<compile_context>
chip_gen: v7x
topology: tpu7x:2x2x1
jax: 0.10.0
libtpu: 0.0.40
codegen_flags: <defaults>
</compile_context>

<pallas_src>
import math
import numpy as np
import jax
import jax.numpy as jnp
from jax.experimental import pallas as pl
from jax.experimental.pallas import tpu as pltpu


_VMEM = pl.BlockSpec(memory_space=pltpu.MemorySpace.VMEM)


def _round8(v):
    return ((v + 7) // 8) * 8


def _sel_matrix(n_rows, n_cols, ph, pw, dst_w, src_w, stride):
    """0/1 matrix: picks pooled/cropped pixel (stride*i, stride*j) out of a flat
    row-width-`src_w` source slab and drops it at interior position (i+1, j+1)
    of the next conv's zero-padded canvas (row width dst_w).  All other rows
    are zero, so the matmul also (re)creates the zero border / tail."""
    S = np.zeros((n_rows, n_cols), dtype=np.float32)
    for i in range(ph):
        for j in range(pw):
            S[(i + 1) * dst_w + (j + 1), stride * i * src_w + stride * j] = 1.0
    return S


def _bilinear_rows(in_h, in_w, out_h, out_w, row_w, n_rows, scale):
    """PyTorch Upsample(bilinear, align_corners=False, scale_factor given) as a
    dense [n_rows, out_h*out_w] matrix over the flat (row width `row_w`)
    conv4-output slab.  Coordinate mapping uses 1/scale (PyTorch >= 1.6
    default when scale_factor is provided and not recomputed)."""
    inv = 1.0 / scale

    def coords(osz, isz):
        d = np.arange(osz, dtype=np.float64)
        src = np.maximum((d + 0.5) * inv - 0.5, 0.0)
        i0 = np.minimum(np.floor(src).astype(np.int64), isz - 1)
        i1 = np.minimum(i0 + 1, isz - 1)
        return i0, i1, src - i0

    h0, h1, lh = coords(out_h, in_h)
    w0, w1, lw = coords(out_w, in_w)
    Bt = np.zeros((n_rows, out_h * out_w), dtype=np.float32)
    for oy in range(out_h):
        for ox in range(out_w):
            q = oy * out_w + ox
            for a, wa in ((h0[oy], 1.0 - lh[oy]), (h1[oy], lh[oy])):
                for b, wb in ((w0[ox], 1.0 - lw[ox]), (w1[ox], lw[ox])):
                    Bt[a * row_w + b, q] += wa * wb
    return Bt


def convnet_forward(params, x):
    N, cin0, H, W = x.shape
    assert cin0 == 1
    f32 = jnp.float32
    CH1, CH2, CH3 = 16, 32, 16

    # ------------- static shape plumbing (Python ints, 8-aligned) -------------
    C1h, C1w = H + 1, W + 1                               # conv1 output
    Q1h, Q1w = (C1h - 2) // 2 + 1, (C1w - 2) // 2 + 1     # maxpool k2 s2
    M1 = C1h * C1w
    K1 = _round8(2 * (Q1h - 1) * C1w + 2 * (Q1w - 1) + 1)  # pool1 max rows
    M1p = _round8(max(M1, K1 + C1w + 2))                  # padded im2col rows

    G2w = Q1w + 2                                         # conv2 canvas row width
    C2h, C2w = Q1h + 1, Q1w + 1
    Q2h, Q2w = C2h - 1, C2w - 1                           # maxpool k2 s1
    K2 = _round8((Q2h - 1) * G2w + (Q2w - 1) + 1)         # pool2 max rows
    L2 = _round8(K2 + G2w + 1)                            # conv2 rows computed
    CAN2 = _round8(L2 + G2w + 1)                          # conv2 canvas rows

    G3w = Q2w + 2
    C3h, C3w = Q2h + 1, Q2w + 1
    U3h, U3w = int(math.floor(C3h * 0.99)), int(math.floor(C3w * 0.99))
    # nearest(0.99): src index == dst index at these sizes -> pure crop
    assert U3h == C3h - 1 and U3w == C3w - 1
    L3 = _round8((U3h - 1) * G3w + (U3w - 1) + 1)         # conv3 rows computed
    CAN3 = _round8(L3 + G3w + 1)

    G4w = U3w + 2
    C4h, C4w = U3h + 1, U3w + 1
    L4 = _round8((C4h - 1) * G4w + (C4w - 1) + 1)         # conv4 rows computed
    CAN4 = _round8(L4 + G4w + 1)
    U4h, U4w = int(math.floor(C4h * 1.97)), int(math.floor(C4w * 1.97))
    UU = U4h * U4w

    # ------- constant gather / interpolation matrices (trace-time numpy) -------
    sel1 = jnp.asarray(_sel_matrix(CAN2, K1, Q1h, Q1w, G2w, C1w, 2), jnp.bfloat16)
    sel2 = jnp.asarray(_sel_matrix(CAN3, K2, Q2h, Q2w, G3w, G2w, 1), jnp.bfloat16)
    sel3 = jnp.asarray(_sel_matrix(CAN4, L3, U3h, U3w, G4w, G3w, 1), jnp.bfloat16)
    bmt = jnp.asarray(_bilinear_rows(C4h, C4w, U4h, U4w, G4w, L4, 1.97))  # f32

    # ---------------- model-boundary layout transforms (tiny) ----------------
    (W1, B1) = params["conv1"]
    (W2, B2) = params["conv2"]
    (W3, B3) = params["conv3"]
    (W4, B4) = params["conv4"]
    w1m = W1.transpose(2, 3, 1, 0).reshape(4, CH1).astype(f32)         # [4, 16]
    w2m = W2.transpose(2, 3, 1, 0).reshape(4 * CH1, CH2).astype(f32)   # [64, 32]
    w3m = W3.transpose(2, 3, 1, 0).reshape(4 * CH2, CH3).astype(f32)   # [128, 16]
    w4m = W4.transpose(2, 3, 0, 1).reshape(4, CH3).astype(f32)         # [4, 16]
    b1m = B1.reshape(1, CH1).astype(f32)
    b2m = B2.reshape(1, CH2).astype(f32)
    b3m = B3.reshape(1, CH3).astype(f32)
    b4m = B4.reshape(1, 1).astype(f32)

    # conv1 im2col (tap-major, matches w1m rows), rows zero-padded to M1p
    xp = jnp.pad(x[:, 0].astype(f32), ((0, 0), (1, 1), (1, 1)))
    taps = [xp[:, di:di + C1h, dj:dj + C1w] for di in (0, 1) for dj in (0, 1)]
    x1 = jnp.stack(taps, axis=-1).reshape(N, M1, 4)
    x1 = jnp.pad(x1, ((0, 0), (0, M1p - M1), (0, 0)))

    s1 = (1, C1w, C1w + 1)
    s2 = (0, 1, G2w, G2w + 1)
    s3 = (0, 1, G3w, G3w + 1)
    s4 = (0, 1, G4w, G4w + 1)

    # --------------------------- fused Pallas kernel ---------------------------
    def kernel(x1_ref, w1_ref, b1_ref, w2_ref, b2_ref, w3_ref, b3_ref,
               w4_ref, b4_ref, sel1_ref, sel2_ref, sel3_ref, bmt_ref, o_ref):
        # layer1: conv(1->16, k2, p1) + ReLU as ONE matmul over the im2col
        h1 = jnp.maximum(
            jnp.dot(x1_ref[0], w1_ref[...], preferred_element_type=f32)
            + b1_ref[...], 0.0)                                      # [M1p, 16]
        # maxpool(k2, s2): shifted-row max, then stride-2 decimation +
        # zero-re-padding into conv2's canvas in one selection matmul.
        p1 = h1[0:K1, :]
        for s in s1:
            p1 = jnp.maximum(p1, h1[s:s + K1, :])
        a2 = jnp.dot(sel1_ref[...].astype(f32), p1,
                     preferred_element_type=f32)                     # [CAN2, 16]

        # layer2: conv(16->32) as a single K=64 tap-concatenated matmul
        c2 = jnp.concatenate([a2[s:s + L2, :] for s in s2], axis=1)  # [L2, 64]
        h2 = jnp.maximum(
            jnp.dot(c2, w2_ref[...], preferred_element_type=f32)
            + b2_ref[...], 0.0)                                      # [L2, 32]
        # maxpool(k2, s1) + re-pack into conv3's zero-padded canvas
        p2 = h2[0:K2, :]
        for s in s2[1:]:
            p2 = jnp.maximum(p2, h2[s:s + K2, :])
        a3 = jnp.dot(sel2_ref[...].astype(f32), p2,
                     preferred_element_type=f32)                     # [CAN3, 32]

        # layer3: conv(32->16) as a single K=128 matmul; nearest(0.99) == crop,
        # fused with re-padding into conv4's canvas via the selection matmul.
        c3 = jnp.concatenate([a3[s:s + L3, :] for s in s3], axis=1)  # [L3, 128]
        h3 = jnp.maximum(
            jnp.dot(c3, w3_ref[...], preferred_element_type=f32)
            + b3_ref[...], 0.0)                                      # [L3, 16]
        a4 = jnp.dot(sel3_ref[...].astype(f32), h3,
                     preferred_element_type=f32)                     # [CAN4, 16]

        # layer4: conv(16->1) + ReLU on the VPU (weighted lane reduce)
        acc = a4[0:L4, :] * w4_ref[0:1, :]
        for t, s in enumerate(s4[1:]):
            acc = acc + a4[s:s + L4, :] * w4_ref[t + 1:t + 2, :]
        h4 = jnp.maximum(jnp.sum(acc, axis=1, keepdims=True)
                         + b4_ref[...], 0.0)                         # [L4, 1]
        # Upsample(1.97, bilinear): broadcast-mul + sublane reduce -> one
        # lane-dense [1, 17*17] output row per sample.
        o_ref[0] = jnp.sum(h4 * bmt_ref[...], axis=0, keepdims=True)

    out = pl.pallas_call(
        kernel,
        out_shape=jax.ShapeDtypeStruct((N, 1, UU), f32),
        grid=(N,),
        in_specs=[pl.BlockSpec((1, M1p, 4), lambda n: (n, 0, 0))] + [_VMEM] * 12,
        out_specs=pl.BlockSpec((1, 1, UU), lambda n: (n, 0, 0)),
        compiler_params=pltpu.CompilerParams(
            dimension_semantics=("parallel",),       # 2 TensorCores on v7x
            vmem_limit_bytes=16 * 1024 * 1024),
    )(x1, w1m, b1m, w2m, b2m, w3m, b3m, w4m, b4m, sel1, sel2, sel3, bmt)

    # boundary transform back to NCHW
    return out.reshape(N, 1, U4h, U4w)


# --------------------------------- parameters ---------------------------------

def init_params(key):
    def init_conv(k, cout, cin):
        k1, k2 = jax.random.split(k)
        fan_in = cin * 2 * 2
        bound = 1.0 / math.sqrt(fan_in)
        Wc = jax.random.uniform(k1, (cout, cin, 2, 2), jnp.float32, -bound, bound)
        bc = jax.random.uniform(k2, (cout,), jnp.float32, -bound, bound)
        return Wc, bc

    k1, k2, k3, k4 = jax.random.split(key, 4)
    return {
        "conv1": init_conv(k1, 16, 1),
        "conv2": init_conv(k2, 32, 16),
        "conv3": init_conv(k3, 16, 32),
        "conv4": init_conv(k4, 1, 16),
    }


if __name__ == "__main__":
    key = jax.random.PRNGKey(0)
    pkey, xkey = jax.random.split(key)
    params = init_params(pkey)
    x = jax.random.normal(xkey, (2, 1, 16, 16), jnp.float32)   # NCHW, 1 channel

    fwd = jax.jit(convnet_forward)
    y = jax.block_until_ready(fwd(params, x))

    # shape trace: 16 -> conv 17 -> pool/2 8 -> conv 9 -> pool/1 8
    #              -> conv 9 -> nearest(0.99) 8 -> conv 9 -> bilinear(1.97) 17
    assert y.shape == (2, 1, 17, 17), y.shape
    assert y.dtype == jnp.float32
    assert bool(jnp.all(jnp.isfinite(y)))
    assert bool(jnp.all(y >= 0.0))     # ReLU output through non-negative bilinear
    print("KERNEL_OK")
</pallas_src>

<mosaic_0001>
module attributes {stable_mosaic.version = 11 : i64} {
  func.func @kernel(%arg0: i32, %arg1: memref<1x296x4xf32, #tpu.memory_space<vmem>>, %arg2: memref<4x16xf32, #tpu.memory_space<vmem>>, %arg3: memref<1x16xf32, #tpu.memory_space<vmem>>, %arg4: memref<64x32xf32, #tpu.memory_space<vmem>>, %arg5: memref<1x32xf32, #tpu.memory_space<vmem>>, %arg6: memref<128x16xf32, #tpu.memory_space<vmem>>, %arg7: memref<1x16xf32, #tpu.memory_space<vmem>>, %arg8: memref<4x16xf32, #tpu.memory_space<vmem>>, %arg9: memref<1x1xf32, #tpu.memory_space<vmem>>, %arg10: memref<112x256xbf16, #tpu.memory_space<vmem>>, %arg11: memref<96x80xbf16, #tpu.memory_space<vmem>>, %arg12: memref<112x80xbf16, #tpu.memory_space<vmem>>, %arg13: memref<96x289xf32, #tpu.memory_space<vmem>>, %arg14: memref<1x1x289xf32, #tpu.memory_space<vmem>>) attributes {dimension_semantics = [#tpu.dimension_semantics<parallel>], iteration_bounds = array<i64: 2>, scalar_prefetch = 0 : i64, scratch_operands = 0 : i64, tpu.core_type = #tpu.core_type<tc>, window_params = [{transform_indices = @transform_0, window_bounds = array<i64: 1, 296, 4>}, {pipeline_mode = #tpu.pipeline_mode<synchronous>, transform_indices = @transform_1, window_bounds = array<i64: 4, 16>}, {pipeline_mode = #tpu.pipeline_mode<synchronous>, transform_indices = @transform_2, window_bounds = array<i64: 1, 16>}, {pipeline_mode = #tpu.pipeline_mode<synchronous>, transform_indices = @transform_3, window_bounds = array<i64: 64, 32>}, {pipeline_mode = #tpu.pipeline_mode<synchronous>, transform_indices = @transform_4, window_bounds = array<i64: 1, 32>}, {pipeline_mode = #tpu.pipeline_mode<synchronous>, transform_indices = @transform_5, window_bounds = array<i64: 128, 16>}, {pipeline_mode = #tpu.pipeline_mode<synchronous>, transform_indices = @transform_6, window_bounds = array<i64: 1, 16>}, {pipeline_mode = #tpu.pipeline_mode<synchronous>, transform_indices = @transform_7, window_bounds = array<i64: 4, 16>}, {pipeline_mode = #tpu.pipeline_mode<synchronous>, transform_indices = @transform_8, window_bounds = array<i64: 1, 1>}, {pipeline_mode = #tpu.pipeline_mode<synchronous>, transform_indices = @transform_9, window_bounds = array<i64: 112, 256>}, {pipeline_mode = #tpu.pipeline_mode<synchronous>, transform_indices = @transform_10, window_bounds = array<i64: 96, 80>}, {pipeline_mode = #tpu.pipeline_mode<synchronous>, transform_indices = @transform_11, window_bounds = array<i64: 112, 80>}, {pipeline_mode = #tpu.pipeline_mode<synchronous>, transform_indices = @transform_12, window_bounds = array<i64: 96, 289>}, {transform_indices = @transform_13, window_bounds = array<i64: 1, 1, 289>}]} {
    %c0 = arith.constant 0 : index
    %c0_0 = arith.constant 0 : index
    %c0_1 = arith.constant 0 : index
    %0 = vector.load %arg1[%c0, %c0_0, %c0_1] : memref<1x296x4xf32, #tpu.memory_space<vmem>>, vector<1x296x4xf32>
    %1 = vector.shape_cast %0 : vector<1x296x4xf32> to vector<296x4xf32>
    %c0_2 = arith.constant 0 : index
    %c0_3 = arith.constant 0 : index
    %2 = vector.load %arg2[%c0_2, %c0_3] : memref<4x16xf32, #tpu.memory_space<vmem>>, vector<4x16xf32>
    %cst = arith.constant dense<0.000000e+00> : vector<296x16xf32>
    %3 = tpu.matmul %1, %2, %cst {dimension_numbers = #tpu.dot_dimension_numbers<[1], [0], [0], [1], [0, 0, 1, 1], [], []>} : vector<296x4xf32>, vector<4x16xf32>, vector<296x16xf32> -> vector<296x16xf32>
    %c0_4 = arith.constant 0 : index
    %c0_5 = arith.constant 0 : index
    %4 = vector.load %arg3[%c0_4, %c0_5] : memref<1x16xf32, #tpu.memory_space<vmem>>, vector<1x16xf32>
    %5 = vector.broadcast %4 : vector<1x16xf32> to vector<296x16xf32>
    %6 = arith.addf %3, %5 : vector<296x16xf32>
    %cst_6 = arith.constant 0.000000e+00 : f32
    %7 = vector.broadcast %cst_6 : f32 to vector<296x16xf32>
    %8 = arith.maximumf %6, %7 : vector<296x16xf32>
    %9 = vector.extract_strided_slice %8 {offsets = [0, 0], sizes = [256, 16], strides = [1, 1]} : vector<296x16xf32> to vector<256x16xf32>
    %10 = vector.extract_strided_slice %8 {offsets = [1, 0], sizes = [256, 16], strides = [1, 1]} : vector<296x16xf32> to vector<256x16xf32>
    %11 = arith.maximumf %9, %10 : vector<256x16xf32>
    %12 = vector.extract_strided_slice %8 {offsets = [17, 0], sizes = [256, 16], strides = [1, 1]} : vector<296x16xf32> to vector<256x16xf32>
    %13 = arith.maximumf %11, %12 : vector<256x16xf32>
    %14 = vector.extract_strided_slice %8 {offsets = [18, 0], sizes = [256, 16], strides = [1, 1]} : vector<296x16xf32> to vector<256x16xf32>
    %15 = arith.maximumf %13, %14 : vector<256x16xf32>
    %c0_7 = arith.constant 0 : index
    %c0_8 = arith.constant 0 : index
    %16 = vector.load %arg10[%c0_7, %c0_8] : memref<112x256xbf16, #tpu.memory_space<vmem>>, vector<112x256xbf16>
    %17 = arith.extf %16 : vector<112x256xbf16> to vector<112x256xf32>
    %cst_9 = arith.constant dense<0.000000e+00> : vector<112x16xf32>
    %18 = tpu.matmul %17, %15, %cst_9 {dimension_numbers = #tpu.dot_dimension_numbers<[1], [0], [0], [1], [0, 0, 1, 1], [], []>} : vector<112x256xf32>, vector<256x16xf32>, vector<112x16xf32> -> vector<112x16xf32>
    %19 = vector.extract_strided_slice %18 {offsets = [0, 0], sizes = [96, 16], strides = [1, 1]} : vector<112x16xf32> to vector<96x16xf32>
    %20 = vector.extract_strided_slice %18 {offsets = [1, 0], sizes = [96, 16], strides = [1, 1]} : vector<112x16xf32> to vector<96x16xf32>
    %21 = vector.extract_strided_slice %18 {offsets = [10, 0], sizes = [96, 16], strides = [1, 1]} : vector<112x16xf32> to vector<96x16xf32>
    %22 = vector.extract_strided_slice %18 {offsets = [11, 0], sizes = [96, 16], strides = [1, 1]} : vector<112x16xf32> to vector<96x16xf32>
    %23 = tpu.concatenate %19, %20, %21, %22 in 1 : vector<96x16xf32>, vector<96x16xf32>, vector<96x16xf32>, vector<96x16xf32> -> vector<96x64xf32>
    %c0_10 = arith.constant 0 : index
    %c0_11 = arith.constant 0 : index
    %24 = vector.load %arg4[%c0_10, %c0_11] : memref<64x32xf32, #tpu.memory_space<vmem>>, vector<64x32xf32>
    %cst_12 = arith.constant dense<0.000000e+00> : vector<96x32xf32>
    %25 = tpu.matmul %23, %24, %cst_12 {dimension_numbers = #tpu.dot_dimension_numbers<[1], [0], [0], [1], [0, 0, 1, 1], [], []>} : vector<96x64xf32>, vector<64x32xf32>, vector<96x32xf32> -> vector<96x32xf32>
    %c0_13 = arith.constant 0 : index
    %c0_14 = arith.constant 0 : index
    %26 = vector.load %arg5[%c0_13, %c0_14] : memref<1x32xf32, #tpu.memory_space<vmem>>, vector<1x32xf32>
    %27 = vector.broadcast %26 : vector<1x32xf32> to vector<96x32xf32>
    %28 = arith.addf %25, %27 : vector<96x32xf32>
    %cst_15 = arith.constant 0.000000e+00 : f32
    %29 = vector.broadcast %cst_15 : f32 to vector<96x32xf32>
    %30 = arith.maximumf %28, %29 : vector<96x32xf32>
    %31 = vector.extract_strided_slice %30 {offsets = [0, 0], sizes = [80, 32], strides = [1, 1]} : vector<96x32xf32> to vector<80x32xf32>
    %32 = vector.extract_strided_slice %30 {offsets = [1, 0], sizes = [80, 32], strides = [1, 1]} : vector<96x32xf32> to vector<80x32xf32>
    %33 = arith.maximumf %31, %32 : vector<80x32xf32>
    %34 = vector.extract_strided_slice %30 {offsets = [10, 0], sizes = [80, 32], strides = [1, 1]} : vector<96x32xf32> to vector<80x32xf32>
    %35 = arith.maximumf %33, %34 : vector<80x32xf32>
    %36 = vector.extract_strided_slice %30 {offsets = [11, 0], sizes = [80, 32], strides = [1, 1]} : vector<96x32xf32> to vector<80x32xf32>
    %37 = arith.maximumf %35, %36 : vector<80x32xf32>
    %c0_16 = arith.constant 0 : index
    %c0_17 = arith.constant 0 : index
    %38 = vector.load %arg11[%c0_16, %c0_17] : memref<96x80xbf16, #tpu.memory_space<vmem>>, vector<96x80xbf16>
    %39 = arith.extf %38 : vector<96x80xbf16> to vector<96x80xf32>
    %cst_18 = arith.constant dense<0.000000e+00> : vector<96x32xf32>
    %40 = tpu.matmul %39, %37, %cst_18 {dimension_numbers = #tpu.dot_dimension_numbers<[1], [0], [0], [1], [0, 0, 1, 1], [], []>} : vector<96x80xf32>, vector<80x32xf32>, vector<96x32xf32> -> vector<96x32xf32>
    %41 = vector.extract_strided_slice %40 {offsets = [0, 0], sizes = [80, 32], strides = [1, 1]} : vector<96x32xf32> to vector<80x32xf32>
    %42 = vector.extract_strided_slice %40 {offsets = [1, 0], sizes = [80, 32], strides = [1, 1]} : vector<96x32xf32> to vector<80x32xf32>
    %43 = vector.extract_strided_slice %40 {offsets = [10, 0], sizes = [80, 32], strides = [1, 1]} : vector<96x32xf32> to vector<80x32xf32>
    %44 = vector.extract_strided_slice %40 {offsets = [11, 0], sizes = [80, 32], strides = [1, 1]} : vector<96x32xf32> to vector<80x32xf32>
    %45 = tpu.concatenate %41, %42, %43, %44 in 1 : vector<80x32xf32>, vector<80x32xf32>, vector<80x32xf32>, vector<80x32xf32> -> vector<80x128xf32>
    %c0_19 = arith.constant 0 : index
    %c0_20 = arith.constant 0 : index
    %46 = vector.load %arg6[%c0_19, %c0_20] : memref<128x16xf32, #tpu.memory_space<vmem>>, vector<128x16xf32>
    %cst_21 = arith.constant dense<0.000000e+00> : vector<80x16xf32>
    %47 = tpu.matmul %45, %46, %cst_21 {dimension_numbers = #tpu.dot_dimension_numbers<[1], [0], [0], [1], [0, 0, 1, 1], [], []>} : vector<80x128xf32>, vector<128x16xf32>, vector<80x16xf32> -> vector<80x16xf32>
    %c0_22 = arith.constant 0 : index
    %c0_23 = arith.constant 0 : index
    %48 = vector.load %arg7[%c0_22, %c0_23] : memref<1x16xf32, #tpu.memory_space<vmem>>, vector<1x16xf32>
    %49 = vector.broadcast %48 : vector<1x16xf32> to vector<80x16xf32>
    %50 = arith.addf %47, %49 : vector<80x16xf32>
    %cst_24 = arith.constant 0.000000e+00 : f32
    %51 = vector.broadcast %cst_24 : f32 to vector<80x16xf32>
    %52 = arith.maximumf %50, %51 : vector<80x16xf32>
    %c0_25 = arith.constant 0 : index
    %c0_26 = arith.constant 0 : index
    %53 = vector.load %arg12[%c0_25, %c0_26] : memref<112x80xbf16, #tpu.memory_space<vmem>>, vector<112x80xbf16>
    %54 = arith.extf %53 : vector<112x80xbf16> to vector<112x80xf32>
    %cst_27 = arith.constant dense<0.000000e+00> : vector<112x16xf32>
    %55 = tpu.matmul %54, %52, %cst_27 {dimension_numbers = #tpu.dot_dimension_numbers<[1], [0], [0], [1], [0, 0, 1, 1], [], []>} : vector<112x80xf32>, vector<80x16xf32>, vector<112x16xf32> -> vector<112x16xf32>
    %56 = vector.extract_strided_slice %55 {offsets = [0, 0], sizes = [96, 16], strides = [1, 1]} : vector<112x16xf32> to vector<96x16xf32>
    %c0_28 = arith.constant 0 : index
    %c0_29 = arith.constant 0 : index
    %57 = vector.load %arg8[%c0_28, %c0_29] : memref<4x16xf32, #tpu.memory_space<vmem>>, vector<1x16xf32>
    %58 = vector.broadcast %57 : vector<1x16xf32> to vector<96x16xf32>
    %59 = arith.mulf %56, %58 : vector<96x16xf32>
    %60 = vector.extract_strided_slice %55 {offsets = [1, 0], sizes = [96, 16], strides = [1, 1]} : vector<112x16xf32> to vector<96x16xf32>
    %c1 = arith.constant 1 : index
    %c0_30 = arith.constant 0 : index
    %61 = vector.load %arg8[%c1, %c0_30] : memref<4x16xf32, #tpu.memory_space<vmem>>, vector<1x16xf32>
    %62 = vector.broadcast %61 : vector<1x16xf32> to vector<96x16xf32>
    %63 = arith.mulf %60, %62 : vector<96x16xf32>
    %64 = arith.addf %59, %63 : vector<96x16xf32>
    %65 = vector.extract_strided_slice %55 {offsets = [10, 0], sizes = [96, 16], strides = [1, 1]} : vector<112x16xf32> to vector<96x16xf32>
    %c2 = arith.constant 2 : index
    %c0_31 = arith.constant 0 : index
    %66 = vector.load %arg8[%c2, %c0_31] : memref<4x16xf32, #tpu.memory_space<vmem>>, vector<1x16xf32>
    %67 = vector.broadcast %66 : vector<1x16xf32> to vector<96x16xf32>
    %68 = arith.mulf %65, %67 : vector<96x16xf32>
    %69 = arith.addf %64, %68 : vector<96x16xf32>
    %70 = vector.extract_strided_slice %55 {offsets = [11, 0], sizes = [96, 16], strides = [1, 1]} : vector<112x16xf32> to vector<96x16xf32>
    %c3 = arith.constant 3 : index
    %c0_32 = arith.constant 0 : index
    %71 = vector.load %arg8[%c3, %c0_32] : memref<4x16xf32, #tpu.memory_space<vmem>>, vector<1x16xf32>
    %72 = vector.broadcast %71 : vector<1x16xf32> to vector<96x16xf32>
    %73 = arith.mulf %70, %72 : vector<96x16xf32>
    %74 = arith.addf %69, %73 : vector<96x16xf32>
    %cst_33 = arith.constant dense<0.000000e+00> : vector<96xf32>
    %75 = vector.multi_reduction <add>, %74, %cst_33 [1] : vector<96x16xf32> to vector<96xf32>
    %76 = vector.shape_cast %75 : vector<96xf32> to vector<96x1xf32>
    %c0_34 = arith.constant 0 : index
    %c0_35 = arith.constant 0 : index
    %77 = vector.load %arg9[%c0_34, %c0_35] : memref<1x1xf32, #tpu.memory_space<vmem>>, vector<1x1xf32>
    %78 = vector.broadcast %77 : vector<1x1xf32> to vector<96x1xf32>
    %79 = arith.addf %76, %78 : vector<96x1xf32>
    %cst_36 = arith.constant 0.000000e+00 : f32
    %80 = vector.broadcast %cst_36 : f32 to vector<96x1xf32>
    %81 = arith.maximumf %79, %80 : vector<96x1xf32>
    %c0_37 = arith.constant 0 : index
    %c0_38 = arith.constant 0 : index
    %82 = vector.load %arg13[%c0_37, %c0_38] : memref<96x289xf32, #tpu.memory_space<vmem>>, vector<96x289xf32>
    %83 = vector.broadcast %81 : vector<96x1xf32> to vector<96x289xf32>
    %84 = arith.mulf %83, %82 : vector<96x289xf32>
    %cst_39 = arith.constant dense<0.000000e+00> : vector<289xf32>
    %85 = vector.multi_reduction <add>, %84, %cst_39 [0] : vector<96x289xf32> to vector<289xf32>
    %86 = vector.shape_cast %85 : vector<289xf32> to vector<1x289xf32>
    %c0_40 = arith.constant 0 : index
    %c0_41 = arith.constant 0 : index
    %c0_42 = arith.constant 0 : index
    %87 = vector.load %arg14[%c0_40, %c0_41, %c0_42] : memref<1x1x289xf32, #tpu.memory_space<vmem>>, vector<1x1x289xf32>
    %88 = vector.shape_cast %87 : vector<1x1x289xf32> to vector<1x289xf32>
    %89 = vector.shape_cast %86 : vector<1x289xf32> to vector<1x1x289xf32>
    tpu.vector_store %arg14[%c0_40, %c0_41, %c0_42], %89 {strides = array<i32>} : memref<1x1x289xf32, #tpu.memory_space<vmem>>, vector<1x1x289xf32>,
    return
  }
  func.func @transform_0(%arg0: i32) -> (i32, i32, i32) {
    %c0_i32 = arith.constant 0 : i32
    %c0_i32_0 = arith.constant 0 : i32
    %c0_i32_1 = arith.constant 0 : i32
    return %arg0, %c0_i32, %c0_i32_0 : i32, i32, i32
  }
  func.func @transform_1(%arg0: i32) -> (i32, i32) {
    %c0_i32 = arith.constant 0 : i32
    %c0_i32_0 = arith.constant 0 : i32
    %c0_i32_1 = arith.constant 0 : i32
    return %c0_i32, %c0_i32_0 : i32, i32
  }
  func.func @transform_2(%arg0: i32) -> (i32, i32) {
    %c0_i32 = arith.constant 0 : i32
    %c0_i32_0 = arith.constant 0 : i32
    %c0_i32_1 = arith.constant 0 : i32
    return %c0_i32, %c0_i32_0 : i32, i32
  }
  func.func @transform_3(%arg0: i32) -> (i32, i32) {
    %c0_i32 = arith.constant 0 : i32
    %c0_i32_0 = arith.constant 0 : i32
    %c0_i32_1 = arith.constant 0 : i32
    return %c0_i32, %c0_i32_0 : i32, i32
  }
  func.func @transform_4(%arg0: i32) -> (i32, i32) {
    %c0_i32 = arith.constant 0 : i32
    %c0_i32_0 = arith.constant 0 : i32
    %c0_i32_1 = arith.constant 0 : i32
    return %c0_i32, %c0_i32_0 : i32, i32
  }
  func.func @transform_5(%arg0: i32) -> (i32, i32) {
    %c0_i32 = arith.constant 0 : i32
    %c0_i32_0 = arith.constant 0 : i32
    %c0_i32_1 = arith.constant 0 : i32
    return %c0_i32, %c0_i32_0 : i32, i32
  }
  func.func @transform_6(%arg0: i32) -> (i32, i32) {
    %c0_i32 = arith.constant 0 : i32
    %c0_i32_0 = arith.constant 0 : i32
    %c0_i32_1 = arith.constant 0 : i32
    return %c0_i32, %c0_i32_0 : i32, i32
  }
  func.func @transform_7(%arg0: i32) -> (i32, i32) {
    %c0_i32 = arith.constant 0 : i32
    %c0_i32_0 = arith.constant 0 : i32
    %c0_i32_1 = arith.constant 0 : i32
    return %c0_i32, %c0_i32_0 : i32, i32
  }
  func.func @transform_8(%arg0: i32) -> (i32, i32) {
    %c0_i32 = arith.constant 0 : i32
    %c0_i32_0 = arith.constant 0 : i32
    %c0_i32_1 = arith.constant 0 : i32
    return %c0_i32, %c0_i32_0 : i32, i32
  }
  func.func @transform_9(%arg0: i32) -> (i32, i32) {
    %c0_i32 = arith.constant 0 : i32
    %c0_i32_0 = arith.constant 0 : i32
    %c0_i32_1 = arith.constant 0 : i32
    return %c0_i32, %c0_i32_0 : i32, i32
  }
  func.func @transform_10(%arg0: i32) -> (i32, i32) {
    %c0_i32 = arith.constant 0 : i32
    %c0_i32_0 = arith.constant 0 : i32
    %c0_i32_1 = arith.constant 0 : i32
    return %c0_i32, %c0_i32_0 : i32, i32
  }
  func.func @transform_11(%arg0: i32) -> (i32, i32) {
    %c0_i32 = arith.constant 0 : i32
    %c0_i32_0 = arith.constant 0 : i32
    %c0_i32_1 = arith.constant 0 : i32
    return %c0_i32, %c0_i32_0 : i32, i32
  }
  func.func @transform_12(%arg0: i32) -> (i32, i32) {
    %c0_i32 = arith.constant 0 : i32
    %c0_i32_0 = arith.constant 0 : i32
    %c0_i32_1 = arith.constant 0 : i32
    return %c0_i32, %c0_i32_0 : i32, i32
  }
  func.func @transform_13(%arg0: i32) -> (i32, i32, i32) {
    %c0_i32 = arith.constant 0 : i32
    %c0_i32_0 = arith.constant 0 : i32
    %c0_i32_1 = arith.constant 0 : i32
    return %arg0, %c0_i32, %c0_i32_0 : i32, i32, i32
  }
}

</mosaic_0001>

<bundles_post_ra>
// kernel: convnet_forward.1
= control target key start
LH: loop header
LB: loop body
LE: loop exit
PB: predicated region body
PF: predicated region fallthrough
CT: control target
= control target key end

     0   :  { %s4244_s27 = smov 0   ;;  %s5489_s0 = inlined_call_operand.vmem [shape: f32[2,296,4], index: 0, kind: input, shape index: {}]   ;;  %s5490_s1 = inlined_call_operand.vmem [shape: f32[4,16], index: 1, kind: input, shape index: {}]   ;;  %s5491_s2 = inlined_call_operand.vmem [shape: f32[1,16], index: 2, kind: input, shape index: {}]   ;;  %s5492_s3 = inlined_call_operand.vmem [shape: f32[64,32], index: 3, kind: input, shape index: {}]   ;;  %s5493_s4 = inlined_call_operand.vmem [shape: f32[1,32], index: 4, kind: input, shape index: {}]   ;;  %s5494_s5 = inlined_call_operand.vmem [shape: f32[128,16], index: 5, kind: input, shape index: {}]   ;;  %s5495_s6 = inlined_call_operand.vmem [shape: f32[1,16], index: 6, kind: input, shape index: {}]   ;;  %s5496_s7 = inlined_call_operand.vmem [shape: f32[4,16], index: 7, kind: input, shape index: {}]   ;;  %s5497_s8 = inlined_call_operand.<no memory space> [shape: f32[1,1], index: 8, kind: input, shape index: {}]   ;;  %s5498_s9 = inlined_call_operand.vmem [shape: bf16[112,256], index: 9, kind: input, shape index: {}]   ;;  %s5499_s10 = inlined_call_operand.vmem [shape: bf16[96,80], index: 10, kind: input, shape index: {}]   ;;  %s5500_s11 = inlined_call_operand.vmem [shape: bf16[112,80], index: 11, kind: input, shape index: {}]   ;;  %s5501_s12 = inlined_call_operand.vmem [shape: f32[96,289], index: 12, kind: input, shape index: {}]   ;;  %s5502_s13 = inlined_call_operand.vmem [shape: f32[2,1,289], index: 13, kind: output, shape index: {}]  }
   0x1   :  { %v18_v0 = vstv %s5497_s8 }
   0x2   :  { %19 = vst [vmem:[#allocation2] sm:$0x1] %v18_v0 }
   0x3 LB: > { %s3296_s28 = sadd.s32 4294967295, %s4160_s27   ;;  %p3300_p0 = scmp.ge.s32.totalorder %s4160_s27, 1  ;;  %s4160_s27 = sphi %s4244_s27, %s25_s27  }
   0x4   : > { %p389_p1 = scmp.lt.s32.totalorder %s4160_s27, 3 }
   0x6   : > { %p390_p2 = pnand %p3300_p0, %p389_p1 }
   0x7   : > { %v478_v1 = vld [vmem:[%s5490_s1] sm:$0xf] (!%p390_p2)  ;;  %vm598_vm0 = vcmask (!%p390_p2), 1043456   ;;  %p432_p3 = scmp.lt.s32.totalorder (!%p390_p2), %s3296_s28, 1  ;;  %v4162_v2 = vmov (!%p390_p2), 0.0   ;;  %vm4163_vm1 = vmmov (!%p390_p2), 0  }
   0x8   : > { %393 = sbr.rel (%p390_p2) target bundleno = 2185 (0x889), region = 72  ;;  %3655 = vmatprep.subr.mxu0 (!%p390_p2), %v4162_v2  ;;  %3657 = vmatprep.mubr.msk.f32.mxu0 (!%p390_p2), %vm4163_vm1, %v4162_v2  ;;  %vm486_vm2 = vcmask (!%p390_p2), 31744   ;;  %v4409_v38 = vld [vmem:[%s5491_s2] ss:$0 sm:$0xff] (!%p390_p2)  ;;  %vm918_vm3 = vcmask (!%p390_p2), 1046528   ;;  %vm1088_vm4 = vcmask (!%p390_p2), 1045504  }
   0x9   : > { %3656 = vmatpush3.msk.msra.mxu0 (!%p390_p2), %vm598_vm0, %v478_v1  ;;  %s4164_s18 = smov (!%p390_p2), 16   ;;  %s4165_s19 = smov (!%p390_p2), 32   ;;  %vm1531_vm5 = vcmask (!%p390_p2), 1044480   ;;  %vm1593_vm6 = vcmask (!%p390_p2), 130048   ;;  %vm1606_vm7 = vcmask (!%p390_p2), 261120   ;;  %vm1619_vm8 = vcmask (!%p390_p2), 392192  }
   0xa   : > { %s4166_s20 = smov (!%p390_p2), 48   ;;  %vm1647_vm9 = vcmask (!%p390_p2), 523264   ;;  %vm1980_vm10 = vcmask (!%p390_p2), 654336   ;;  %s4167_s25 = smov (!%p390_p2), 64   ;;  %vm2327_vm11 = vcmask (!%p390_p2), 785408   ;;  %vm3181_vm12 = vcmask (!%p390_p2), 269312  }
   0xb   : > { %s4168_s26 = smov (!%p390_p2), 96  }
   0xf   : > { %s5504_s28 = smov (!%p432_p3, %s3296_s28), 1 }
  0x10   : > { %s4058_s8 = smul.u32 296, %s5504_s28 }
  0x12   : > { %s4264_s16 = scalar_lea.vmem %s5489_s0, %s4058_s8 }
  0x13   : > { %v441_v3 = vld [vmem:[%s4264_s16] sm:$0xff]  ;;  %v442_v4 = vld [vmem:[%s4264_s16 + $0x8] sm:$0xff]  ;;  %v443_v5 = vld [vmem:[%s4264_s16 + $0x10] sm:$0xff] }
  0x14   : > { %3658 = vmatmul.mubr.msk.f32.vlgmr.msra.gmra.mrb[0].mxu0 %vm486_vm2, %v441_v3  ;;  %v444_v6 = vld [vmem:[%s4264_s16 + $0x18] sm:$0xff]  ;;  %v445_v7 = vld [vmem:[%s4264_s16 + $0x20] sm:$0xff]  ;;  %v446_v8 = vld [vmem:[%s4264_s16 + $0x28] sm:$0xff] }
  0x15   : > { %3660 = vmatprep.mubr.msk.f32.mxu0 %vm4163_vm1, %v4162_v2  ;;  %v447_v9 = vld [vmem:[%s4264_s16 + $0x30] sm:$0xff]  ;;  %v448_v10 = vld [vmem:[%s4264_s16 + $0x38] sm:$0xff]  ;;  %v449_v11 = vld [vmem:[%s4264_s16 + $0x40] sm:$0xff] }
  0x16   : > { %v450_v12 = vld [vmem:[%s4264_s16 + $0x48] sm:$0xff]  ;;  %v451_v13 = vld [vmem:[%s4264_s16 + $0x50] sm:$0xff]  ;;  %v452_v14 = vld [vmem:[%s4264_s16 + $0x58] sm:$0xff] }
  0x17   : > { %v453_v15 = vld [vmem:[%s4264_s16 + $0x60] sm:$0xff]  ;;  %v454_v16 = vld [vmem:[%s4264_s16 + $0x68] sm:$0xff]  ;;  %v455_v17 = vld [vmem:[%s4264_s16 + $0x70] sm:$0xff] }
  0x18   : > { %3661 = vmatmul.mubr.msk.f32.gmra.mrb[2].mxu0 %vm486_vm2, %v442_v4  ;;  %v456_v18 = vld [vmem:[%s4264_s16 + $0x78] sm:$0xff]  ;;  %v457_v19 = vld [vmem:[%s4264_s16 + $0x80] sm:$0xff]  ;;  %v458_v20 = vld [vmem:[%s4264_s16 + $0x88] sm:$0xff] }
  0x19   : > { %3663 = vmatprep.mubr.msk.f32.mxu0 %vm4163_vm1, %v4162_v2  ;;  %v459_v21 = vld [vmem:[%s4264_s16 + $0x90] sm:$0xff]  ;;  %v460_v22 = vld [vmem:[%s4264_s16 + $0x98] sm:$0xff]  ;;  %v461_v23 = vld [vmem:[%s4264_s16 + $0xa0] sm:$0xff] }
  0x1a   : > { %v462_v24 = vld [vmem:[%s4264_s16 + $0xa8] sm:$0xff]  ;;  %v463_v25 = vld [vmem:[%s4264_s16 + $0xb0] sm:$0xff]  ;;  %v464_v26 = vld [vmem:[%s4264_s16 + $0xb8] sm:$0xff] }
  0x1b   : > { %v465_v27 = vld [vmem:[%s4264_s16 + $0xc0] sm:$0xff]  ;;  %v466_v28 = vld [vmem:[%s4264_s16 + $0xc8] sm:$0xff]  ;;  %v467_v29 = vld [vmem:[%s4264_s16 + $0xd0] sm:$0xff] }
  0x1c   : > { %3664 = vmatmul.mubr.msk.f32.gmra.mrb[4].mxu0 %vm486_vm2, %v443_v5  ;;  %v468_v30 = vld [vmem:[%s4264_s16 + $0xd8] sm:$0xff]  ;;  %v469_v31 = vld [vmem:[%s4264_s16 + $0xe0] sm:$0xff]  ;;  %v470_v32 = vld [vmem:[%s4264_s16 + $0xe8] sm:$0xff] }
  0x1d   : > { %3666 = vmatprep.mubr.msk.f32.mxu0 %vm4163_vm1, %v4162_v2  ;;  %v471_v33 = vld [vmem:[%s4264_s16 + $0xf0] sm:$0xff]  ;;  %v472_v34 = vld [vmem:[%s4264_s16 + $0xf8] sm:$0xff]  ;;  %v473_v35 = vld [vmem:[%s4264_s16 + $0x100] sm:$0xff] }
  0x1e   : > { %v474_v36 = vld [vmem:[%s4264_s16 + $0x108] sm:$0xff]  ;;  %v475_v37 = vld [vmem:[%s4264_s16 + $0x110] sm:$0xff] }
  0x20   : > { %3667 = vmatmul.mubr.msk.f32.gmra.mrb[6].mxu0 %vm486_vm2, %v444_v6 }
  0x21   : > { %3669 = vmatprep.mubr.msk.f32.mxu0 %vm4163_vm1, %v4162_v2 }
  0x24   : > { %3670 = vmatmul.mubr.msk.f32.gmra.mrb[8].mxu0 %vm486_vm2, %v445_v7 }
  0x25   : > { %3672 = vmatprep.mubr.msk.f32.mxu0 %vm4163_vm1, %v4162_v2 }
  0x28   : > { %3673 = vmatmul.mubr.msk.f32.gmra.mrb[10].mxu0 %vm486_vm2, %v446_v8 }
  0x29   : > { %3675 = vmatprep.mubr.msk.f32.mxu0 %vm4163_vm1, %v4162_v2 }
  0x2c   : > { %3676 = vmatmul.mubr.msk.f32.gmra.mrb[12].mxu0 %vm486_vm2, %v447_v9 }
  0x2d   : > { %3678 = vmatprep.mubr.msk.f32.mxu0 %vm4163_vm1, %v4162_v2 }
  0x30   : > { %3679 = vmatmul.mubr.msk.f32.gmra.mrb[14].mxu0 %vm486_vm2, %v448_v10 }
  0x31   : > { %3681 = vmatprep.mubr.msk.f32.mxu0 %vm4163_vm1, %v4162_v2 }
  0x34   : > { %3682 = vmatmul.mubr.msk.f32.gmra.mrb[16].mxu0 %vm486_vm2, %v449_v11 }
  0x35   : > { %3684 = vmatprep.mubr.msk.f32.mxu0 %vm4163_vm1, %v4162_v2 }
  0x38   : > { %3685 = vmatmul.mubr.msk.f32.gmra.mrb[18].mxu0 %vm486_vm2, %v450_v12 }
  0x39   : > { %3687 = vmatprep.mubr.msk.f32.mxu0 %vm4163_vm1, %v4162_v2 }
  0x3c   : > { %3688 = vmatmul.mubr.msk.f32.gmra.mrb[20].mxu0 %vm486_vm2, %v451_v13 }
  0x3d   : > { %3690 = vmatprep.mubr.msk.f32.mxu0 %vm4163_vm1, %v4162_v2 }
  0x40   : > { %3691 = vmatmul.mubr.msk.f32.gmra.mrb[22].mxu0 %vm486_vm2, %v452_v14 }
  0x41   : > { %3693 = vmatprep.mubr.msk.f32.mxu0 %vm4163_vm1, %v4162_v2 }
  0x44   : > { %3694 = vmatmul.mubr.msk.f32.gmra.mrb[24].mxu0 %vm486_vm2, %v453_v15 }
  0x45   : > { %3696 = vmatprep.mubr.msk.f32.mxu0 %vm4163_vm1, %v4162_v2 }
  0x48   : > { %3697 = vmatmul.mubr.msk.f32.gmra.mrb[26].mxu0 %vm486_vm2, %v454_v16  ;;  %v4426_v16 = vld [vmem:[%s5498_s9] sm:$0xff] }
  0x49   : > { %3699 = vmatprep.mubr.msk.f32.mxu0 %vm4163_vm1, %v4162_v2 }
  0x4c   : > { %3700 = vmatmul.mubr.msk.f32.gmra.mrb[28].mxu0 %vm486_vm2, %v455_v17 }
  0x4d   : > { %3702 = vmatprep.mubr.msk.f32.mxu0 %vm4163_vm1, %v4162_v2 }
  0x50   : > { %3703 = vmatmul.mubr.msk.f32.gmra.mrb[30].mxu0 %vm486_vm2, %v456_v18 }
  0x51   : > { %3705 = vmatprep.mubr.msk.f32.mxu0 %vm4163_vm1, %v4162_v2 }
  0x54   : > { %3706 = vmatmul.mubr.msk.f32.gmra.mrb[32].mxu0 %vm486_vm2, %v457_v19 }
  0x55   : > { %3708 = vmatprep.mubr.msk.f32.mxu0 %vm4163_vm1, %v4162_v2 }
  0x58   : > { %3709 = vmatmul.mubr.msk.f32.gmra.mrb[34].mxu0 %vm486_vm2, %v458_v20 }
  0x59   : > { %3711 = vmatprep.mubr.msk.f32.mxu0 %vm4163_vm1, %v4162_v2 }
  0x5c   : > { %3712 = vmatmul.mubr.msk.f32.gmra.mrb[36].mxu0 %vm486_vm2, %v459_v21 }
  0x5d   : > { %3714 = vmatprep.mubr.msk.f32.mxu0 %vm4163_vm1, %v4162_v2 }
  0x60   : > { %3715 = vmatmul.mubr.msk.f32.gmra.mrb[38].mxu0 %vm486_vm2, %v460_v22 }
  0x61   : > { %3717 = vmatprep.mubr.msk.f32.mxu0 %vm4163_vm1, %v4162_v2 }
  0x64   : > { %3718 = vmatmul.mubr.msk.f32.gmra.mrb[40].mxu0 %vm486_vm2, %v461_v23  ;;  %v1233_v23 = vunpack.c.h.bf16 %v4426_v16 }
  0x65   : > { %3720 = vmatprep.mubr.msk.f32.mxu0 %vm4163_vm1, %v4162_v2 }
  0x66   : > { %1324 = vmatprep.mubr.f32.mxu1 %v1233_v23 }
  0x68   : > { %3721 = vmatmul.mubr.msk.f32.gmra.mrb[42].mxu0 %vm486_vm2, %v462_v24 }
  0x69   : > { %3723 = vmatprep.mubr.msk.f32.mxu0 %vm4163_vm1, %v4162_v2 }
  0x6c   : > { %3724 = vmatmul.mubr.msk.f32.gmra.mrb[44].mxu0 %vm486_vm2, %v463_v25 }
  0x6d   : > { %3726 = vmatprep.mubr.msk.f32.mxu0 %vm4163_vm1, %v4162_v2 }
  0x70   : > { %3727 = vmatmul.mubr.msk.f32.gmra.mrb[46].mxu0 %vm486_vm2, %v464_v26 }
  0x71   : > { %3729 = vmatprep.mubr.msk.f32.mxu0 %vm4163_vm1, %v4162_v2 }
  0x74   : > { %3730 = vmatmul.mubr.msk.f32.gmra.mrb[48].mxu0 %vm486_vm2, %v465_v27 }
  0x75   : > { %3732 = vmatprep.mubr.msk.f32.mxu0 %vm4163_vm1, %v4162_v2 }
  0x78   : > { %3733 = vmatmul.mubr.msk.f32.gmra.mrb[50].mxu0 %vm486_vm2, %v466_v28 }
  0x79   : > { %3735 = vmatprep.mubr.msk.f32.mxu0 %vm4163_vm1, %v4162_v2 }
  0x7c   : > { %3736 = vmatmul.mubr.msk.f32.gmra.mrb[52].mxu0 %vm486_vm2, %v467_v29 }
  0x7d   : > { %3738 = vmatprep.mubr.msk.f32.mxu0 %vm4163_vm1, %v4162_v2 }
  0x80   : > { %3739 = vmatmul.mubr.msk.f32.gmra.mrb[54].mxu0 %vm486_vm2, %v468_v30 }
  0x81   : > { %3741 = vmatprep.mubr.msk.f32.mxu0 %vm4163_vm1, %v4162_v2 }
  0x84   : > { %3742 = vmatmul.mubr.msk.f32.gmra.mrb[56].mxu0 %vm486_vm2, %v469_v31 }
  0x85   : > { %3744 = vmatprep.mubr.msk.f32.mxu0 %vm4163_vm1, %v4162_v2 }
  0x88   : > { %3745 = vmatmul.mubr.msk.f32.gmra.mrb[58].mxu0 %vm486_vm2, %v470_v32 }
  0x89   : > { %3747 = vmatprep.mubr.msk.f32.mxu0 %vm4163_vm1, %v4162_v2 }
  0x8c   : > { %3748 = vmatmul.mubr.msk.f32.gmra.mrb[60].mxu0 %vm486_vm2, %v471_v33 }
  0x8d   : > { %3750 = vmatprep.mubr.msk.f32.mxu0 %vm4163_vm1, %v4162_v2 }
  0x90   : > { %3751 = vmatmul.mubr.msk.f32.gmra.mrb[62].mxu0 %vm486_vm2, %v472_v34 }
  0x91   : > { %3753 = vmatprep.mubr.msk.f32.mxu0 %vm4163_vm1, %v4162_v2 }
  0x94   : > { %3754 = vmatmul.mubr.msk.f32.gmra.mrb[64].mxu0 %vm486_vm2, %v473_v35 }
  0x95   : > { %3756 = vmatprep.mubr.msk.f32.mxu0 %vm4163_vm1, %v4162_v2 }
  0x98   : > { %3757 = vmatmul.mubr.msk.f32.gmra.mrb[66].mxu0 %vm486_vm2, %v474_v36 }
  0x99   : > { %3759 = vmatprep.mubr.msk.f32.mxu0 %vm4163_vm1, %v4162_v2 }
  0x9c   : > { %3760 = vmatmul.mubr.msk.f32.gmra.mrb[68].mxu0 %vm486_vm2, %v475_v37 }
  0x9d   : > { %3762 = vmatprep.mubr.msk.f32.mxu0 %vm4163_vm1, %v4162_v2 }
  0xe7   : > { %v668_v39 = vpop.f32.mrb[0].mxu0 }
  0xe8   : > { %v669_v40 = vadd.f32 %v4409_v38, %v668_v39  ;;  %v3659_v41 = vpop.f32.mrb[1].mxu0 }
  0xea   : > { %v850_v43 = vmax.f32 %v669_v40, 0.0 }
  0xeb   : > { %v673_v42 = vpop.f32.mrb[2].mxu0 }
  0xec   : > { %v674_v44 = vadd.f32 %v4409_v38, %v673_v42  ;;  %v3662_v45 = vpop.f32.mrb[3].mxu0  ;;  %v919_v48 = vrot.slane %v850_v43, 1 }
  0xee   : > { %v851_v46 = vmax.f32 %v674_v44, 0.0 }
  0xef   : > { %v678_v47 = vpop.f32.mrb[4].mxu0 }
  0xf0   : > { %v920_v49 = vrot.slane %v851_v46, 1  ;;  %v679_v50 = vadd.f32 %v4409_v38, %v678_v47  ;;  %v3665_v51 = vpop.f32.mrb[5].mxu0 }
  0xf2   : > { %v921_v52 = vsel %vm918_vm3, %v919_v48, %v920_v49  ;;  %v852_v53 = vmax.f32 %v679_v50, 0.0 }
  0xf3   : > { %v683_v54 = vpop.f32.mrb[6].mxu0  ;;  %v1016_v55 = vmax.f32 %v850_v43, %v921_v52 }
  0xf4   : > { %v922_v56 = vrot.slane %v852_v53, 1  ;;  %v684_v57 = vadd.f32 %v4409_v38, %v683_v54  ;;  %v3668_v58 = vpop.f32.mrb[7].mxu0  ;;  %v1089_v63 = vrot.slane %v852_v53, 2 }
  0xf6   : > { %v853_v59 = vmax.f32 %v684_v57, 0.0  ;;  %v923_v60 = vsel %vm918_vm3, %v920_v49, %v922_v56 }
  0xf7   : > { %v688_v61 = vpop.f32.mrb[8].mxu0  ;;  %v1017_v62 = vmax.f32 %v851_v46, %v923_v60 }
  0xf8   : > { %v924_v0 = vrot.slane %v853_v59, 1  ;;  %v1090_v1 = vrot.slane %v853_v59, 2  ;;  %v689_v3 = vadd.f32 %v4409_v38, %v688_v61  ;;  %v3671_v4 = vpop.f32.mrb[9].mxu0 }
  0xfa   : > { %v854_v5 = vmax.f32 %v689_v3, 0.0  ;;  %v925_v6 = vsel %vm918_vm3, %v922_v56, %v924_v0  ;;  %v1091_v7 = vsel %vm1088_vm4, %v1089_v63, %v1090_v1 }
  0xfb   : > { %v693_v8 = vpop.f32.mrb[10].mxu0  ;;  %v1018_v9 = vmax.f32 %v852_v53, %v925_v6  ;;  %v1056_v10 = vmax.f32 %v1016_v55, %v925_v6 }
  0xfc   : > { %v926_v11 = vrot.slane %v854_v5, 1  ;;  %v1092_v12 = vrot.slane %v854_v5, 2  ;;  %v694_v13 = vadd.f32 %v4409_v38, %v693_v8  ;;  %v3674_v14 = vpop.f32.mrb[11].mxu0 }
  0xfd   : > { %v4421_v15 = vmax.f32 %v1056_v10, %v1091_v7 }
  0xfe   : > { %v855_v17 = vmax.f32 %v694_v13, 0.0  ;;  %v927_v18 = vsel %vm918_vm3, %v924_v0, %v926_v11  ;;  %v1093_v19 = vsel %vm1088_vm4, %v1090_v1, %v1092_v12 }
  0xff   : > { %v698_v20 = vpop.f32.mrb[12].mxu0  ;;  %v1019_v21 = vmax.f32 %v853_v59, %v927_v18  ;;  %v1057_v22 = vmax.f32 %v1017_v62, %v927_v18 }
 0x100   : > { %v928_v24 = vrot.slane %v855_v17, 1  ;;  %v1094_v25 = vrot.slane %v855_v17, 2  ;;  %v699_v26 = vadd.f32 %v4409_v38, %v698_v20  ;;  %v3677_v27 = vpop.f32.mrb[13].mxu0 }
 0x101   : > { %v4432_v28 = vmax.f32 %v1057_v22, %v1093_v19 }
 0x102   : > { %v856_v29 = vmax.f32 %v699_v26, 0.0  ;;  %v929_v30 = vsel %vm918_vm3, %v926_v11, %v928_v24  ;;  %v1095_v31 = vsel %vm1088_vm4, %v1092_v12, %v1094_v25 }
 0x103   : > { %v703_v32 = vpop.f32.mrb[14].mxu0  ;;  %v3930_v33 = vpack.c.bf16 %v4432_v28, %v4421_v15  ;;  %v1058_v34 = vmax.f32 %v1018_v9, %v929_v30  ;;  %v1020_v35 = vmax.f32 %v854_v5, %v929_v30 }
 0x104   : > { %v930_v36 = vrot.slane %v856_v29, 1  ;;  %v1096_v37 = vrot.slane %v856_v29, 2  ;;  %v704_v39 = vadd.f32 %v4409_v38, %v703_v32  ;;  %v3680_v40 = vpop.f32.mrb[15].mxu0 }
 0x105   : > { %v1188_v41 = vmax.f32 %v1058_v34, %v1095_v31 }
 0x106   : > { %v857_v42 = vmax.f32 %v704_v39, 0.0  ;;  %v931_v43 = vsel %vm918_vm3, %v928_v24, %v930_v36  ;;  %v1097_v44 = vsel %vm1088_vm4, %v1094_v25, %v1096_v37 }
 0x107   : > { %v708_v45 = vpop.f32.mrb[16].mxu0  ;;  %v1059_v46 = vmax.f32 %v1019_v21, %v931_v43  ;;  %v1021_v47 = vmax.f32 %v855_v17, %v931_v43 }
 0x108   : > { %v932_v48 = vrot.slane %v857_v42, 1  ;;  %v1098_v49 = vrot.slane %v857_v42, 2  ;;  %v709_v50 = vadd.f32 %v4409_v38, %v708_v45  ;;  %v3683_v51 = vpop.f32.mrb[17].mxu0 }
 0x109   : > { %v1189_v52 = vmax.f32 %v1059_v46, %v1097_v44 }
 0x10a   : > { %v858_v53 = vmax.f32 %v709_v50, 0.0  ;;  %v933_v54 = vsel %vm918_vm3, %v930_v36, %v932_v48  ;;  %v1099_v55 = vsel %vm1088_vm4, %v1096_v37, %v1098_v49 }
 0x10b   : > { %v713_v56 = vpop.f32.mrb[18].mxu0  ;;  %v4444_v57 = vpack.c.bf16 %v1189_v52, %v1188_v41  ;;  %v1060_v58 = vmax.f32 %v1020_v35, %v933_v54  ;;  %v1022_v59 = vmax.f32 %v856_v29, %v933_v54 }
 0x10c   : > { %v934_v60 = vrot.slane %v858_v53, 1  ;;  %v1100_v61 = vrot.slane %v858_v53, 2  ;;  %v714_v62 = vadd.f32 %v4409_v38, %v713_v56  ;;  %v3686_v63 = vpop.f32.mrb[19].mxu0 }
 0x10d   : > { %v1190_v0 = vmax.f32 %v1060_v58, %v1099_v55 }
 0x10e   : > { %v859_v1 = vmax.f32 %v714_v62, 0.0  ;;  %v935_v3 = vsel %vm918_vm3, %v932_v48, %v934_v60  ;;  %v1101_v4 = vsel %vm1088_vm4, %v1098_v49, %v1100_v61 }
 0x10f   : > { %v718_v5 = vpop.f32.mrb[20].mxu0  ;;  %v1061_v6 = vmax.f32 %v1021_v47, %v935_v3  ;;  %v1023_v7 = vmax.f32 %v857_v42, %v935_v3 }
 0x110   : > { %v936_v8 = vrot.slane %v859_v1, 1  ;;  %v1102_v9 = vrot.slane %v859_v1, 2  ;;  %v719_v10 = vadd.f32 %v4409_v38, %v718_v5  ;;  %v3689_v11 = vpop.f32.mrb[21].mxu0 }
 0x111   : > { %v1191_v12 = vmax.f32 %v1061_v6, %v1101_v4 }
 0x112   : > { %v860_v13 = vmax.f32 %v719_v10, 0.0  ;;  %v937_v14 = vsel %vm918_vm3, %v934_v60, %v936_v8  ;;  %v1103_v17 = vsel %vm1088_vm4, %v1100_v61, %v1102_v9 }
 0x113   : > { %v723_v18 = vpop.f32.mrb[22].mxu0  ;;  %v4452_v19 = vpack.c.bf16 %v1191_v12, %v1190_v0  ;;  %v1062_v20 = vmax.f32 %v1022_v59, %v937_v14  ;;  %v1024_v21 = vmax.f32 %v858_v53, %v937_v14 }
 0x114   : > { %v938_v22 = vrot.slane %v860_v13, 1  ;;  %v1104_v23 = vrot.slane %v860_v13, 2  ;;  %v724_v24 = vadd.f32 %v4409_v38, %v723_v18  ;;  %v3692_v25 = vpop.f32.mrb[23].mxu0 }
 0x115   : > { %v1192_v26 = vmax.f32 %v1062_v20, %v1103_v17 }
 0x116   : > { %v861_v27 = vmax.f32 %v724_v24, 0.0  ;;  %v939_v29 = vsel %vm918_vm3, %v936_v8, %v938_v22  ;;  %v1105_v30 = vsel %vm1088_vm4, %v1102_v9, %v1104_v23 }
 0x117   : > { %v728_v31 = vpop.f32.mrb[24].mxu0  ;;  %v1063_v32 = vmax.f32 %v1023_v7, %v939_v29  ;;  %v1025_v34 = vmax.f32 %v859_v1, %v939_v29 }
 0x118   : > { %v940_v35 = vrot.slane %v861_v27, 1  ;;  %v1106_v36 = vrot.slane %v861_v27, 2  ;;  %v729_v37 = vadd.f32 %v4409_v38, %v728_v31  ;;  %v3695_v39 = vpop.f32.mrb[25].mxu0 }
 0x119   : > { %v1193_v40 = vmax.f32 %v1063_v32, %v1105_v30 }
 0x11a   : > { %v862_v41 = vmax.f32 %v729_v37, 0.0  ;;  %v941_v42 = vsel %vm918_vm3, %v938_v22, %v940_v35  ;;  %v1107_v43 = vsel %vm1088_vm4, %v1104_v23, %v1106_v36 }
 0x11b   : > { %v733_v44 = vpop.f32.mrb[26].mxu0  ;;  %v4460_v45 = vpack.c.bf16 %v1193_v40, %v1192_v26  ;;  %v1064_v46 = vmax.f32 %v1024_v21, %v941_v42  ;;  %v1026_v47 = vmax.f32 %v860_v13, %v941_v42 }
 0x11c   : > { %v942_v48 = vrot.slane %v862_v41, 1  ;;  %v1108_v49 = vrot.slane %v862_v41, 2  ;;  %v734_v50 = vadd.f32 %v4409_v38, %v733_v44  ;;  %v3698_v51 = vpop.f32.mrb[27].mxu0 }
 0x11d   : > { %v1194_v52 = vmax.f32 %v1064_v46, %v1107_v43 }
 0x11e   : > { %v863_v53 = vmax.f32 %v734_v50, 0.0  ;;  %v943_v54 = vsel %vm918_vm3, %v940_v35, %v942_v48  ;;  %v1109_v55 = vsel %vm1088_vm4, %v1106_v36, %v1108_v49 }
 0x11f   : > { %v738_v56 = vpop.f32.mrb[28].mxu0  ;;  %v1065_v58 = vmax.f32 %v1025_v34, %v943_v54  ;;  %v1027_v59 = vmax.f32 %v861_v27, %v943_v54 }
 0x120   : > { %v944_v60 = vrot.slane %v863_v53, 1  ;;  %v1110_v61 = vrot.slane %v863_v53, 2  ;;  %v739_v62 = vadd.f32 %v4409_v38, %v738_v56  ;;  %v3701_v63 = vpop.f32.mrb[29].mxu0 }
 0x121   : > { %v1195_v0 = vmax.f32 %v1065_v58, %v1109_v55 }
 0x122   : > { %v864_v1 = vmax.f32 %v739_v62, 0.0  ;;  %v945_v3 = vsel %vm918_vm3, %v942_v48, %v944_v60  ;;  %v1111_v4 = vsel %vm1088_vm4, %v1108_v49, %v1110_v61 }
 0x123   : > { %v743_v5 = vpop.f32.mrb[30].mxu0  ;;  %v4468_v6 = vpack.c.bf16 %v1195_v0, %v1194_v52  ;;  %v1066_v7 = vmax.f32 %v1026_v47, %v945_v3  ;;  %v1028_v8 = vmax.f32 %v862_v41, %v945_v3 }
 0x124   : > { %v946_v9 = vrot.slane %v864_v1, 1  ;;  %v1112_v10 = vrot.slane %v864_v1, 2  ;;  %v744_v11 = vadd.f32 %v4409_v38, %v743_v5  ;;  %v3704_v12 = vpop.f32.mrb[31].mxu0 }
 0x125   : > { %v1196_v13 = vmax.f32 %v1066_v7, %v1111_v4 }
 0x126   : > { %v865_v14 = vmax.f32 %v744_v11, 0.0  ;;  %v947_v17 = vsel %vm918_vm3, %v944_v60, %v946_v9  ;;  %v1113_v18 = vsel %vm1088_vm4, %v1110_v61, %v1112_v10 }
 0x127   : > { %v748_v20 = vpop.f32.mrb[32].mxu0  ;;  %v1067_v21 = vmax.f32 %v1027_v59, %v947_v17  ;;  %v1029_v22 = vmax.f32 %v863_v53, %v947_v17 }
 0x128   : > { %v948_v23 = vrot.slane %v865_v14, 1  ;;  %v1114_v24 = vrot.slane %v865_v14, 2  ;;  %v749_v25 = vadd.f32 %v4409_v38, %v748_v20  ;;  %v3707_v26 = vpop.f32.mrb[33].mxu0 }
 0x129   : > { %v1197_v27 = vmax.f32 %v1067_v21, %v1113_v18 }
 0x12a   : > { %v866_v29 = vmax.f32 %v749_v25, 0.0  ;;  %v949_v30 = vsel %vm918_vm3, %v946_v9, %v948_v23  ;;  %v1115_v31 = vsel %vm1088_vm4, %v1112_v10, %v1114_v24 }
 0x12b   : > { %v753_v32 = vpop.f32.mrb[34].mxu0  ;;  %v4476_v34 = vpack.c.bf16 %v1197_v27, %v1196_v13  ;;  %v1068_v35 = vmax.f32 %v1028_v8, %v949_v30  ;;  %v1030_v36 = vmax.f32 %v864_v1, %v949_v30 }
 0x12c   : > { %v950_v37 = vrot.slane %v866_v29, 1  ;;  %v1116_v39 = vrot.slane %v866_v29, 2  ;;  %v754_v40 = vadd.f32 %v4409_v38, %v753_v32  ;;  %v3710_v41 = vpop.f32.mrb[35].mxu0 }
 0x12d   : > { %v1198_v42 = vmax.f32 %v1068_v35, %v1115_v31 }
 0x12e   : > { %v867_v43 = vmax.f32 %v754_v40, 0.0  ;;  %v951_v44 = vsel %vm918_vm3, %v948_v23, %v950_v37  ;;  %v1117_v46 = vsel %vm1088_vm4, %v1114_v24, %v1116_v39 }
 0x12f   : > { %v758_v47 = vpop.f32.mrb[36].mxu0  ;;  %v1069_v48 = vmax.f32 %v1029_v22, %v951_v44  ;;  %v1031_v49 = vmax.f32 %v865_v14, %v951_v44 }
 0x130   : > { %v952_v50 = vrot.slane %v867_v43, 1  ;;  %v1118_v51 = vrot.slane %v867_v43, 2  ;;  %v759_v52 = vadd.f32 %v4409_v38, %v758_v47  ;;  %v3713_v53 = vpop.f32.mrb[37].mxu0 }
 0x131   : > { %v1199_v54 = vmax.f32 %v1069_v48, %v1117_v46 }
 0x132   : > { %v868_v55 = vmax.f32 %v759_v52, 0.0  ;;  %v953_v56 = vsel %vm918_vm3, %v950_v37, %v952_v50  ;;  %v1119_v58 = vsel %vm1088_vm4, %v1116_v39, %v1118_v51 }
 0x133   : > { %v763_v59 = vpop.f32.mrb[38].mxu0  ;;  %v1032_v60 = vmax.f32 %v866_v29, %v953_v56  ;;  %v4484_v61 = vpack.c.bf16 %v1199_v54, %v1198_v42  ;;  %v1070_v62 = vmax.f32 %v1030_v36, %v953_v56 }
 0x134   : > { %v954_v63 = vrot.slane %v868_v55, 1  ;;  %v1120_v0 = vrot.slane %v868_v55, 2  ;;  %v764_v1 = vadd.f32 %v4409_v38, %v763_v59  ;;  %v3716_v3 = vpop.f32.mrb[39].mxu0 }
 0x135   : > { %v1200_v4 = vmax.f32 %v1070_v62, %v1119_v58 }
 0x136   : > { %v869_v5 = vmax.f32 %v764_v1, 0.0  ;;  %v955_v7 = vsel %vm918_vm3, %v952_v50, %v954_v63  ;;  %v1121_v8 = vsel %vm1088_vm4, %v1118_v51, %v1120_v0 }
 0x137   : > { %v768_v9 = vpop.f32.mrb[40].mxu0  ;;  %v1033_v10 = vmax.f32 %v867_v43, %v955_v7  ;;  %v1071_v11 = vmax.f32 %v1031_v49, %v955_v7 }
 0x138   : > { %v956_v12 = vrot.slane %v869_v5, 1  ;;  %v1122_v13 = vrot.slane %v869_v5, 2  ;;  %v769_v14 = vadd.f32 %v4409_v38, %v768_v9  ;;  %v3719_v17 = vpop.f32.mrb[41].mxu0 }
 0x139   : > { %v1201_v18 = vmax.f32 %v1071_v11, %v1121_v8 }
 0x13a   : > { %v870_v20 = vmax.f32 %v769_v14, 0.0  ;;  %v957_v21 = vsel %vm918_vm3, %v954_v63, %v956_v12  ;;  %v1123_v22 = vsel %vm1088_vm4, %v1120_v0, %v1122_v13 }
 0x13b   : > { %v773_v23 = vpop.f32.mrb[42].mxu0  ;;  %v1034_v24 = vmax.f32 %v868_v55, %v957_v21  ;;  %v1072_v25 = vmax.f32 %v1032_v60, %v957_v21  ;;  %v4492_v26 = vpack.c.bf16 %v1201_v18, %v1200_v4 }
 0x13c   : > { %v958_v27 = vrot.slane %v870_v20, 1  ;;  %v1124_v29 = vrot.slane %v870_v20, 2  ;;  %v774_v30 = vadd.f32 %v4409_v38, %v773_v23  ;;  %v3722_v31 = vpop.f32.mrb[43].mxu0 }
 0x13d   : > { %v1202_v32 = vmax.f32 %v1072_v25, %v1123_v22 }
 0x13e   : > { %v871_v35 = vmax.f32 %v774_v30, 0.0  ;;  %v959_v36 = vsel %vm918_vm3, %v956_v12, %v958_v27  ;;  %v1125_v37 = vsel %vm1088_vm4, %v1122_v13, %v1124_v29 }
 0x13f   : > { %v778_v39 = vpop.f32.mrb[44].mxu0  ;;  %v1035_v40 = vmax.f32 %v869_v5, %v959_v36  ;;  %v1073_v41 = vmax.f32 %v1033_v10, %v959_v36 }
 0x140   : > { %v960_v42 = vrot.slane %v871_v35, 1  ;;  %v1126_v43 = vrot.slane %v871_v35, 2  ;;  %v779_v44 = vadd.f32 %v4409_v38, %v778_v39  ;;  %v3725_v46 = vpop.f32.mrb[45].mxu0 }
 0x141   : > { %v1203_v47 = vmax.f32 %v1073_v41, %v1125_v37 }
 0x142   : > { %v872_v48 = vmax.f32 %v779_v44, 0.0  ;;  %v961_v49 = vsel %vm918_vm3, %v958_v27, %v960_v42  ;;  %v1127_v50 = vsel %vm1088_vm4, %v1124_v29, %v1126_v43 }
 0x143   : > { %v783_v51 = vpop.f32.mrb[46].mxu0  ;;  %v3928_v52 = vpack.c.bf16 %v1203_v47, %v1202_v32  ;;  %v1074_v53 = vmax.f32 %v1034_v24, %v961_v49  ;;  %v1036_v54 = vmax.f32 %v870_v20, %v961_v49 }
 0x144   : > { %v962_v55 = vrot.slane %v872_v48, 1  ;;  %v1128_v56 = vrot.slane %v872_v48, 2  ;;  %v784_v58 = vadd.f32 %v4409_v38, %v783_v51  ;;  %v3728_v59 = vpop.f32.mrb[47].mxu0 }
 0x145   : > { %3929 = vmatprep.subr.bf16.mxu1 %v3928_v52  ;;  %v1204_v60 = vmax.f32 %v1074_v53, %v1127_v50 }
 0x146   : > { %v873_v62 = vmax.f32 %v784_v58, 0.0  ;;  %3931 = vmatpush3.bf16.msra.mxu1 %v3930_v33  ;;  %v963_v63 = vsel %vm918_vm3, %v960_v42, %v962_v55  ;;  %v1129_v0 = vsel %vm1088_vm4, %v1126_v43, %v1128_v56 }
 0x147   : > { %v788_v1 = vpop.f32.mrb[48].mxu0  ;;  %v1075_v3 = vmax.f32 %v1035_v40, %v963_v63  ;;  %v1037_v4 = vmax.f32 %v871_v35, %v963_v63 }
 0x148   : > { %v964_v5 = vrot.slane %v873_v62, 1  ;;  %v1130_v7 = vrot.slane %v873_v62, 2  ;;  %v789_v8 = vadd.f32 %v4409_v38, %v788_v1  ;;  %v3731_v9 = vpop.f32.mrb[49].mxu0 }
 0x149   : > { %v1205_v10 = vmax.f32 %v1075_v3, %v1129_v0 }
 0x14a   : > { %v874_v11 = vmax.f32 %v789_v8, 0.0  ;;  %v965_v12 = vsel %vm918_vm3, %v962_v55, %v964_v5  ;;  %v1131_v13 = vsel %vm1088_vm4, %v1128_v56, %v1130_v7 }
 0x14b   : > { %v793_v15 = vpop.f32.mrb[50].mxu0  ;;  %v3932_v28 = vpack.c.bf16 %v1205_v10, %v1204_v60  ;;  %v1076_v33 = vmax.f32 %v1036_v54, %v965_v12  ;;  %v1038_v14 = vmax.f32 %v872_v48, %v965_v12 }
 0x14c   : > { %v966_v17 = vrot.slane %v874_v11, 1  ;;  %v1132_v18 = vrot.slane %v874_v11, 2  ;;  %v794_v20 = vadd.f32 %v4409_v38, %v793_v15  ;;  %v3734_v21 = vpop.f32.mrb[51].mxu0 }
 0x14d   : > { %3933 = vmatprep.subr.bf16.mxu1 %v3932_v28  ;;  %v1206_v22 = vmax.f32 %v1076_v33, %v1131_v13 }
 0x14e   : > { %v875_v23 = vmax.f32 %v794_v20, 0.0  ;;  %3935 = vmatpush3.bf16.msra.mxu1 %v4444_v57  ;;  %v967_v24 = vsel %vm918_vm3, %v964_v5, %v966_v17  ;;  %v1133_v25 = vsel %vm1088_vm4, %v1130_v7, %v1132_v18 }
 0x14f   : > { %v798_v27 = vpop.f32.mrb[52].mxu0  ;;  %v1077_v29 = vmax.f32 %v1037_v4, %v967_v24  ;;  %v1039_v30 = vmax.f32 %v873_v62, %v967_v24 }
 0x150   : > { %v968_v31 = vrot.slane %v875_v23, 1  ;;  %v1134_v32 = vrot.slane %v875_v23, 2  ;;  %v799_v35 = vadd.f32 %v4409_v38, %v798_v27  ;;  %v3737_v36 = vpop.f32.mrb[53].mxu0 }
 0x151   : > { %v1207_v37 = vmax.f32 %v1077_v29, %v1133_v25 }
 0x152   : > { %v876_v39 = vmax.f32 %v799_v35, 0.0  ;;  %v969_v40 = vsel %vm918_vm3, %v966_v17, %v968_v31  ;;  %v1135_v41 = vsel %vm1088_vm4, %v1132_v18, %v1134_v32 }
 0x153   : > { %v803_v42 = vpop.f32.mrb[54].mxu0  ;;  %v3936_v57 = vpack.c.bf16 %v1207_v37, %v1206_v22  ;;  %v1078_v43 = vmax.f32 %v1038_v14, %v969_v40  ;;  %v1040_v44 = vmax.f32 %v874_v11, %v969_v40 }
 0x154   : > { %v970_v46 = vrot.slane %v876_v39, 1  ;;  %v1136_v47 = vrot.slane %v876_v39, 2  ;;  %v804_v48 = vadd.f32 %v4409_v38, %v803_v42  ;;  %v3740_v49 = vpop.f32.mrb[55].mxu0 }
 0x155   : > { %3937 = vmatprep.subr.bf16.mxu1 %v3936_v57  ;;  %v1208_v50 = vmax.f32 %v1078_v43, %v1135_v41 }
 0x156   : > { %v877_v51 = vmax.f32 %v804_v48, 0.0  ;;  %3939 = vmatpush3.bf16.msra.mxu1 %v4452_v19  ;;  %v971_v52 = vsel %vm918_vm3, %v968_v31, %v970_v46  ;;  %v1137_v53 = vsel %vm1088_vm4, %v1134_v32, %v1136_v47 }
 0x157   : > { %v808_v54 = vpop.f32.mrb[56].mxu0  ;;  %v1079_v55 = vmax.f32 %v1039_v30, %v971_v52  ;;  %v1041_v56 = vmax.f32 %v875_v23, %v971_v52 }
 0x158   : > { %v972_v58 = vrot.slane %v877_v51, 1  ;;  %v1138_v59 = vrot.slane %v877_v51, 2  ;;  %v809_v60 = vadd.f32 %v4409_v38, %v808_v54  ;;  %v3743_v62 = vpop.f32.mrb[57].mxu0 }
 0x159   : > { %v1209_v63 = vmax.f32 %v1079_v55, %v1137_v53 }
 0x15a   : > { %v878_v0 = vmax.f32 %v809_v60, 0.0  ;;  %v973_v1 = vsel %vm918_vm3, %v970_v46, %v972_v58  ;;  %v1139_v3 = vsel %vm1088_vm4, %v1136_v47, %v1138_v59 }
 0x15b   : > { %v813_v4 = vpop.f32.mrb[58].mxu0  ;;  %v3940_v19 = vpack.c.bf16 %v1209_v63, %v1208_v50  ;;  %v1080_v5 = vmax.f32 %v1040_v44, %v973_v1  ;;  %v1042_v7 = vmax.f32 %v876_v39, %v973_v1 }
 0x15c   : > { %v974_v8 = vrot.slane %v878_v0, 1  ;;  %v1140_v9 = vrot.slane %v878_v0, 2  ;;  %v814_v10 = vadd.f32 %v4409_v38, %v813_v4  ;;  %v3746_v11 = vpop.f32.mrb[59].mxu0 }
 0x15d   : > { %3941 = vmatprep.subr.bf16.mxu1 %v3940_v19  ;;  %v1210_v12 = vmax.f32 %v1080_v5, %v1139_v3 }
 0x15e   : > { %v879_v13 = vmax.f32 %v814_v10, 0.0  ;;  %3943 = vmatpush3.bf16.msra.mxu1 %v4460_v45  ;;  %v975_v15 = vsel %vm918_vm3, %v972_v58, %v974_v8  ;;  %v1141_v28 = vsel %vm1088_vm4, %v1138_v59, %v1140_v9 }
 0x15f   : > { %v818_v33 = vpop.f32.mrb[60].mxu0  ;;  %v1081_v14 = vmax.f32 %v1041_v56, %v975_v15  ;;  %v1043_v17 = vmax.f32 %v877_v51, %v975_v15 }
 0x160   : > { %v976_v18 = vrot.slane %v879_v13, 1  ;;  %v1142_v20 = vrot.slane %v879_v13, 2  ;;  %v819_v21 = vadd.f32 %v4409_v38, %v818_v33  ;;  %v3749_v22 = vpop.f32.mrb[61].mxu0 }
 0x161   : > { %v1211_v23 = vmax.f32 %v1081_v14, %v1141_v28 }
 0x162   : > { %v880_v24 = vmax.f32 %v819_v21, 0.0  ;;  %v977_v25 = vsel %vm918_vm3, %v974_v8, %v976_v18  ;;  %v1143_v27 = vsel %vm1088_vm4, %v1140_v9, %v1142_v20 }
 0x163   : > { %v823_v29 = vpop.f32.mrb[62].mxu0  ;;  %v3944_v45 = vpack.c.bf16 %v1211_v23, %v1210_v12  ;;  %v1082_v30 = vmax.f32 %v1042_v7, %v977_v25  ;;  %v1044_v31 = vmax.f32 %v878_v0, %v977_v25  ;;  %v1219_v23 = vld [vmem:[%s5498_s9 + $0x8] sm:$0xff] }
 0x164   : > { %v978_v32 = vrot.slane %v880_v24, 1  ;;  %v1144_v35 = vrot.slane %v880_v24, 2  ;;  %v824_v36 = vadd.f32 %v4409_v38, %v823_v29  ;;  %v3752_v37 = vpop.f32.mrb[63].mxu0  ;;  %v1235_v25 = vunpack.c.h.bf16 %v1219_v23 }
 0x165   : > { %3945 = vmatprep.subr.bf16.mxu1 %v3944_v45  ;;  %v1212_v39 = vmax.f32 %v1082_v30, %v1143_v27  ;;  %v1220_v27 = vld [vmem:[%s5498_s9 + $0x10] sm:$0xff]  ;;  %v1221_v45 = vld [vmem:[%s5498_s9 + $0x18] sm:$0xff] }
 0x166   : > { %v881_v40 = vmax.f32 %v824_v36, 0.0  ;;  %3947 = vmatpush3.bf16.msra.mxu1 %v4468_v6  ;;  %v979_v41 = vsel %vm918_vm3, %v976_v18, %v978_v32  ;;  %v1145_v42 = vsel %vm1088_vm4, %v1142_v20, %v1144_v35  ;;  %v1237_v29 = vunpack.c.h.bf16 %v1220_v27 }
 0x167   : > { %v828_v57 = vpop.f32.mrb[64].mxu0  ;;  %v1083_v43 = vmax.f32 %v1043_v17, %v979_v41  ;;  %v1045_v44 = vmax.f32 %v879_v13, %v979_v41  ;;  %v1236_v30 = vunpack.c.l.bf16 %v1220_v27 }
 0x168   : > { %v980_v46 = vrot.slane %v881_v40, 1  ;;  %v1146_v47 = vrot.slane %v881_v40, 2  ;;  %v829_v48 = vadd.f32 %v4409_v38, %v828_v57  ;;  %v3755_v49 = vpop.f32.mrb[65].mxu0 }
 0x169   : > { %v1213_v50 = vmax.f32 %v1083_v43, %v1145_v42  ;;  %v1225_v42 = vld [vmem:[%s5498_s9 + $0x38] sm:$0xff] }
 0x16a   : > { %v882_v51 = vmax.f32 %v829_v48, 0.0  ;;  %v981_v52 = vsel %vm918_vm3, %v978_v32, %v980_v46  ;;  %v1147_v53 = vsel %vm1088_vm4, %v1144_v35, %v1146_v47  ;;  %v1223_v35 = vld [vmem:[%s5498_s9 + $0x28] sm:$0xff]  ;;  %v1247_v43 = vunpack.c.h.bf16 %v1225_v42 }
 0x16b   : > { %v833_v54 = vpop.f32.mrb[66].mxu0  ;;  %v3948_v6 = vpack.c.bf16 %v1213_v50, %v1212_v39  ;;  %v1084_v55 = vmax.f32 %v1044_v31, %v981_v52  ;;  %v1046_v56 = vmax.f32 %v880_v24, %v981_v52  ;;  %v1232_v24 = vunpack.c.l.bf16 %v4426_v16  ;;  %v1222_v16 = vld [vmem:[%s5498_s9 + $0x20] sm:$0xff]  ;;  %v1224_v39 = vld [vmem:[%s5498_s9 + $0x30] sm:$0xff]  ;;  %v1227_v48 = vld [vmem:[%s5498_s9 + $0x48] sm:$0xff] }
 0x16c   : > { %v982_v58 = vrot.slane %v882_v51, 1  ;;  %v1148_v59 = vrot.slane %v882_v51, 2  ;;  %v834_v60 = vadd.f32 %v4409_v38, %v833_v54  ;;  %v3758_v62 = vpop.f32.mrb[67].mxu0  ;;  %v1239_v31 = vunpack.c.h.bf16 %v1221_v45  ;;  %v1228_v51 = vld [vmem:[%s5498_s9 + $0x50] sm:$0xff]  ;;  %v1229_v54 = vld [vmem:[%s5498_s9 + $0x58] sm:$0xff] }
 0x16d   : > { %3949 = vmatprep.subr.bf16.mxu1 %v3948_v6  ;;  %v1214_v63 = vmax.f32 %v1084_v55, %v1147_v53  ;;  %v1241_v32 = vunpack.c.h.bf16 %v1222_v16  ;;  %v1240_v36 = vunpack.c.l.bf16 %v1222_v16  ;;  %v1243_v37 = vunpack.c.h.bf16 %v1223_v35 }
 0x16e   : > { %v983_v0 = vsel %vm918_vm3, %v980_v46, %v982_v58  ;;  %v883_v1 = vmax.f32 %v834_v60, 0.0  ;;  %3951 = vmatpush3.bf16.msra.mxu1 %v4476_v34  ;;  %v1149_v3 = vsel %vm1088_vm4, %v1146_v47, %v1148_v59  ;;  %v1245_v41 = vunpack.c.h.bf16 %v1224_v39  ;;  %v1231_v60 = vld [vmem:[%s5498_s9 + $0x68] sm:$0xff] }
 0x16f   : > { %v1047_v4 = vmax.f32 %v881_v40, %v983_v0  ;;  %v838_v19 = vpop.f32.mrb[68].mxu0  ;;  %v1085_v5 = vmax.f32 %v1045_v44, %v983_v0  ;;  %v1242_v40 = vunpack.c.l.bf16 %v1223_v35  ;;  %v1244_v57 = vunpack.c.l.bf16 %v1224_v39  ;;  %v1226_v44 = vld [vmem:[%s5498_s9 + $0x40] sm:$0xff] }
 0x170   : > { %v1050_v7 = vrot.slane %v883_v1, 1  ;;  %v1150_v8 = vrot.slane %v883_v1, 2  ;;  %v839_v9 = vadd.f32 %v4409_v38, %v838_v19  ;;  %v3761_v10 = vpop.f32.mrb[69].mxu0  ;;  %v1246_v46 = vunpack.c.l.bf16 %v1225_v42  ;;  %v1632_v1 = vld [vmem:[%s5492_s3] sm:$0xff]  ;;  %v1634_v19 = vld [vmem:[%s5492_s3 + $0x10] sm:$0xff] }
 0x171   : > { %v1215_v11 = vmax.f32 %v1085_v5, %v1149_v3  ;;  %v1249_v47 = vunpack.c.h.bf16 %v1226_v44  ;;  %v1248_v49 = vunpack.c.l.bf16 %v1226_v44  ;;  %v1251_v50 = vunpack.c.h.bf16 %v1227_v48  ;;  %v1633_v3 = vld [vmem:[%s5492_s3 + $0x8] sm:$0xff]  ;;  %v1635_v5 = vld [vmem:[%s5492_s3 + $0x18] sm:$0xff] }
 0x172   : > { %v1051_v12 = vsel %vm918_vm3, %v982_v58, %v1050_v7  ;;  %v884_v13 = vmax.f32 %v839_v9, 0.0  ;;  %v1151_v15 = vsel %vm1088_vm4, %v1148_v59, %v1150_v8  ;;  %v1250_v52 = vunpack.c.l.bf16 %v1227_v48  ;;  %v1636_v9 = vld [vmem:[%s5492_s3 + $0x20] sm:$0xff]  ;;  %v1637_v10 = vld [vmem:[%s5492_s3 + $0x28] sm:$0xff] }
 0x173   : > { %v3952_v28 = vpack.c.bf16 %v1215_v11, %v1214_v63  ;;  %v1086_v33 = vmax.f32 %v1046_v56, %v1051_v12  ;;  %v1253_v53 = vunpack.c.h.bf16 %v1228_v51  ;;  %v1252_v6 = vunpack.c.l.bf16 %v1228_v51  ;;  %v1230_v56 = vld [vmem:[%s5498_s9 + $0x60] sm:$0xff] }
 0x174   : > { %v1052_v14 = vrot.slane %v884_v13, 1  ;;  %v1152_v34 = vrot.slane %v884_v13, 2  ;;  %v1255_v55 = vunpack.c.h.bf16 %v1229_v54  ;;  %v1254_v58 = vunpack.c.l.bf16 %v1229_v54 }
 0x175   : > { %3953 = vmatprep.subr.bf16.mxu1 %v3952_v28  ;;  %v1216_v17 = vmax.f32 %v1086_v33, %v1151_v15  ;;  %v1257_v59 = vunpack.c.h.bf16 %v1230_v56  ;;  %v1256_v62 = vunpack.c.l.bf16 %v1230_v56  ;;  %v1259_v63 = vunpack.c.h.bf16 %v1231_v60  ;;  %v1638_v28 = vld [vmem:[%s5492_s3 + $0x30] sm:$0xff]  ;;  %v1639_v33 = vld [vmem:[%s5492_s3 + $0x38] sm:$0xff] }
 0x176   : > { %v1053_v18 = vsel %vm918_vm3, %v1050_v7, %v1052_v14  ;;  %3955 = vmatpush3.bf16.msra.mxu1 %v4484_v61  ;;  %v1153_v20 = vsel %vm1088_vm4, %v1150_v8, %v1152_v34  ;;  %v1234_v61 = vunpack.c.l.bf16 %v1219_v23  ;;  %v1258_v0 = vunpack.c.l.bf16 %v1231_v60 }
 0x177   : > { %v1087_v38 = vmax.f32 %v1047_v4, %v1053_v18  ;;  %v3960_v4 = vpack.c.bf16 %v1633_v3, %v1632_v1  ;;  %v3964_v7 = vpack.c.bf16 %v1635_v5, %v1634_v19  ;;  %v3968_v12 = vpack.c.bf16 %v1637_v10, %v1636_v9 }
 0x178   : > { %v3972_v34 = vpack.c.bf16 %v1639_v33, %v1638_v28 }
 0x179   : > { %v1217_v21 = vmax.f32 %v1087_v38, %v1153_v20 }
 0x17b   : > { %v3956_v22 = vpack.c.bf16 %v1217_v21, %v1216_v17 }
 0x17d   : > { %3957 = vmatprep.subr.bf16.mxu1 %v3956_v22 }
 0x17e   : > { %3959 = vmatpush3.bf16.msra.mxu1 %v4492_v26  ;;  %v1238_v26 = vunpack.c.l.bf16 %v1221_v45 }
 0x17f   : > { %3961 = vmatprep.subr.bf16.mxu1 %v3960_v4 }
 0x181   : > { %1325 = vmatmul.mubr.f32.vlgmr.msra.gmra.mrb[0].mxu1 %v1232_v24 }
 0x182   : > { %1329 = vmatprep.mubr.f32.mxu1 %v1235_v25  ;;  %3963 = vmatpush3.bf16.msra.mxu1 %v3960_v4 }
 0x183   : > { %3965 = vmatprep.subr.bf16.mxu1 %v3964_v7 }
 0x185   : > { %1330 = vmatmul.mubr.f32.gmra.mrb[2].mxu1 %v1234_v61 }
 0x186   : > { %1334 = vmatprep.mubr.f32.mxu1 %v1237_v29  ;;  %3967 = vmatpush3.bf16.msra.mxu1 %v3964_v7 }
 0x187   : > { %3969 = vmatprep.subr.bf16.mxu1 %v3968_v12 }
 0x189   : > { %1335 = vmatmul.mubr.f32.gmra.mrb[4].mxu1 %v1236_v30 }
 0x18a   : > { %1339 = vmatprep.mubr.f32.mxu1 %v1239_v31  ;;  %3971 = vmatpush3.bf16.msra.mxu1 %v3968_v12 }
 0x18b   : > { %3973 = vmatprep.subr.bf16.mxu1 %v3972_v34 }
 0x18d   : > { %1340 = vmatmul.mubr.f32.gmra.mrb[6].mxu1 %v1238_v26 }
 0x18e   : > { %1344 = vmatprep.mubr.f32.mxu1 %v1241_v32  ;;  %3975 = vmatpush3.bf16.msra.mxu1 %v3972_v34 }
 0x191   : > { %1345 = vmatmul.mubr.f32.gmra.mrb[8].mxu1 %v1240_v36 }
 0x192   : > { %1349 = vmatprep.mubr.f32.mxu1 %v1243_v37 }
 0x195   : > { %1350 = vmatmul.mubr.f32.gmra.mrb[10].mxu1 %v1242_v40 }
 0x196   : > { %1354 = vmatprep.mubr.f32.mxu1 %v1245_v41 }
 0x199   : > { %1355 = vmatmul.mubr.f32.gmra.mrb[12].mxu1 %v1244_v57 }
 0x19a   : > { %1359 = vmatprep.mubr.f32.mxu1 %v1247_v43 }
 0x19d   : > { %1360 = vmatmul.mubr.f32.gmra.mrb[14].mxu1 %v1246_v46 }
 0x19e   : > { %1364 = vmatprep.mubr.f32.mxu1 %v1249_v47 }
 0x1a1   : > { %1365 = vmatmul.mubr.f32.gmra.mrb[16].mxu1 %v1248_v49 }
 0x1a2   : > { %1369 = vmatprep.mubr.f32.mxu1 %v1251_v50 }
 0x1a5   : > { %1370 = vmatmul.mubr.f32.gmra.mrb[18].mxu1 %v1250_v52 }
 0x1a6   : > { %1374 = vmatprep.mubr.f32.mxu1 %v1253_v53 }
 0x1a9   : > { %1375 = vmatmul.mubr.f32.gmra.mrb[20].mxu1 %v1252_v6 }
 0x1aa   : > { %1379 = vmatprep.mubr.f32.mxu1 %v1255_v55 }
 0x1ad   : > { %1380 = vmatmul.mubr.f32.gmra.mrb[22].mxu1 %v1254_v58 }
 0x1ae   : > { %1384 = vmatprep.mubr.f32.mxu1 %v1257_v59 }
 0x1b1   : > { %1385 = vmatmul.mubr.f32.gmra.mrb[24].mxu1 %v1256_v62 }
 0x1b2   : > { %1389 = vmatprep.mubr.f32.mxu1 %v1259_v63 }
 0x1b5   : > { %1390 = vmatmul.mubr.f32.gmra.mrb[26].mxu1 %v1258_v0 }
 0x254   : > { %v3521_v8 = vpop.f32.mrb[0].mxu1 }
 0x255   : > { %v3522_v11 = vpop.f32.mrb[1].mxu1 }
 0x256   : > { %v4606_v13 = vadd.f32 %v3522_v11, %v3521_v8 }
 0x258   : > { %v3524_v15 = vpop.f32.mrb[2].mxu1  ;;  %v1408_v18 = vrot.slane %v4606_v13, 1 }
 0x259   : > { %v3525_v14 = vpop.f32.mrb[3].mxu1 }
 0x25a   : > { %v4614_v17 = vadd.f32 %v3525_v14, %v3524_v15 }
 0x25c   : > { %v3527_v20 = vpop.f32.mrb[4].mxu1  ;;  %v1409_v38 = vrot.slane %v4614_v17, 1  ;;  %v1470_v25 = vrot.slane %v4614_v17, 2  ;;  %v1532_v35 = vrot.slane %v4614_v17, 3 }
 0x25d   : > { %v3528_v21 = vpop.f32.mrb[5].mxu1 }
 0x25e   : > { %v4618_v22 = vadd.f32 %v3528_v21, %v3527_v20  ;;  %v1410_v23 = vsel %vm918_vm3, %v1408_v18, %v1409_v38 }
 0x25f   : > { %1433 = vrot.lane.b32.xlu0 %v1410_v23, %s4164_s18 }
 0x260   : > { %v3530_v24 = vpop.f32.mrb[6].mxu1  ;;  %v1471_v27 = vrot.slane %v4618_v22, 2  ;;  %v1411_v61 = vrot.slane %v4618_v22, 1  ;;  %v1533_v16 = vrot.slane %v4618_v22, 3 }
 0x261   : > { %v3531_v29 = vpop.f32.mrb[7].mxu1 }
 0x262   : > { %v4625_v45 = vadd.f32 %v3531_v29, %v3530_v24  ;;  %v1472_v30 = vsel %vm1088_vm4, %v1470_v25, %v1471_v27  ;;  %v1412_v31 = vsel %vm918_vm3, %v1409_v38, %v1411_v61  ;;  %v1534_v41 = vsel %vm1531_vm5, %v1532_v35, %v1533_v16 }
 0x263   : > { %1495 = vrot.lane.b32.xlu1 %v1472_v30, %s4165_s19  ;;  %1435 = vrot.lane.b32.xlu0 %v1412_v31, %s4164_s18 }
 0x264   : > { %v3533_v26 = vpop.f32.mrb[8].mxu1  ;;  %v1473_v32 = vrot.slane %v4625_v45, 2  ;;  %v1535_v37 = vrot.slane %v4625_v45, 3  ;;  %v1413_v42 = vrot.slane %v4625_v45, 1 }
 0x265   : > { %v3534_v36 = vpop.f32.mrb[9].mxu1 }
 0x266   : > { %v4635_v39 = vadd.f32 %v3534_v36, %v3533_v26  ;;  %v1474_v40 = vsel %vm1088_vm4, %v1471_v27, %v1473_v32  ;;  %v1536_v44 = vsel %vm1531_vm5, %v1533_v16, %v1535_v37  ;;  %v1414_v47 = vsel %vm918_vm3, %v1411_v61, %v1413_v42 }
 0x267   : > { %1497 = vrot.lane.b32.xlu1 %v1474_v40, %s4165_s19  ;;  %1557 = vrot.lane.b32.xlu0 %v1534_v41, %s4166_s20 }
 0x268   : > { %v3536_v57 = vpop.f32.mrb[10].mxu1  ;;  %v1415_v48 = vrot.slane %v4635_v39, 1  ;;  %v1475_v49 = vrot.slane %v4635_v39, 2  ;;  %v1537_v52 = vrot.slane %v4635_v39, 3 }
 0x269   : > { %v3537_v43 = vpop.f32.mrb[11].mxu1 }
 0x26a   : > { %v4643_v46 = vadd.f32 %v3537_v43, %v3536_v57  ;;  %v1416_v54 = vsel %vm918_vm3, %v1413_v42, %v1415_v48  ;;  %v1476_v6 = vsel %vm1088_vm4, %v1473_v32, %v1475_v49  ;;  %v1538_v62 = vsel %vm1531_vm5, %v1535_v37, %v1537_v52 }
 0x26b   : > { %1559 = vrot.lane.b32.xlu1 %v1536_v44, %s4166_s20  ;;  %1437 = vrot.lane.b32.xlu0 %v1414_v47, %s4164_s18 }
 0x26c   : > { %v3539_v50 = vpop.f32.mrb[12].mxu1  ;;  %v1477_v55 = vrot.slane %v4643_v46, 2  ;;  %v1539_v59 = vrot.slane %v4643_v46, 3  ;;  %v1417_v0 = vrot.slane %v4643_v46, 1 }
 0x26d   : > { %v3540_v51 = vpop.f32.mrb[13].mxu1 }
 0x26e   : > { %v4651_v53 = vadd.f32 %v3540_v51, %v3539_v50  ;;  %v1478_v60 = vsel %vm1088_vm4, %v1475_v49, %v1477_v55  ;;  %v1540_v3 = vsel %vm1531_vm5, %v1537_v52, %v1539_v59  ;;  %v1418_v19 = vsel %vm918_vm3, %v1415_v48, %v1417_v0 }
 0x26f   : > { %1439 = vrot.lane.b32.xlu1 %v1416_v54, %s4164_s18  ;;  %1499 = vrot.lane.b32.xlu0 %v1476_v6, %s4165_s19 }
 0x270   : > { %v3542_v56 = vpop.f32.mrb[14].mxu1  ;;  %v1419_v7 = vrot.slane %v4651_v53, 1  ;;  %v1479_v8 = vrot.slane %v4651_v53, 2  ;;  %v1541_v10 = vrot.slane %v4651_v53, 3 }
 0x271   : > { %v3543_v58 = vpop.f32.mrb[15].mxu1 }
 0x272   : > { %v4661_v63 = vadd.f32 %v3543_v58, %v3542_v56  ;;  %v1420_v12 = vsel %vm918_vm3, %v1417_v0, %v1419_v7  ;;  %v1480_v15 = vsel %vm1088_vm4, %v1477_v55, %v1479_v8  ;;  %v1542_v38 = vsel %vm1531_vm5, %v1539_v59, %v1541_v10 }
 0x273   : > { %1501 = vrot.lane.b32.xlu1 %v1478_v60, %s4165_s19  ;;  %1561 = vrot.lane.b32.xlu0 %v1538_v62, %s4166_s20 }
 0x274   : > { %v3545_v1 = vpop.f32.mrb[16].mxu1  ;;  %v1481_v28 = vrot.slane %v4661_v63, 2  ;;  %v1543_v34 = vrot.slane %v4661_v63, 3  ;;  %v1421_v21 = vrot.slane %v4661_v63, 1 }
 0x275   : > { %v3546_v4 = vpop.f32.mrb[17].mxu1 }
 0x276   : > { %v4668_v5 = vadd.f32 %v3546_v4, %v3545_v1  ;;  %v1482_v20 = vsel %vm1088_vm4, %v1479_v8, %v1481_v28  ;;  %v1544_v25 = vsel %vm1531_vm5, %v1541_v10, %v1543_v34  ;;  %v1422_v61 = vsel %vm918_vm3, %v1419_v7, %v1421_v21 }
 0x277   : > { %1563 = vrot.lane.b32.xlu1 %v1540_v3, %s4166_s20  ;;  %1441 = vrot.lane.b32.xlu0 %v1418_v19, %s4164_s18 }
 0x278   : > { %v3548_v9 = vpop.f32.mrb[18].mxu1  ;;  %v1423_v29 = vrot.slane %v4668_v5, 1  ;;  %v1483_v30 = vrot.slane %v4668_v5, 2  ;;  %v1545_v26 = vrot.slane %v4668_v5, 3 }
 0x279   : > { %v3549_v11 = vpop.f32.mrb[19].mxu1 }
 0x27a   : > { %v4678_v33 = vadd.f32 %v3549_v11, %v3548_v9  ;;  %v1424_v35 = vsel %vm918_vm3, %v1421_v21, %v1423_v29  ;;  %v1484_v36 = vsel %vm1088_vm4, %v1481_v28, %v1483_v30  ;;  %v1546_v47 = vsel %vm1531_vm5, %v1543_v34, %v1545_v26 }
 0x27b   : > { %1443 = vrot.lane.b32.xlu1 %v1420_v12, %s4164_s18  ;;  %1503 = vrot.lane.b32.xlu0 %v1480_v15, %s4165_s19 }
 0x27c   : > { %v3551_v14 = vpop.f32.mrb[20].mxu1  ;;  %v1485_v37 = vrot.slane %v4678_v33, 2  ;;  %v1547_v42 = vrot.slane %v4678_v33, 3  ;;  %v1425_v57 = vrot.slane %v4678_v33, 1 }
 0x27d   : > { %v3552_v18 = vpop.f32.mrb[21].mxu1 }
 0x27e   : > { %v4686_v23 = vadd.f32 %v3552_v18, %v3551_v14  ;;  %v1486_v44 = vsel %vm1088_vm4, %v1483_v30, %v1485_v37  ;;  %v1548_v54 = vsel %vm1531_vm5, %v1545_v26, %v1547_v42  ;;  %v1426_v6 = vsel %vm918_vm3, %v1423_v29, %v1425_v57 }
 0x27f   : > { %1505 = vrot.lane.b32.xlu1 %v1482_v20, %s4165_s19  ;;  %1565 = vrot.lane.b32.xlu0 %v1542_v38, %s4166_s20 }
 0x280   : > { %v3554_v24 = vpop.f32.mrb[22].mxu1  ;;  %v1427_v55 = vrot.slane %v4686_v23, 1  ;;  %v1487_v56 = vrot.slane %v4686_v23, 2  ;;  %v1549_v1 = vrot.slane %v4686_v23, 3 }
 0x281   : > { %v3555_v27 = vpop.f32.mrb[23].mxu1 }
 0x282   : > { %v4694_v31 = vadd.f32 %v3555_v27, %v3554_v24  ;;  %v1428_v60 = vsel %vm918_vm3, %v1425_v57, %v1427_v55  ;;  %v1488_v62 = vsel %vm1088_vm4, %v1485_v37, %v1487_v56  ;;  %v1550_v4 = vsel %vm1531_vm5, %v1547_v42, %v1549_v1 }
 0x283   : > { %1567 = vrot.lane.b32.xlu1 %v1544_v25, %s4166_s20  ;;  %1445 = vrot.lane.b32.xlu0 %v1422_v61, %s4164_s18 }
 0x284   : > { %v3557_v16 = vpop.f32.mrb[24].mxu1  ;;  %v1489_v0 = vrot.slane %v4694_v31, 2  ;;  %v1551_v19 = vrot.slane %v4694_v31, 3  ;;  %v1429_v7 = vrot.slane %v4694_v31, 1 }
 0x285   : > { %v3558_v32 = vpop.f32.mrb[25].mxu1 }
 0x286   : > { %v3559_v40 = vadd.f32 %v3558_v32, %v3557_v16  ;;  %v1490_v3 = vsel %vm1088_vm4, %v1487_v56, %v1489_v0  ;;  %v1552_v9 = vsel %vm1531_vm5, %v1549_v1, %v1551_v19  ;;  %v1430_v10 = vsel %vm918_vm3, %v1427_v55, %v1429_v7 }
 0x287   : > { %1447 = vrot.lane.b32.xlu1 %v1424_v35, %s4164_s18  ;;  %1507 = vrot.lane.b32.xlu0 %v1484_v36, %s4165_s19 }
 0x288   : > { %v3560_v41 = vpop.f32.mrb[26].mxu1  ;;  %v1491_v49 = vrot.slane %v3559_v40, 2  ;;  %v1553_v50 = vrot.slane %v3559_v40, 3  ;;  %v1431_v8 = vrot.slane %v3559_v40, 1 }
 0x289   : > { %v3561_v43 = vpop.f32.mrb[27].mxu1 }
 0x28a   : > { %v3562_v48 = vadd.f32 %v3561_v43, %v3560_v41  ;;  %v1432_v11 = vsel %vm918_vm3, %v1429_v7, %v1431_v8  ;;  %v1492_v12 = vsel %vm1088_vm4, %v1489_v0, %v1491_v49  ;;  %v1554_v15 = vsel %vm1531_vm5, %v1551_v19, %v1553_v50 }
 0x28b   : > { %1509 = vrot.lane.b32.xlu1 %v1486_v44, %s4165_s19  ;;  %1569 = vrot.lane.b32.xlu0 %v1546_v47, %s4166_s20 }
 0x28c   : > { %v1493_v51 = vrot.slane %v3562_v48, 2  ;;  %v1555_v52 = vrot.slane %v3562_v48, 3 }
 0x28e   : > { %v1494_v58 = vsel %vm1088_vm4, %v1491_v49, %v1493_v51  ;;  %v1556_v59 = vsel %vm1531_vm5, %v1553_v50, %v1555_v52 }
 0x28f   : > { %1571 = vrot.lane.b32.xlu1 %v1548_v54, %s4166_s20  ;;  %1449 = vrot.lane.b32.xlu0 %v1426_v6, %s4164_s18 }
 0x293   : > { %1451 = vrot.lane.b32.xlu1 %v1428_v60, %s4164_s18  ;;  %1511 = vrot.lane.b32.xlu0 %v1488_v62, %s4165_s19 }
 0x297   : > { %1513 = vrot.lane.b32.xlu1 %v1490_v3, %s4165_s19  ;;  %1573 = vrot.lane.b32.xlu0 %v1550_v4, %s4166_s20 }
 0x29b   : > { %1575 = vrot.lane.b32.xlu1 %v1552_v9, %s4166_s20  ;;  %1453 = vrot.lane.b32.xlu0 %v1430_v10, %s4164_s18 }
 0x29f   : > { %1455 = vrot.lane.b32.xlu1 %v1432_v11, %s4164_s18  ;;  %1515 = vrot.lane.b32.xlu0 %v1492_v12, %s4165_s19 }
 0x2a3   : > { %1517 = vrot.lane.b32.xlu1 %v1494_v58, %s4165_s19  ;;  %1577 = vrot.lane.b32.xlu0 %v1554_v15, %s4166_s20 }
 0x2a7   : > { %1579 = vrot.lane.b32.xlu1 %v1556_v59, %s4166_s20 }
 0x2d1   : > { %v1434_v28 = vpop.permute.xlu0 %1433 }
 0x2d2   : > { %v1594_v18 = vsel %vm1593_vm6, %v4606_v13, %v1434_v28 }
 0x2d5   : > { %v1496_v14 = vpop.permute.xlu1 %1495  ;;  %v1436_v34 = vpop.permute.xlu0 %1435 }
 0x2d6   : > { %v1607_v20 = vsel %vm1606_vm7, %v1594_v18, %v1496_v14  ;;  %v1595_v25 = vsel %vm1593_vm6, %v4614_v17, %v1436_v34 }
 0x2d9   : > { %v1498_v38 = vpop.permute.xlu1 %1497  ;;  %v1558_v21 = vpop.permute.xlu0 %1557 }
 0x2da   : > { %v1620_v24 = vsel %vm1619_vm8, %v1607_v20, %v1558_v21  ;;  %v1608_v27 = vsel %vm1606_vm7, %v1595_v25, %v1498_v38 }
 0x2db   : > { %3784 = vmatprep.mubr.msk.f32.mxu1 %vm1647_vm9, %v1620_v24 }
 0x2dd   : > { %v1560_v61 = vpop.permute.xlu1 %1559  ;;  %v1438_v29 = vpop.permute.xlu0 %1437 }
 0x2de   : > { %v1621_v30 = vsel %vm1619_vm8, %v1608_v27, %v1560_v61  ;;  %v1596_v26 = vsel %vm1593_vm6, %v4618_v22, %v1438_v29 }
 0x2df   : > { %3785 = vmatmul.mubr.msk.f32.vlgmr.msra.gmra.mrb[28].mxu1 %vm1647_vm9, %v1621_v30 }
 0x2e1   : > { %v1440_v13 = vpop.permute.xlu1 %1439  ;;  %v1500_v16 = vpop.permute.xlu0 %1499 }
 0x2e2   : > { %v1609_v32 = vsel %vm1606_vm7, %v1596_v26, %v1500_v16  ;;  %v1597_v17 = vsel %vm1593_vm6, %v4625_v45, %v1440_v13 }
 0x2e5   : > { %v1502_v35 = vpop.permute.xlu1 %1501  ;;  %v1562_v36 = vpop.permute.xlu0 %1561 }
 0x2e6   : > { %v1622_v37 = vsel %vm1619_vm8, %v1609_v32, %v1562_v36  ;;  %v1610_v40 = vsel %vm1606_vm7, %v1597_v17, %v1502_v35 }
 0x2e7   : > { %3787 = vmatprep.mubr.msk.f32.mxu1 %vm1647_vm9, %v1622_v37 }
 0x2e9   : > { %v1564_v41 = vpop.permute.xlu1 %1563  ;;  %v1442_v42 = vpop.permute.xlu0 %1441 }
 0x2ea   : > { %v1623_v57 = vsel %vm1619_vm8, %v1610_v40, %v1564_v41  ;;  %v1598_v44 = vsel %vm1593_vm6, %v4635_v39, %v1442_v42 }
 0x2eb   : > { %3788 = vmatmul.mubr.msk.f32.gmra.mrb[30].mxu1 %vm1647_vm9, %v1623_v57 }
 0x2ed   : > { %v1444_v22 = vpop.permute.xlu1 %1443  ;;  %v1504_v43 = vpop.permute.xlu0 %1503 }
 0x2ee   : > { %v1611_v47 = vsel %vm1606_vm7, %v1598_v44, %v1504_v43  ;;  %v1599_v45 = vsel %vm1593_vm6, %v4643_v46, %v1444_v22 }
 0x2f1   : > { %v1506_v48 = vpop.permute.xlu1 %1505  ;;  %v1566_v49 = vpop.permute.xlu0 %1565 }
 0x2f2   : > { %v1624_v50 = vsel %vm1619_vm8, %v1611_v47, %v1566_v49  ;;  %v1612_v51 = vsel %vm1606_vm7, %v1599_v45, %v1506_v48 }
 0x2f3   : > { %3790 = vmatprep.mubr.msk.f32.mxu1 %vm1647_vm9, %v1624_v50 }
 0x2f5   : > { %v1568_v52 = vpop.permute.xlu1 %1567  ;;  %v1446_v54 = vpop.permute.xlu0 %1445 }
 0x2f6   : > { %v1625_v6 = vsel %vm1619_vm8, %v1612_v51, %v1568_v52  ;;  %v1600_v56 = vsel %vm1593_vm6, %v4651_v53, %v1446_v54 }
 0x2f7   : > { %3791 = vmatmul.mubr.msk.f32.gmra.mrb[32].mxu1 %vm1647_vm9, %v1625_v6 }
 0x2f9   : > { %v1448_v39 = vpop.permute.xlu1 %1447  ;;  %v1508_v55 = vpop.permute.xlu0 %1507 }
 0x2fa   : > { %v1613_v58 = vsel %vm1606_vm7, %v1600_v56, %v1508_v55  ;;  %v1601_v46 = vsel %vm1593_vm6, %v4661_v63, %v1448_v39 }
 0x2fd   : > { %v1510_v59 = vpop.permute.xlu1 %1509  ;;  %v1570_v60 = vpop.permute.xlu0 %1569 }
 0x2fe   : > { %v1626_v62 = vsel %vm1619_vm8, %v1613_v58, %v1570_v60  ;;  %v1614_v0 = vsel %vm1606_vm7, %v1601_v46, %v1510_v59 }
 0x2ff   : > { %3793 = vmatprep.mubr.msk.f32.mxu1 %vm1647_vm9, %v1626_v62 }
 0x301   : > { %v1572_v1 = vpop.permute.xlu1 %1571  ;;  %v1450_v3 = vpop.permute.xlu0 %1449 }
 0x302   : > { %v1627_v4 = vsel %vm1619_vm8, %v1614_v0, %v1572_v1  ;;  %v1602_v7 = vsel %vm1593_vm6, %v4668_v5, %v1450_v3 }
 0x303   : > { %3794 = vmatmul.mubr.msk.f32.gmra.mrb[34].mxu1 %vm1647_vm9, %v1627_v4 }
 0x305   : > { %v1452_v53 = vpop.permute.xlu1 %1451  ;;  %v1512_v19 = vpop.permute.xlu0 %1511 }
 0x306   : > { %v1615_v8 = vsel %vm1606_vm7, %v1602_v7, %v1512_v19  ;;  %v1603_v63 = vsel %vm1593_vm6, %v4678_v33, %v1452_v53 }
 0x309   : > { %v1514_v9 = vpop.permute.xlu1 %1513  ;;  %v1574_v10 = vpop.permute.xlu0 %1573 }
 0x30a   : > { %v1628_v11 = vsel %vm1619_vm8, %v1615_v8, %v1574_v10  ;;  %v1616_v12 = vsel %vm1606_vm7, %v1603_v63, %v1514_v9 }
 0x30b   : > { %3796 = vmatprep.mubr.msk.f32.mxu1 %vm1647_vm9, %v1628_v11 }
 0x30d   : > { %v1576_v15 = vpop.permute.xlu1 %1575  ;;  %v1454_v28 = vpop.permute.xlu0 %1453 }
 0x30e   : > { %v1629_v14 = vsel %vm1619_vm8, %v1616_v12, %v1576_v15  ;;  %v1604_v18 = vsel %vm1593_vm6, %v4686_v23, %v1454_v28  ;;  %v4805_v23 = vld [vmem:[%s5499_s10] sm:$0xff]  }
 0x30f   : > { %3797 = vmatmul.mubr.msk.f32.gmra.mrb[36].mxu1 %vm1647_vm9, %v1629_v14  ;;  %v3390_v29 = vunpack.c.l.bf16 %v4805_v23 }
 0x311   : > { %v1456_v5 = vpop.permute.xlu1 %1455  ;;  %v1516_v34 = vpop.permute.xlu0 %1515 }
 0x312   : > { %v1617_v20 = vsel %vm1606_vm7, %v1604_v18, %v1516_v34  ;;  %v1605_v33 = vsel %vm1593_vm6, %v4694_v31, %v1456_v5  ;;  %v4812_v31 = vld [vmem:[%s5493_s4] ss:$0 sm:$0xff] }
 0x315   : > { %v1518_v38 = vpop.permute.xlu1 %1517  ;;  %v1578_v21 = vpop.permute.xlu0 %1577 }
 0x316   : > { %v1630_v24 = vsel %vm1619_vm8, %v1617_v20, %v1578_v21  ;;  %v1618_v25 = vsel %vm1606_vm7, %v1605_v33, %v1518_v38 }
 0x317   : > { %3799 = vmatprep.mubr.msk.f32.mxu1 %vm1647_vm9, %v1630_v24 }
 0x319   : > { %v1580_v27 = vpop.permute.xlu1 %1579 }
 0x31a   : > { %v1631_v61 = vsel %vm1619_vm8, %v1618_v25, %v1580_v27 }
 0x31b   : > { %3800 = vmatmul.mubr.msk.f32.gmra.mrb[38].mxu1 %vm1647_vm9, %v1631_v61 }
 0x31c   : > { %3822 = vmatprep.mubr.msk.f32.mxu1 %vm1980_vm10, %v3390_v29 }
 0x3b2   : > { %v3786_v30 = vpop.f32.mrb[28].mxu1 }
 0x3b3   : > { %v1756_v13 = vadd.f32 %v3786_v30, %v4812_v31  ;;  %v1750_v16 = vpop.f32.mrb[29].mxu1 }
 0x3b4   : > { %v1751_v26 = vadd.f32 %v4812_v31, %v1750_v16 }
 0x3b5   : > { %v1810_v32 = vmax.f32 %v1756_v13, 0.0 }
 0x3b6   : > { %v1809_v35 = vmax.f32 %v1751_v26, 0.0 }
 0x3b7   : > { %v1833_v36 = vrot.slane %v1810_v32, 1  ;;  %v1874_v47 = vrot.slane %v1810_v32, 2  ;;  %v1915_v54 = vrot.slane %v1810_v32, 3 }
 0x3b8   : > { %v1832_v37 = vrot.slane %v1809_v35, 1 }
 0x3ba   : > { %v1834_v17 = vsel %vm918_vm3, %v1832_v37, %v1833_v36 }
 0x3bb   : > { %v1863_v40 = vmax.f32 %v1809_v35, %v1834_v17 }
 0x3be   : > { %v3789_v41 = vpop.f32.mrb[30].mxu1 }
 0x3bf   : > { %v1766_v42 = vadd.f32 %v3789_v41, %v4812_v31  ;;  %v1760_v57 = vpop.f32.mrb[31].mxu1 }
 0x3c0   : > { %v1761_v22 = vadd.f32 %v4812_v31, %v1760_v57 }
 0x3c1   : > { %v1812_v43 = vmax.f32 %v1766_v42, 0.0 }
 0x3c2   : > { %v1811_v44 = vmax.f32 %v1761_v22, 0.0 }
 0x3c3   : > { %v1837_v48 = vrot.slane %v1812_v43, 1  ;;  %v1877_v49 = vrot.slane %v1812_v43, 2  ;;  %v1918_v50 = vrot.slane %v1812_v43, 3 }
 0x3c4   : > { %v1835_v45 = vrot.slane %v1811_v44, 1  ;;  %v1875_v51 = vrot.slane %v1811_v44, 2  ;;  %v1916_v52 = vrot.slane %v1811_v44, 3 }
 0x3c6   : > { %v1838_v6 = vsel %vm918_vm3, %v1835_v45, %v1837_v48  ;;  %v1836_v39 = vsel %vm918_vm3, %v1833_v36, %v1835_v45  ;;  %v1876_v55 = vsel %vm1088_vm4, %v1874_v47, %v1875_v51  ;;  %v1878_v56 = vsel %vm1088_vm4, %v1875_v51, %v1877_v49 }
 0x3c7   : > { %v1865_v58 = vmax.f32 %v1811_v44, %v1838_v6  ;;  %v1864_v59 = vmax.f32 %v1810_v32, %v1836_v39  ;;  %v1905_v60 = vmax.f32 %v1863_v40, %v1876_v55  ;;  %v1917_v62 = vsel %vm1531_vm5, %v1915_v54, %v1916_v52 }
 0x3c8   : > { %v1919_v46 = vsel %vm1531_vm5, %v1916_v52, %v1918_v50 }
 0x3c9   : > { %v1906_v0 = vmax.f32 %v1864_v59, %v1878_v56  ;;  %v1946_v1 = vmax.f32 %v1905_v60, %v1917_v62 }
 0x3ca   : > { %v3792_v3 = vpop.f32.mrb[32].mxu1 }
 0x3cb   : > { %v1776_v4 = vadd.f32 %v3792_v3, %v4812_v31  ;;  %v1770_v53 = vpop.f32.mrb[33].mxu1  ;;  %v1947_v19 = vmax.f32 %v1906_v0, %v1919_v46 }
 0x3cc   : > { %v1771_v7 = vadd.f32 %v4812_v31, %v1770_v53 }
 0x3cd   : > { %v1814_v8 = vmax.f32 %v1776_v4, 0.0  ;;  %v3976_v9 = vpack.c.bf16 %v1947_v19, %v1946_v1 }
 0x3ce   : > { %v1813_v10 = vmax.f32 %v1771_v7, 0.0 }
 0x3cf   : > { %v1841_v11 = vrot.slane %v1814_v8, 1  ;;  %v1881_v63 = vrot.slane %v1814_v8, 2  ;;  %3977 = vmatprep.subr.bf16.mxu1 %v3976_v9  ;;  %v1922_v12 = vrot.slane %v1814_v8, 3 }
 0x3d0   : > { %v1839_v15 = vrot.slane %v1813_v10, 1  ;;  %v1879_v28 = vrot.slane %v1813_v10, 2  ;;  %v1920_v14 = vrot.slane %v1813_v10, 3  ;;  %3979 = vmatpush3.bf16.msra.mxu1 %v3976_v9 }
 0x3d2   : > { %v1842_v5 = vsel %vm918_vm3, %v1839_v15, %v1841_v11  ;;  %v1840_v34 = vsel %vm918_vm3, %v1837_v48, %v1839_v15  ;;  %v1880_v18 = vsel %vm1088_vm4, %v1877_v49, %v1879_v28  ;;  %v1882_v20 = vsel %vm1088_vm4, %v1879_v28, %v1881_v63 }
 0x3d3   : > { %v1867_v38 = vmax.f32 %v1813_v10, %v1842_v5  ;;  %v1866_v21 = vmax.f32 %v1812_v43, %v1840_v34  ;;  %v1907_v24 = vmax.f32 %v1865_v58, %v1880_v18  ;;  %v1921_v33 = vsel %vm1531_vm5, %v1918_v50, %v1920_v14 }
 0x3d4   : > { %v1923_v25 = vsel %vm1531_vm5, %v1920_v14, %v1922_v12 }
 0x3d5   : > { %v1908_v27 = vmax.f32 %v1866_v21, %v1882_v20  ;;  %v1948_v61 = vmax.f32 %v1907_v24, %v1921_v33 }
 0x3d6   : > { %v3795_v29 = vpop.f32.mrb[34].mxu1 }
 0x3d7   : > { %v1786_v30 = vadd.f32 %v3795_v29, %v4812_v31  ;;  %v1780_v13 = vpop.f32.mrb[35].mxu1  ;;  %v1949_v16 = vmax.f32 %v1908_v27, %v1923_v25 }
 0x3d8   : > { %v1781_v26 = vadd.f32 %v4812_v31, %v1780_v13 }
 0x3d9   : > { %v1816_v32 = vmax.f32 %v1786_v30, 0.0  ;;  %v3980_v35 = vpack.c.bf16 %v1949_v16, %v1948_v61 }
 0x3da   : > { %v1815_v36 = vmax.f32 %v1781_v26, 0.0 }
 0x3db   : > { %v1845_v37 = vrot.slane %v1816_v32, 1  ;;  %v1885_v17 = vrot.slane %v1816_v32, 2  ;;  %3981 = vmatprep.subr.bf16.mxu1 %v3980_v35  ;;  %v1926_v40 = vrot.slane %v1816_v32, 3 }
 0x3dc   : > { %v1843_v41 = vrot.slane %v1815_v36, 1  ;;  %v1883_v42 = vrot.slane %v1815_v36, 2  ;;  %v1924_v57 = vrot.slane %v1815_v36, 3  ;;  %3983 = vmatpush3.bf16.msra.mxu1 %v3980_v35 }
 0x3de   : > { %v1846_v22 = vsel %vm918_vm3, %v1843_v41, %v1845_v37  ;;  %v1844_v43 = vsel %vm918_vm3, %v1841_v11, %v1843_v41  ;;  %v1884_v44 = vsel %vm1088_vm4, %v1881_v63, %v1883_v42  ;;  %v1886_v47 = vsel %vm1088_vm4, %v1883_v42, %v1885_v17  ;;  %v3440_v42 = vld [vmem:[%s5499_s10 + $0x8] sm:$0xff]  }
 0x3df   : > { %v1869_v48 = vmax.f32 %v1815_v36, %v1846_v22  ;;  %v1868_v49 = vmax.f32 %v1814_v8, %v1844_v43  ;;  %v1909_v50 = vmax.f32 %v1867_v38, %v1884_v44  ;;  %v1925_v45 = vsel %vm1531_vm5, %v1922_v12, %v1924_v57  ;;  %v3441_v43 = vld [vmem:[%s5499_s10 + $0x10] sm:$0xff]  }
 0x3e0   : > { %v1927_v51 = vsel %vm1531_vm5, %v1924_v57, %v1926_v40  ;;  %v3391_v57 = vunpack.c.h.bf16 %v4805_v23  ;;  %v3394_v22 = vunpack.c.l.bf16 %v3440_v42  ;;  %v3395_v44 = vunpack.c.h.bf16 %v3440_v42 }
 0x3e1   : > { %v1910_v52 = vmax.f32 %v1868_v49, %v1886_v47  ;;  %v1950_v54 = vmax.f32 %v1909_v50, %v1925_v45  ;;  %v3398_v47 = vunpack.c.l.bf16 %v3441_v43  ;;  %v3399_v49 = vunpack.c.h.bf16 %v3441_v43  ;;  %v3443_v50 = vld [vmem:[%s5499_s10 + $0x20] sm:$0xff]  }
 0x3e2   : > { %v3798_v6 = vpop.f32.mrb[36].mxu1 }
 0x3e3   : > { %v1796_v39 = vadd.f32 %v3798_v6, %v4812_v31  ;;  %v1790_v55 = vpop.f32.mrb[37].mxu1  ;;  %v1951_v56 = vmax.f32 %v1910_v52, %v1927_v51  ;;  %v3406_v51 = vunpack.c.l.bf16 %v3443_v50  ;;  %v3444_v52 = vld [vmem:[%s5499_s10 + $0x28] sm:$0xff]  }
 0x3e4   : > { %v1791_v58 = vadd.f32 %v4812_v31, %v1790_v55  ;;  %v3410_v6 = vunpack.c.l.bf16 %v3444_v52  ;;  %v2338_v55 = vld [vmem:[%s5494_s5] sm:$0xff] }
 0x3e5   : > { %v1818_v59 = vmax.f32 %v1796_v39, 0.0  ;;  %v3984_v60 = vpack.c.bf16 %v1951_v56, %v1950_v54  ;;  %v3407_v54 = vunpack.c.h.bf16 %v3443_v50  ;;  %v3411_v39 = vunpack.c.h.bf16 %v3444_v52  ;;  %v2339_v56 = vld [vmem:[%s5494_s5 + $0x8] sm:$0xff] }
 0x3e6   : > { %v1817_v62 = vmax.f32 %v1791_v58, 0.0  ;;  %v2340_v58 = vld [vmem:[%s5494_s5 + $0x10] sm:$0xff] }
 0x3e7   : > { %v1849_v46 = vrot.slane %v1818_v59, 1  ;;  %v1889_v0 = vrot.slane %v1818_v59, 2  ;;  %3985 = vmatprep.subr.bf16.mxu1 %v3984_v60  ;;  %v1930_v1 = vrot.slane %v1818_v59, 3 }
 0x3e8   : > { %v1847_v3 = vrot.slane %v1817_v62, 1  ;;  %v1887_v4 = vrot.slane %v1817_v62, 2  ;;  %v1928_v53 = vrot.slane %v1817_v62, 3  ;;  %3987 = vmatpush3.bf16.msra.mxu1 %v3984_v60  ;;  %v2341_v60 = vld [vmem:[%s5494_s5 + $0x18] sm:$0xff] }
 0x3ea   : > { %v1850_v19 = vsel %vm918_vm3, %v1847_v3, %v1849_v46  ;;  %v1848_v7 = vsel %vm918_vm3, %v1845_v37, %v1847_v3  ;;  %v1888_v8 = vsel %vm1088_vm4, %v1885_v17, %v1887_v4  ;;  %v1890_v9 = vsel %vm1088_vm4, %v1887_v4, %v1889_v0  ;;  %v2344_v3 = vld [vmem:[%s5494_s5 + $0x30] sm:$0xff]  ;;  %v2345_v4 = vld [vmem:[%s5494_s5 + $0x38] sm:$0xff] }
 0x3eb   : > { %v1871_v10 = vmax.f32 %v1817_v62, %v1850_v19  ;;  %v1870_v11 = vmax.f32 %v1816_v32, %v1848_v7  ;;  %v1911_v63 = vmax.f32 %v1869_v48, %v1888_v8  ;;  %v1929_v12 = vsel %vm1531_vm5, %v1926_v40, %v1928_v53  ;;  %v3442_v48 = vld [vmem:[%s5499_s10 + $0x18] sm:$0xff]   ;;  %v2346_v19 = vld [vmem:[%s5494_s5 + $0x40] sm:$0xff]  ;;  %v2347_v7 = vld [vmem:[%s5494_s5 + $0x48] sm:$0xff] }
 0x3ec   : > { %v1931_v15 = vsel %vm1531_vm5, %v1928_v53, %v1930_v1  ;;  %v3402_v23 = vunpack.c.l.bf16 %v3442_v48  ;;  %v3403_v45 = vunpack.c.h.bf16 %v3442_v48  ;;  %v4000_v62 = vpack.c.bf16 %v2341_v60, %v2340_v58 }
 0x3ed   : > { %v1912_v28 = vmax.f32 %v1870_v11, %v1890_v9  ;;  %v1952_v14 = vmax.f32 %v1911_v63, %v1929_v12  ;;  %v4008_v53 = vpack.c.bf16 %v2345_v4, %v2344_v3  ;;  %v4012_v8 = vpack.c.bf16 %v2347_v7, %v2346_v19  ;;  %v2348_v9 = vld [vmem:[%s5494_s5 + $0x50] sm:$0xff]  ;;  %v2350_v63 = vld [vmem:[%s5494_s5 + $0x60] sm:$0xff]  ;;  %v2351_v12 = vld [vmem:[%s5494_s5 + $0x68] sm:$0xff] }
 0x3ee   : > { %v3801_v5 = vpop.f32.mrb[38].mxu1 }
 0x3ef   : > { %v1806_v34 = vadd.f32 %v3801_v5, %v4812_v31  ;;  %v1800_v18 = vpop.f32.mrb[39].mxu1  ;;  %v1953_v20 = vmax.f32 %v1912_v28, %v1931_v15  ;;  %v4020_v15 = vpack.c.bf16 %v2351_v12, %v2350_v63 }
 0x3f0   : > { %v1801_v38 = vadd.f32 %v4812_v31, %v1800_v18  ;;  %v2352_v18 = vld [vmem:[%s5494_s5 + $0x70] sm:$0xff] }
 0x3f1   : > { %v1820_v21 = vmax.f32 %v1806_v34, 0.0  ;;  %v3988_v24 = vpack.c.bf16 %v1953_v20, %v1952_v14  ;;  %v2353_v20 = vld [vmem:[%s5494_s5 + $0x78] sm:$0xff] }
 0x3f2   : > { %v1819_v33 = vmax.f32 %v1801_v38, 0.0  ;;  %v4024_v38 = vpack.c.bf16 %v2353_v20, %v2352_v18 }
 0x3f3   : > { %v1893_v25 = vrot.slane %v1820_v21, 2  ;;  %v1934_v27 = vrot.slane %v1820_v21, 3  ;;  %3989 = vmatprep.subr.bf16.mxu1 %v3988_v24 }
 0x3f4   : > { %v1851_v61 = vrot.slane %v1819_v33, 1  ;;  %v1891_v29 = vrot.slane %v1819_v33, 2  ;;  %v1932_v30 = vrot.slane %v1819_v33, 3  ;;  %3991 = vmatpush3.bf16.msra.mxu1 %v3988_v24 }
 0x3f6   : > { %v1852_v13 = vsel %vm918_vm3, %v1849_v46, %v1851_v61  ;;  %v1892_v16 = vsel %vm1088_vm4, %v1889_v0, %v1891_v29  ;;  %v1894_v26 = vsel %vm1088_vm4, %v1891_v29, %v1893_v25  ;;  %v1933_v32 = vsel %vm1531_vm5, %v1930_v1, %v1932_v30  ;;  %v2342_v46 = vld [vmem:[%s5494_s5 + $0x20] sm:$0xff]  ;;  %v2343_v0 = vld [vmem:[%s5494_s5 + $0x28] sm:$0xff] }
 0x3f7   : > { %v1872_v35 = vmax.f32 %v1818_v59, %v1852_v13  ;;  %v1913_v31 = vmax.f32 %v1871_v10, %v1892_v16  ;;  %v1935_v36 = vsel %vm1531_vm5, %v1932_v30, %v1934_v27  ;;  %v3996_v59 = vpack.c.bf16 %v2339_v56, %v2338_v55  ;;  %v2349_v10 = vld [vmem:[%s5494_s5 + $0x58] sm:$0xff] }
 0x3f8   : > { %v4004_v1 = vpack.c.bf16 %v2343_v0, %v2342_v46  ;;  %v4016_v11 = vpack.c.bf16 %v2349_v10, %v2348_v9 }
 0x3f9   : > { %v1914_v37 = vmax.f32 %v1872_v35, %v1894_v26  ;;  %v1954_v17 = vmax.f32 %v1913_v31, %v1933_v32 }
 0x3fb   : > { %v1955_v40 = vmax.f32 %v1914_v37, %v1935_v36 }
 0x3fd   : > { %v3992_v41 = vpack.c.bf16 %v1955_v40, %v1954_v17 }
 0x3ff   : > { %3993 = vmatprep.subr.bf16.mxu1 %v3992_v41 }
 0x400   : > { %3995 = vmatpush3.bf16.msra.mxu1 %v3992_v41 }
 0x401   : > { %3997 = vmatprep.subr.bf16.mxu1 %v3996_v59 }
 0x403   : > { %3823 = vmatmul.mubr.msk.f32.vlgmr.msra.gmra.mrb[40].mxu1 %vm1980_vm10, %v3391_v57 }
 0x404   : > { %3825 = vmatprep.mubr.msk.f32.mxu1 %vm1980_vm10, %v3394_v22  ;;  %3999 = vmatpush3.bf16.msra.mxu1 %v3996_v59 }
 0x405   : > { %4001 = vmatprep.subr.bf16.mxu1 %v4000_v62 }
 0x407   : > { %3826 = vmatmul.mubr.msk.f32.gmra.mrb[42].mxu1 %vm1980_vm10, %v3395_v44 }
 0x408   : > { %3828 = vmatprep.mubr.msk.f32.mxu1 %vm1980_vm10, %v3398_v47  ;;  %4003 = vmatpush3.bf16.msra.mxu1 %v4000_v62 }
 0x409   : > { %4005 = vmatprep.subr.bf16.mxu1 %v4004_v1 }
 0x40b   : > { %3829 = vmatmul.mubr.msk.f32.gmra.mrb[44].mxu1 %vm1980_vm10, %v3399_v49 }
 0x40c   : > { %3831 = vmatprep.mubr.msk.f32.mxu1 %vm1980_vm10, %v3402_v23  ;;  %4007 = vmatpush3.bf16.msra.mxu1 %v4004_v1 }
 0x40d   : > { %4009 = vmatprep.subr.bf16.mxu1 %v4008_v53 }
 0x40f   : > { %3832 = vmatmul.mubr.msk.f32.gmra.mrb[46].mxu1 %vm1980_vm10, %v3403_v45 }
 0x410   : > { %3834 = vmatprep.mubr.msk.f32.mxu1 %vm1980_vm10, %v3406_v51  ;;  %4011 = vmatpush3.bf16.msra.mxu1 %v4008_v53 }
 0x411   : > { %4013 = vmatprep.subr.bf16.mxu1 %v4012_v8 }
 0x413   : > { %3835 = vmatmul.mubr.msk.f32.gmra.mrb[48].mxu1 %vm1980_vm10, %v3407_v54 }
 0x414   : > { %3837 = vmatprep.mubr.msk.f32.mxu1 %vm1980_vm10, %v3410_v6  ;;  %4015 = vmatpush3.bf16.msra.mxu1 %v4012_v8 }
 0x415   : > { %4017 = vmatprep.subr.bf16.mxu1 %v4016_v11 }
 0x417   : > { %3838 = vmatmul.mubr.msk.f32.gmra.mrb[50].mxu1 %vm1980_vm10, %v3411_v39 }
 0x418   : > { %4019 = vmatpush3.bf16.msra.mxu1 %v4016_v11 }
 0x419   : > { %4021 = vmatprep.subr.bf16.mxu1 %v4020_v15 }
 0x41c   : > { %4023 = vmatpush3.bf16.msra.mxu1 %v4020_v15 }
 0x41d   : > { %4025 = vmatprep.subr.bf16.mxu1 %v4024_v38 }
 0x420   : > { %4027 = vmatpush3.bf16.msra.mxu1 %v4024_v38 }
 0x4d6   : > { %v4925_v28 = vpop.f32.mrb[40].mxu1 }
 0x4d7   : > { %v2154_v14 = vrot.slane %v4925_v28, 1  ;;  %v4928_v5 = vpop.f32.mrb[41].mxu1  ;;  %v2205_v33 = vrot.slane %v4925_v28, 2  ;;  %v2256_v61 = vrot.slane %v4925_v28, 3 }
 0x4d8   : > { %v2153_v34 = vrot.slane %v4928_v5, 1 }
 0x4da   : > { %v4937_v21 = vpop.f32.mrb[42].mxu1  ;;  %v2155_v24 = vsel %vm918_vm3, %v2153_v34, %v2154_v14 }
 0x4db   : > { %v2208_v25 = vrot.slane %v4937_v21, 2  ;;  %v4942_v27 = vpop.f32.mrb[43].mxu1  ;;  %v2158_v16 = vrot.slane %v4937_v21, 1  ;;  %v2259_v26 = vrot.slane %v4937_v21, 3 }
 0x4dc   : > { %v2156_v29 = vrot.slane %v4942_v27, 1  ;;  %v2206_v30 = vrot.slane %v4942_v27, 2  ;;  %v2257_v13 = vrot.slane %v4942_v27, 3 }
 0x4de   : > { %v4950_v32 = vpop.f32.mrb[44].mxu1  ;;  %v2207_v35 = vsel %vm1088_vm4, %v2205_v33, %v2206_v30  ;;  %v2209_v31 = vsel %vm1088_vm4, %v2206_v30, %v2208_v25  ;;  %v2157_v36 = vsel %vm918_vm3, %v2154_v14, %v2156_v29  ;;  %v2258_v37 = vsel %vm1531_vm5, %v2256_v61, %v2257_v13 }
 0x4df   : > { %v2212_v17 = vrot.slane %v4950_v32, 2  ;;  %v4957_v40 = vpop.f32.mrb[45].mxu1  ;;  %v4082_v41 = vpack.i.bf16 %v2209_v31, %v2207_v35  ;;  %v2162_v42 = vrot.slane %v4950_v32, 1  ;;  %v4077_v43 = vpack.i.bf16 %v2157_v36, %v2155_v24 }
 0x4e0   : > { %v2160_v57 = vrot.slane %v4957_v40, 1  ;;  %v2210_v22 = vrot.slane %v4957_v40, 2  ;;  %v2263_v44 = vrot.slane %v4950_v32, 3  ;;  %v2261_v47 = vrot.slane %v4957_v40, 3 }
 0x4e1   : > { %4083 = vrot.lane.b32.xlu1 %v4082_v41, %s4167_s25  ;;  %v2260_v48 = vsel %vm1531_vm5, %v2257_v13, %v2259_v26  ;;  %v2159_v49 = vsel %vm918_vm3, %v2156_v29, %v2158_v16  ;;  %4078 = vrot.lane.b32.xlu0 %v4077_v43, %s4165_s19 }
 0x4e2   : > { %v4087_v23 = vpack.i.bf16 %v2260_v48, %v2258_v37  ;;  %v2161_v50 = vsel %vm918_vm3, %v2158_v16, %v2160_v57  ;;  %v4969_v45 = vpop.f32.mrb[46].mxu1  ;;  %v2211_v51 = vsel %vm1088_vm4, %v2208_v25, %v2210_v22  ;;  %v2213_v52 = vsel %vm1088_vm4, %v2210_v22, %v2212_v17 }
 0x4e3   : > { %v4092_v54 = vpack.i.bf16 %v2161_v50, %v2159_v49  ;;  %v2166_v6 = vrot.slane %v4969_v45, 1  ;;  %v2216_v39 = vrot.slane %v4969_v45, 2  ;;  %v4975_v55 = vpop.f32.mrb[47].mxu1  ;;  %v2267_v56 = vrot.slane %v4969_v45, 3 }
 0x4e4   : > { %v2164_v58 = vrot.slane %v4975_v55, 1  ;;  %v2214_v59 = vrot.slane %v4975_v55, 2  ;;  %v4097_v60 = vpack.i.bf16 %v2213_v52, %v2211_v51  ;;  %v2265_v62 = vrot.slane %v4975_v55, 3 }
 0x4e5   : > { %4093 = vrot.lane.b32.xlu1 %v4092_v54, %s4165_s19  ;;  %v2262_v46 = vsel %vm1531_vm5, %v2259_v26, %v2261_v47  ;;  %v2264_v0 = vsel %vm1531_vm5, %v2261_v47, %v2263_v44  ;;  %v2163_v1 = vsel %vm918_vm3, %v2160_v57, %v2162_v42  ;;  %4088 = vrot.lane.b32.xlu0 %v4087_v23, %s4168_s26 }
 0x4e6   : > { %v4102_v3 = vpack.i.bf16 %v2264_v0, %v2262_v46  ;;  %v4986_v4 = vpop.f32.mrb[48].mxu1  ;;  %v2215_v53 = vsel %vm1088_vm4, %v2212_v17, %v2214_v59  ;;  %v2217_v19 = vsel %vm1088_vm4, %v2214_v59, %v2216_v39  ;;  %v2165_v7 = vsel %vm918_vm3, %v2162_v42, %v2164_v58 }
 0x4e7   : > { %v2170_v8 = vrot.slane %v4986_v4, 1  ;;  %v2220_v9 = vrot.slane %v4986_v4, 2  ;;  %v4993_v10 = vpop.f32.mrb[49].mxu1  ;;  %v4112_v11 = vpack.i.bf16 %v2217_v19, %v2215_v53  ;;  %v4107_v14 = vpack.i.bf16 %v2165_v7, %v2163_v1 }
 0x4e8   : > { %v2168_v63 = vrot.slane %v4993_v10, 1  ;;  %v2218_v12 = vrot.slane %v4993_v10, 2  ;;  %v2269_v15 = vrot.slane %v4993_v10, 3  ;;  %v2271_v34 = vrot.slane %v4986_v4, 3 }
 0x4e9   : > { %4103 = vrot.lane.b32.xlu1 %v4102_v3, %s4168_s26  ;;  %v2266_v18 = vsel %vm1531_vm5, %v2263_v44, %v2265_v62  ;;  %v2268_v20 = vsel %vm1531_vm5, %v2265_v62, %v2267_v56  ;;  %v2167_v38 = vsel %vm918_vm3, %v2164_v58, %v2166_v6  ;;  %4098 = vrot.lane.b32.xlu0 %v4097_v60, %s4167_s25 }
 0x4ea   : > { %v4117_v24 = vpack.i.bf16 %v2268_v20, %v2266_v18  ;;  %v2169_v33 = vsel %vm918_vm3, %v2166_v6, %v2168_v63  ;;  %v3839_v25 = vpop.f32.mrb[50].mxu1  ;;  %v2219_v61 = vsel %vm1088_vm4, %v2216_v39, %v2218_v12  ;;  %v2221_v29 = vsel %vm1088_vm4, %v2218_v12, %v2220_v9 }
 0x4eb   : > { %v4122_v30 = vpack.i.bf16 %v2169_v33, %v2167_v38  ;;  %v2224_v13 = vrot.slane %v3839_v25, 2  ;;  %v2275_v16 = vrot.slane %v3839_v25, 3  ;;  %v2133_v26 = vpop.f32.mrb[51].mxu1  ;;  %v4127_v35 = vpack.i.bf16 %v2221_v29, %v2219_v61 }
 0x4ec   : > { %v2172_v31 = vrot.slane %v2133_v26, 1  ;;  %v2222_v36 = vrot.slane %v2133_v26, 2  ;;  %v2273_v37 = vrot.slane %v2133_v26, 3  ;;  %v2270_v17 = vsel %vm1531_vm5, %v2267_v56, %v2269_v15 }
 0x4ed   : > { %4113 = vrot.lane.b32.xlu1 %v4112_v11, %s4167_s25  ;;  %v2272_v41 = vsel %vm1531_vm5, %v2269_v15, %v2271_v34  ;;  %v2171_v42 = vsel %vm918_vm3, %v2168_v63, %v2170_v8  ;;  %4108 = vrot.lane.b32.xlu0 %v4107_v14, %s4165_s19 }
 0x4ee   : > { %v4132_v57 = vpack.i.bf16 %v2272_v41, %v2270_v17  ;;  %v2173_v22 = vsel %vm918_vm3, %v2170_v8, %v2172_v31  ;;  %v2223_v43 = vsel %vm1088_vm4, %v2220_v9, %v2222_v36  ;;  %v2225_v44 = vsel %vm1088_vm4, %v2222_v36, %v2224_v13 }
 0x4ef   : > { %v4137_v47 = vpack.i.bf16 %v2173_v22, %v2171_v42  ;;  %v4142_v48 = vpack.i.bf16 %v2225_v44, %v2223_v43  ;;  %v2274_v49 = vsel %vm1531_vm5, %v2271_v34, %v2273_v37  ;;  %v2276_v23 = vsel %vm1531_vm5, %v2273_v37, %v2275_v16 }
 0x4f0   : > { %v4147_v50 = vpack.i.bf16 %v2276_v23, %v2274_v49 }
 0x4f1   : > { %4123 = vrot.lane.b32.xlu1 %v4122_v30, %s4165_s19  ;;  %4118 = vrot.lane.b32.xlu0 %v4117_v24, %s4168_s26 }
 0x4f5   : > { %4133 = vrot.lane.b32.xlu1 %v4132_v57, %s4168_s26  ;;  %4128 = vrot.lane.b32.xlu0 %v4127_v35, %s4167_s25 }
 0x4f9   : > { %4143 = vrot.lane.b32.xlu1 %v4142_v48, %s4167_s25  ;;  %4138 = vrot.lane.b32.xlu0 %v4137_v47, %s4165_s19  ;;  %s4059_s19 = smul.u32 3, %s5504_s28 }
 0x4fb   : > { %s440_s8 = scalar_lea.vmem %s5502_s13, %s4059_s19 }
 0x4fd   : > { %4148 = vrot.lane.b32.xlu0 %v4147_v50, %s4168_s26 }
 0x553   : > { %v4084_v51 = vpop.permute.xlu1 %4083  ;;  %v4079_v52 = vpop.permute.xlu0 %4078 }
 0x554   : > { %v4081_v54 = vunpack.i.h.bf16 %v4079_v52  ;;  %v4080_v6 = vunpack.i.l.bf16 %v4079_v52  ;;  %v4086_v39 = vunpack.i.h.bf16 %v4084_v51  ;;  %v4085_v56 = vunpack.i.l.bf16 %v4084_v51 }
 0x556   : > { %v2308_v58 = vsel %vm1606_vm7, %v4925_v28, %v4081_v54  ;;  %v2307_v60 = vsel %vm1606_vm7, %v4928_v5, %v4080_v6 }
 0x557   : > { %v4094_v59 = vpop.permute.xlu1 %4093  ;;  %v4089_v62 = vpop.permute.xlu0 %4088  ;;  %v2317_v53 = vsel %vm1647_vm9, %v2307_v60, %v4085_v56  ;;  %v2318_v19 = vsel %vm1647_vm9, %v2308_v58, %v4086_v39 }
 0x558   : > { %v4091_v46 = vunpack.i.h.bf16 %v4089_v62  ;;  %v4090_v0 = vunpack.i.l.bf16 %v4089_v62  ;;  %v4096_v1 = vunpack.i.h.bf16 %v4094_v59  ;;  %v4095_v3 = vunpack.i.l.bf16 %v4094_v59 }
 0x55a   : > { %v2328_v7 = vsel %vm2327_vm11, %v2317_v53, %v4090_v0  ;;  %v2329_v9 = vsel %vm2327_vm11, %v2318_v19, %v4091_v46  ;;  %v2309_v15 = vsel %vm1606_vm7, %v4942_v27, %v4095_v3  ;;  %v2310_v14 = vsel %vm1606_vm7, %v4937_v21, %v4096_v1  ;;  %v476_v53 = vld [vmem:[%s4264_s16 + $0x118] sm:$0xff] }
 0x55b   : > { %v4104_v8 = vpop.permute.xlu1 %4103  ;;  %3872 = vmatprep.mubr.f32.mxu1 %v2328_v7  ;;  %v4099_v28 = vpop.permute.xlu0 %4098  ;;  %3763 = vmatmul.mubr.msk.f32.gmra.mrb[70].mxu0 %vm486_vm2, %v476_v53  ;;  %v5080_v7 = vld [vmem:[%s5500_s11 + $0x30] sm:$0xff]   ;;  %v5124_v53 = vld [vmem:[%s5496_s7 + $0x1] ss:$0 sm:$0xff] }
 0x55c   : > { %v4106_v11 = vunpack.i.h.bf16 %v4104_v8  ;;  %v4105_v63 = vunpack.i.l.bf16 %v4104_v8  ;;  %v4101_v5 = vunpack.i.h.bf16 %v4099_v28  ;;  %v4100_v12 = vunpack.i.l.bf16 %v4099_v28  ;;  %3873 = vmatmul.mubr.f32.vlgmr.msra.gmra.mrb[52].mxu1 %v2329_v9  ;;  %3765 = vmatprep.mubr.msk.f32.mxu0 %vm4163_vm1, %v4162_v2  ;;  %v3366_v2 = vld [vmem:[%s5495_s6] ss:$0 sm:$0xff] }
 0x55d   : > { %v3438_v8 = vunpack.c.l.bf16 %v5080_v7 }
 0x55e   : > { %v2319_v18 = vsel %vm1647_vm9, %v2309_v15, %v4100_v12  ;;  %v2320_v20 = vsel %vm1647_vm9, %v2310_v14, %v4101_v5 }
 0x55f   : > { %v4114_v34 = vpop.permute.xlu1 %4113  ;;  %v4109_v38 = vpop.permute.xlu0 %4108  ;;  %v2330_v24 = vsel %vm2327_vm11, %v2319_v18, %v4105_v63  ;;  %v2331_v33 = vsel %vm2327_vm11, %v2320_v20, %v4106_v11 }
 0x560   : > { %v4111_v25 = vunpack.i.h.bf16 %v4109_v38  ;;  %v4110_v61 = vunpack.i.l.bf16 %v4109_v38  ;;  %3875 = vmatprep.mubr.f32.mxu1 %v2330_v24  ;;  %v4116_v29 = vunpack.i.h.bf16 %v4114_v34  ;;  %v4115_v30 = vunpack.i.l.bf16 %v4114_v34 }
 0x561   : > { %3876 = vmatmul.mubr.f32.gmra.mrb[54].mxu1 %v2331_v33 }
 0x562   : > { %v2311_v21 = vsel %vm1606_vm7, %v4957_v40, %v4110_v61  ;;  %v2312_v13 = vsel %vm1606_vm7, %v4950_v32, %v4111_v25 }
 0x563   : > { %v4124_v27 = vpop.permute.xlu1 %4123  ;;  %v4119_v16 = vpop.permute.xlu0 %4118  ;;  %v2321_v37 = vsel %vm1647_vm9, %v2311_v21, %v4115_v30  ;;  %v2322_v17 = vsel %vm1647_vm9, %v2312_v13, %v4116_v29 }
 0x564   : > { %v4121_v26 = vunpack.i.h.bf16 %v4119_v16  ;;  %v4120_v35 = vunpack.i.l.bf16 %v4119_v16  ;;  %v4126_v31 = vunpack.i.h.bf16 %v4124_v27  ;;  %v4125_v36 = vunpack.i.l.bf16 %v4124_v27 }
 0x566   : > { %v2332_v41 = vsel %vm2327_vm11, %v2321_v37, %v4120_v35  ;;  %v2333_v42 = vsel %vm2327_vm11, %v2322_v17, %v4121_v26  ;;  %v2313_v47 = vsel %vm1606_vm7, %v4975_v55, %v4125_v36  ;;  %v2314_v48 = vsel %vm1606_vm7, %v4969_v45, %v4126_v31 }
 0x567   : > { %v4134_v57 = vpop.permute.xlu1 %4133  ;;  %3878 = vmatprep.mubr.f32.mxu1 %v2332_v41  ;;  %v4129_v22 = vpop.permute.xlu0 %4128 }
 0x568   : > { %v4136_v40 = vunpack.i.h.bf16 %v4134_v57  ;;  %v4135_v43 = vunpack.i.l.bf16 %v4134_v57  ;;  %v4131_v44 = vunpack.i.h.bf16 %v4129_v22  ;;  %v4130_v32 = vunpack.i.l.bf16 %v4129_v22  ;;  %3879 = vmatmul.mubr.f32.gmra.mrb[56].mxu1 %v2333_v42 }
 0x56a   : > { %v2323_v49 = vsel %vm1647_vm9, %v2313_v47, %v4130_v32  ;;  %v2324_v50 = vsel %vm1647_vm9, %v2314_v48, %v4131_v44  ;;  %v3445_v32 = vld [vmem:[%s5500_s11 + $0x8] sm:$0xff]   ;;  %v3439_v48 = vunpack.c.h.bf16 %v5080_v7 }
 0x56b   : > { %v4144_v23 = vpop.permute.xlu1 %4143  ;;  %v4139_v51 = vpop.permute.xlu0 %4138  ;;  %v2334_v52 = vsel %vm2327_vm11, %v2323_v49, %v4135_v43  ;;  %v2335_v54 = vsel %vm2327_vm11, %v2324_v50, %v4136_v40  ;;  %v3418_v49 = vunpack.c.l.bf16 %v3445_v32  ;;  %v3419_v50 = vunpack.c.h.bf16 %v3445_v32 }
 0x56c   : > { %v4141_v6 = vunpack.i.h.bf16 %v4139_v51  ;;  %v4140_v39 = vunpack.i.l.bf16 %v4139_v51  ;;  %3881 = vmatprep.mubr.f32.mxu1 %v2334_v52  ;;  %v4146_v56 = vunpack.i.h.bf16 %v4144_v23  ;;  %v4145_v58 = vunpack.i.l.bf16 %v4144_v23  ;;  %v3446_v23 = vld [vmem:[%s5500_s11 + $0x10] sm:$0xff]   ;;  %v3447_v52 = vld [vmem:[%s5500_s11 + $0x18] sm:$0xff]  }
 0x56d   : > { %3882 = vmatmul.mubr.f32.gmra.mrb[58].mxu1 %v2335_v54  ;;  %v3422_v51 = vunpack.c.l.bf16 %v3446_v23  ;;  %v3423_v54 = vunpack.c.h.bf16 %v3446_v23 }
 0x56e   : > { %v2315_v45 = vsel %vm1606_vm7, %v4993_v10, %v4140_v39  ;;  %v2316_v55 = vsel %vm1606_vm7, %v4986_v4, %v4141_v6  ;;  %v477_v4 = vld [vmem:[%s4264_s16 + $0x120] sm:$0xff]  ;;  %v3426_v6 = vunpack.c.l.bf16 %v3447_v52 }
 0x56f   : > { %v4149_v59 = vpop.permute.xlu0 %4148  ;;  %v2325_v46 = vsel %vm1647_vm9, %v2315_v45, %v4145_v58  ;;  %v2326_v0 = vsel %vm1647_vm9, %v2316_v55, %v4146_v56  ;;  %3766 = vmatmul.mubr.msk.f32.gmra.mrb[72].mxu0 %vm486_vm2, %v477_v4  ;;  %v5073_v10 = vld [vmem:[%s5500_s11] sm:$0xff]   ;;  %v3427_v56 = vunpack.c.h.bf16 %v3447_v52  ;;  %v3449_v45 = vld [vmem:[%s5500_s11 + $0x28] sm:$0xff]  }
 0x570   : > { %v4151_v60 = vunpack.i.h.bf16 %v4149_v59  ;;  %v4150_v62 = vunpack.i.l.bf16 %v4149_v59  ;;  %v3414_v19 = vunpack.c.l.bf16 %v5073_v10  ;;  %v3415_v47 = vunpack.c.h.bf16 %v5073_v10  ;;  %v3448_v39 = vld [vmem:[%s5500_s11 + $0x20] sm:$0xff]  }
 0x571   : > { %v3430_v58 = vunpack.c.l.bf16 %v3448_v39  ;;  %v3431_v55 = vunpack.c.h.bf16 %v3448_v39  ;;  %v3434_v59 = vunpack.c.l.bf16 %v3449_v45  ;;  %v5129_v4 = vld [vmem:[%s5496_s7 + $0x2] ss:$0 sm:$0xff]  ;;  %v5134_v10 = vld [vmem:[%s5496_s7 + $0x3] ss:$0 sm:$0xff] }
 0x572   : > { %v2336_v1 = vsel %vm2327_vm11, %v2325_v46, %v4150_v62  ;;  %v2337_v3 = vsel %vm2327_vm11, %v2326_v0, %v4151_v60  ;;  %3907 = vmatprep.mubr.msk.f32.mxu0 %vm1980_vm10, %v3414_v19  ;;  %v3435_v60 = vunpack.c.h.bf16 %v3449_v45 }
 0x573   : > { %3884 = vmatprep.mubr.f32.mxu1 %v2336_v1 }
 0x574   : > { %3885 = vmatmul.mubr.f32.gmra.mrb[60].mxu1 %v2337_v3  ;;  %v5119_v3 = vld [vmem:[%s5496_s7] ss:$0 sm:$0xff] }
 0x575   : > { %3925 = vmatprep.mubr.msk.f32.mxu1 %vm1980_vm10, %v3438_v8 }
 0x62e   : > { %v843_v62 = vpop.f32.mrb[70].mxu0 }
 0x62f   : > { %v3874_v9 = vpop.f32.mrb[52].mxu1  ;;  %v3764_v46 = vpop.f32.mrb[71].mxu0 }
 0x630   : > { %v2433_v28 = vadd.f32 %v3874_v9, %v3366_v2  ;;  %v2427_v11 = vpop.f32.mrb[53].mxu1 }
 0x631   : > { %v2428_v63 = vadd.f32 %v3366_v2, %v2427_v11 }
 0x632   : > { %v2477_v5 = vmax.f32 %v2433_v28, 0.0 }
 0x633   : > { %v2476_v12 = vmax.f32 %v2428_v63, 0.0 }
 0x634   : > { %v3877_v15 = vpop.f32.mrb[54].mxu1 }
 0x635   : > { %v4028_v14 = vpack.c.bf16 %v2477_v5, %v2476_v12  ;;  %v2443_v34 = vadd.f32 %v3877_v15, %v3366_v2  ;;  %v2437_v18 = vpop.f32.mrb[55].mxu1 }
 0x636   : > { %v2438_v20 = vadd.f32 %v3366_v2, %v2437_v18 }
 0x637   : > { %v2479_v38 = vmax.f32 %v2443_v34, 0.0  ;;  %4029 = vmatprep.subr.bf16.mxu0 %v4028_v14  ;;  %4048 = vmatprep.subr.bf16.mxu1 %v4028_v14 }
 0x638   : > { %v2478_v24 = vmax.f32 %v2438_v20, 0.0  ;;  %4031 = vmatpush3.bf16.msra.mxu0 %v4028_v14  ;;  %4053 = vmatpush3.bf16.msra.mxu1 %v4028_v14 }
 0x63a   : > { %v4032_v33 = vpack.c.bf16 %v2479_v38, %v2478_v24 }
 0x63b   : > { %v3880_v25 = vpop.f32.mrb[56].mxu1 }
 0x63c   : > { %v2453_v61 = vadd.f32 %v3880_v25, %v3366_v2  ;;  %v2447_v29 = vpop.f32.mrb[57].mxu1  ;;  %4033 = vmatprep.subr.bf16.mxu0 %v4032_v33  ;;  %4049 = vmatprep.subr.bf16.mxu1 %v4032_v33 }
 0x63d   : > { %v2448_v30 = vadd.f32 %v3366_v2, %v2447_v29  ;;  %4035 = vmatpush3.bf16.msra.mxu0 %v4032_v33  ;;  %4054 = vmatpush3.bf16.msra.mxu1 %v4032_v33 }
 0x63e   : > { %v2481_v27 = vmax.f32 %v2453_v61, 0.0 }
 0x63f   : > { %v2480_v21 = vmax.f32 %v2448_v30, 0.0 }
 0x640   : > { %v3883_v13 = vpop.f32.mrb[58].mxu1 }
 0x641   : > { %v4036_v16 = vpack.c.bf16 %v2481_v27, %v2480_v21  ;;  %v2463_v26 = vadd.f32 %v3883_v13, %v3366_v2  ;;  %v2457_v35 = vpop.f32.mrb[59].mxu1 }
 0x642   : > { %v2458_v31 = vadd.f32 %v3366_v2, %v2457_v35  ;;  %v847_v0 = vpop.f32.mrb[72].mxu0 }
 0x643   : > { %v2483_v36 = vmax.f32 %v2463_v26, 0.0  ;;  %4037 = vmatprep.subr.bf16.mxu0 %v4036_v16  ;;  %4050 = vmatprep.subr.bf16.mxu1 %v4036_v16  ;;  %v3767_v1 = vpop.f32.mrb[73].mxu0 }
 0x644   : > { %v2482_v37 = vmax.f32 %v2458_v31, 0.0  ;;  %4039 = vmatpush3.bf16.msra.mxu0 %v4036_v16  ;;  %4055 = vmatpush3.bf16.msra.mxu1 %v4036_v16 }
 0x646   : > { %v4040_v17 = vpack.c.bf16 %v2483_v36, %v2482_v37 }
 0x647   : > { %v3886_v41 = vpop.f32.mrb[60].mxu1 }
 0x648   : > { %v2473_v42 = vadd.f32 %v3886_v41, %v3366_v2  ;;  %v2467_v57 = vpop.f32.mrb[61].mxu1  ;;  %4041 = vmatprep.subr.bf16.mxu0 %v4040_v17  ;;  %4051 = vmatprep.subr.bf16.mxu1 %v4040_v17 }
 0x649   : > { %v2468_v22 = vadd.f32 %v3366_v2, %v2467_v57  ;;  %4043 = vmatpush3.bf16.msra.mxu0 %v4040_v17  ;;  %4056 = vmatpush3.bf16.msra.mxu1 %v4040_v17 }
 0x64a   : > { %v2485_v40 = vmax.f32 %v2473_v42, 0.0 }
 0x64b   : > { %v2484_v43 = vmax.f32 %v2468_v22, 0.0 }
 0x64d   : > { %v4044_v44 = vpack.c.bf16 %v2485_v40, %v2484_v43 }
 0x64f   : > { %4045 = vmatprep.subr.bf16.mxu0 %v4044_v44  ;;  %4052 = vmatprep.subr.bf16.mxu1 %v4044_v44 }
 0x650   : > { %4047 = vmatpush3.bf16.msra.mxu0 %v4044_v44  ;;  %4057 = vmatpush3.bf16.msra.mxu1 %v4044_v44 }
 0x653   : > { %3908 = vmatmul.mubr.msk.f32.vlgmr.msra.gmra.mrb[74].mxu0 %vm1980_vm10, %v3415_v47  ;;  %3926 = vmatmul.mubr.msk.f32.vlgmr.msra.gmra.mrb[62].mxu1 %vm1980_vm10, %v3439_v48 }
 0x654   : > { %3910 = vmatprep.mubr.msk.f32.mxu0 %vm1980_vm10, %v3418_v49 }
 0x657   : > { %3911 = vmatmul.mubr.msk.f32.gmra.mrb[76].mxu0 %vm1980_vm10, %v3419_v50 }
 0x658   : > { %3913 = vmatprep.mubr.msk.f32.mxu0 %vm1980_vm10, %v3422_v51 }
 0x65b   : > { %3914 = vmatmul.mubr.msk.f32.gmra.mrb[78].mxu0 %vm1980_vm10, %v3423_v54 }
 0x65c   : > { %3916 = vmatprep.mubr.msk.f32.mxu0 %vm1980_vm10, %v3426_v6 }
 0x65f   : > { %3917 = vmatmul.mubr.msk.f32.gmra.mrb[80].mxu0 %vm1980_vm10, %v3427_v56 }
 0x660   : > { %3919 = vmatprep.mubr.msk.f32.mxu0 %vm1980_vm10, %v3430_v58 }
 0x663   : > { %3920 = vmatmul.mubr.msk.f32.gmra.mrb[82].mxu0 %vm1980_vm10, %v3431_v55 }
 0x664   : > { %3922 = vmatprep.mubr.msk.f32.mxu0 %vm1980_vm10, %v3434_v59 }
 0x667   : > { %3923 = vmatmul.mubr.msk.f32.gmra.mrb[84].mxu0 %vm1980_vm10, %v3435_v60 }
 0x726   : > { %v3909_v19 = vpop.f32.mrb[74].mxu0  ;;  %v3927_v7 = vpop.f32.mrb[62].mxu1 }
 0x727   : > { %v2697_v8 = vmul.f32 %v3909_v19, %v5119_v3  ;;  %v2714_v2 = vmul.f32 %v3909_v19, %v5124_v53  ;;  %v5139_v9 = vmul.f32 %v3909_v19, %v5129_v4  ;;  %v5142_v28 = vmul.f32 %v3909_v19, %v5134_v10  ;;  %v2622_v11 = vpop.f32.mrb[75].mxu0  ;;  %v5144_v63 = vpop.f32.mrb[63].mxu1 }
 0x728   : > { %v2696_v5 = vmul.f32 %v5119_v3, %v2622_v11  ;;  %v2713_v12 = vmul.f32 %v5124_v53, %v2622_v11  ;;  %v5149_v15 = vmul.f32 %v3927_v7, %v5129_v4  ;;  %v5152_v14 = vmul.f32 %v3927_v7, %v5134_v10 }
 0x729   : > { %v2740_v34 = vrot.slane %v2714_v2, 1  ;;  %v2819_v18 = vrot.slane %v5139_v9, 2  ;;  %v2899_v20 = vrot.slane %v5142_v28, 3  ;;  %v5158_v38 = vmul.f32 %v5124_v53, %v5144_v63 }
 0x72a   : > { %v2739_v24 = vrot.slane %v2713_v12, 1  ;;  %v3912_v33 = vpop.f32.mrb[76].mxu0  ;;  %v2842_v25 = vrot.slane %v5149_v15, 2  ;;  %v2922_v61 = vrot.slane %v5152_v14, 3  ;;  %v5164_v29 = vmul.f32 %v5129_v4, %v5144_v63 }
 0x72b   : > { %v5167_v30 = vmul.f32 %v3912_v33, %v5119_v3  ;;  %v5170_v27 = vmul.f32 %v3912_v33, %v5124_v53  ;;  %v2795_v21 = vmul.f32 %v3912_v33, %v5129_v4  ;;  %v5174_v13 = vmul.f32 %v3912_v33, %v5134_v10  ;;  %v2632_v16 = vpop.f32.mrb[77].mxu0 }
 0x72c   : > { %v2741_v26 = vsel %vm918_vm3, %v2739_v24, %v2740_v34  ;;  %v2698_v35 = vmul.f32 %v5119_v3, %v2632_v16  ;;  %v2715_v31 = vmul.f32 %v5124_v53, %v2632_v16  ;;  %v2794_v36 = vmul.f32 %v5129_v4, %v2632_v16 }
 0x72d   : > { %v2776_v37 = vadd.f32 %v2741_v26, %v2696_v5  ;;  %v2744_v17 = vrot.slane %v5170_v27, 1  ;;  %v2822_v41 = vrot.slane %v2795_v21, 2  ;;  %v2902_v42 = vrot.slane %v5174_v13, 3 }
 0x72e   : > { %v2742_v57 = vrot.slane %v2715_v31, 1  ;;  %v2820_v22 = vrot.slane %v2794_v36, 2  ;;  %v2874_v40 = vmul.f32 %v5134_v10, %v2632_v16  ;;  %v3915_v43 = vpop.f32.mrb[78].mxu0  ;;  %v2762_v44 = vrot.slane %v5158_v38, 1 }
 0x72f   : > { %v5185_v32 = vmul.f32 %v3915_v43, %v5119_v3  ;;  %v5188_v47 = vmul.f32 %v3915_v43, %v5124_v53  ;;  %v5191_v48 = vmul.f32 %v3915_v43, %v5129_v4  ;;  %v5194_v49 = vmul.f32 %v3915_v43, %v5134_v10  ;;  %v2642_v23 = vpop.f32.mrb[79].mxu0 }
 0x730   : > { %v2900_v50 = vrot.slane %v2874_v40, 3  ;;  %v5197_v51 = vmul.f32 %v5119_v3, %v2642_v23  ;;  %v5200_v52 = vmul.f32 %v5124_v53, %v2642_v23  ;;  %v2796_v54 = vmul.f32 %v5129_v4, %v2642_v23 }
 0x731   : > { %v2748_v6 = vrot.slane %v5188_v47, 1  ;;  %v2826_v39 = vrot.slane %v5191_v48, 2  ;;  %v2906_v56 = vrot.slane %v5194_v49, 3  ;;  %v2876_v58 = vmul.f32 %v5134_v10, %v2642_v23 }
 0x732   : > { %v2746_v45 = vrot.slane %v5200_v52, 1  ;;  %v2824_v55 = vrot.slane %v2796_v54, 2  ;;  %v2743_v59 = vsel %vm918_vm3, %v2740_v34, %v2742_v57  ;;  %v2823_v60 = vsel %vm1088_vm4, %v2820_v22, %v2822_v41  ;;  %v3918_v62 = vpop.f32.mrb[80].mxu0 }
 0x733   : > { %v2904_v46 = vrot.slane %v2876_v58, 3  ;;  %v2777_v0 = vadd.f32 %v2743_v59, %v2697_v8  ;;  %v2903_v1 = vsel %vm1531_vm5, %v2900_v50, %v2902_v42  ;;  %v5212_v19 = vmul.f32 %v3918_v62, %v5119_v3  ;;  %v2652_v7 = vpop.f32.mrb[81].mxu0 }
 0x734   : > { %v5215_v2 = vmul.f32 %v3918_v62, %v5124_v53  ;;  %v5218_v9 = vmul.f32 %v3918_v62, %v5129_v4  ;;  %v5221_v11 = vmul.f32 %v3918_v62, %v5134_v10  ;;  %v5224_v5 = vmul.f32 %v5119_v3, %v2652_v7 }
 0x735   : > { %v2857_v12 = vadd.f32 %v2823_v60, %v2777_v0  ;;  %v5227_v8 = vmul.f32 %v5124_v53, %v2652_v7  ;;  %v2798_v34 = vmul.f32 %v5129_v4, %v2652_v7  ;;  %v2878_v24 = vmul.f32 %v5134_v10, %v2652_v7 }
 0x736   : > { %v2752_v33 = vrot.slane %v5215_v2, 1  ;;  %v2830_v27 = vrot.slane %v5218_v9, 2  ;;  %v2910_v21 = vrot.slane %v5221_v11, 3  ;;  %v2821_v13 = vsel %vm1088_vm4, %v2819_v18, %v2820_v22  ;;  %v3921_v16 = vpop.f32.mrb[82].mxu0 }
 0x737   : > { %v2937_v26 = vadd.f32 %v2903_v1, %v2857_v12  ;;  %v2750_v31 = vrot.slane %v5227_v8, 1  ;;  %v2828_v36 = vrot.slane %v2798_v34, 2  ;;  %v2908_v40 = vrot.slane %v2878_v24, 3  ;;  %v2662_v43 = vpop.f32.mrb[83].mxu0 }
 0x738   : > { %v2856_v23 = vadd.f32 %v2821_v13, %v2776_v37  ;;  %v2901_v54 = vsel %vm1531_vm5, %v2899_v20, %v2900_v50  ;;  %v2745_v58 = vsel %vm918_vm3, %v2742_v57, %v2744_v17  ;;  %v2825_v59 = vsel %vm1088_vm4, %v2822_v41, %v2824_v55 }
 0x739   : > { %v2951_v60 = vsel %vm1593_vm6, %v2937_v26, 0.0  ;;  %v2778_v62 = vadd.f32 %v2745_v58, %v2698_v35  ;;  %v2905_v18 = vsel %vm1531_vm5, %v2902_v42, %v2904_v46  ;;  %v2747_v22 = vsel %vm918_vm3, %v2744_v17, %v2746_v45 }
 0x73a   : > { %2952 = vadd.xlane.f32.xlu0 %v2951_v60  ;;  %v2936_v0 = vadd.f32 %v2901_v54, %v2856_v23  ;;  %v2779_v37 = vadd.f32 %v2747_v22, %v5167_v30  ;;  %v2827_v28 = vsel %vm1088_vm4, %v2824_v55, %v2826_v39  ;;  %v2907_v20 = vsel %vm1531_vm5, %v2904_v46, %v2906_v56  ;;  %v3924_v41 = vpop.f32.mrb[84].mxu0 }
 0x73b   : > { %v2858_v35 = vadd.f32 %v2825_v59, %v2778_v62  ;;  %v5254_v42 = vmul.f32 %v3921_v16, %v5119_v3  ;;  %v5257_v57 = vmul.f32 %v3921_v16, %v5124_v53  ;;  %v5260_v17 = vmul.f32 %v3921_v16, %v5129_v4  ;;  %v2672_v30 = vpop.f32.mrb[85].mxu0 }
 0x73c   : > { %v2948_v50 = vsel %vm1593_vm6, %v2936_v0, 0.0  ;;  %v2859_v1 = vadd.f32 %v2827_v28, %v2779_v37  ;;  %v5264_v55 = vmul.f32 %v3921_v16, %v5134_v10  ;;  %v5267_v46 = vmul.f32 %v5119_v3, %v2662_v43 }
 0x73d   : > { %2949 = vadd.xlane.f32.xlu1 %v2948_v50  ;;  %v2938_v7 = vadd.f32 %v2905_v18, %v2858_v35  ;;  %v2756_v12 = vrot.slane %v5257_v57, 1  ;;  %v2834_v34 = vrot.slane %v5260_v17, 2  ;;  %v2721_v24 = vmul.f32 %v5124_v53, %v2662_v43 }
 0x73e   : > { %v2939_v13 = vadd.f32 %v2907_v20, %v2859_v1  ;;  %v2914_v26 = vrot.slane %v5264_v55, 3  ;;  %v2800_v23 = vmul.f32 %v5129_v4, %v2662_v43  ;;  %v2880_v54 = vmul.f32 %v5134_v10, %v2662_v43 }
 0x73f   : > { %v2954_v16 = vsel %vm1593_vm6, %v2938_v7, 0.0  ;;  %v2754_v58 = vrot.slane %v2721_v24, 1  ;;  %v2749_v59 = vsel %vm918_vm3, %v2746_v45, %v2748_v6  ;;  %v2829_v60 = vsel %vm1088_vm4, %v2826_v39, %v2828_v36 }
 0x740   : > { %2955 = vadd.xlane.f32.xlu0 %v2954_v16  ;;  %v2957_v62 = vsel %vm1593_vm6, %v2939_v13, 0.0  ;;  %v2832_v18 = vrot.slane %v2800_v23, 2  ;;  %v2912_v22 = vrot.slane %v2880_v54, 3  ;;  %v2780_v43 = vadd.f32 %v2749_v59, %v5197_v51 }
 0x741   : > { %2958 = vadd.xlane.f32.xlu1 %v2957_v62  ;;  %v2909_v0 = vsel %vm1531_vm5, %v2906_v56, %v2908_v40  ;;  %v2751_v48 = vsel %vm918_vm3, %v2748_v6, %v2750_v31  ;;  %v2831_v52 = vsel %vm1088_vm4, %v2828_v36, %v2830_v27  ;;  %v2911_v39 = vsel %vm1531_vm5, %v2908_v40, %v2910_v21 }
 0x742   : > { %v2860_v51 = vadd.f32 %v2829_v60, %v2780_v43  ;;  %v2781_v45 = vadd.f32 %v2751_v48, %v5185_v32  ;;  %v2707_v49 = vmul.f32 %v3924_v41, %v5119_v3  ;;  %v2724_v56 = vmul.f32 %v3924_v41, %v5124_v53 }
 0x743   : > { %v2803_v37 = vmul.f32 %v3924_v41, %v5129_v4  ;;  %v2883_v47 = vmul.f32 %v3924_v41, %v5134_v10  ;;  %v2706_v6 = vmul.f32 %v5119_v3, %v2672_v30  ;;  %v2723_v28 = vmul.f32 %v5124_v53, %v2672_v30 }
 0x744   : > { %v2940_v36 = vadd.f32 %v2909_v0, %v2860_v51  ;;  %v2861_v20 = vadd.f32 %v2831_v52, %v2781_v45  ;;  %v2760_v35 = vrot.slane %v2724_v56, 1  ;;  %v2802_v40 = vmul.f32 %v5129_v4, %v2672_v30 }
 0x745   : > { %v2838_v17 = vrot.slane %v2803_v37, 2  ;;  %v2918_v50 = vrot.slane %v2883_v47, 3  ;;  %v2758_v32 = vrot.slane %v2723_v28, 1  ;;  %v2882_v1 = vmul.f32 %v5134_v10, %v2672_v30 }
 0x746   : > { %v2960_v55 = vsel %vm1593_vm6, %v2940_v36, 0.0  ;;  %v2941_v7 = vadd.f32 %v2911_v39, %v2861_v20  ;;  %v2836_v24 = vrot.slane %v2802_v40, 2  ;;  %v2753_v3 = vsel %vm918_vm3, %v2750_v31, %v2752_v33 }
 0x747   : > { %2961 = vadd.xlane.f32.xlu0 %v2960_v55  ;;  %v2761_v53 = vsel %vm918_vm3, %v2758_v32, %v2760_v35  ;;  %v2916_v41 = vrot.slane %v2882_v1, 3  ;;  %v2782_v4 = vadd.f32 %v2753_v3, %v5224_v5  ;;  %v2833_v30 = vsel %vm1088_vm4, %v2830_v27, %v2832_v18 }
 0x748   : > { %v2963_v13 = vsel %vm1593_vm6, %v2941_v7, 0.0  ;;  %v2786_v23 = vadd.f32 %v2761_v53, %v2706_v6  ;;  %v2913_v54 = vsel %vm1531_vm5, %v2910_v21, %v2912_v22  ;;  %v2763_v8 = vsel %vm918_vm3, %v2760_v35, %v2762_v44 }
 0x749   : > { %2964 = vadd.xlane.f32.xlu1 %v2963_v13  ;;  %v2862_v31 = vadd.f32 %v2833_v30, %v2782_v4  ;;  %v2840_v16 = vrot.slane %v5164_v29, 2  ;;  %v2884_v9 = vmul.f32 %v5134_v10, %v5144_v63  ;;  %v2755_v5 = vsel %vm918_vm3, %v2752_v33, %v2754_v58 }
 0x74a   : > { %v2783_v27 = vadd.f32 %v2755_v5, %v5212_v19  ;;  %v2835_v11 = vsel %vm1088_vm4, %v2832_v18, %v2834_v34  ;;  %v2915_v21 = vsel %vm1531_vm5, %v2912_v22, %v2914_v26  ;;  %v2757_v38 = vsel %vm918_vm3, %v2754_v58, %v2756_v12 }
 0x74b   : > { %v2942_v44 = vadd.f32 %v2913_v54, %v2862_v31  ;;  %v2920_v59 = vrot.slane %v2884_v9, 3  ;;  %v2784_v29 = vadd.f32 %v2757_v38, %v5267_v46  ;;  %v2837_v10 = vsel %vm1088_vm4, %v2834_v34, %v2836_v24 }
 0x74c   : > { %v2863_v63 = vadd.f32 %v2835_v11, %v2783_v27  ;;  %v2917_v2 = vsel %vm1531_vm5, %v2914_v26, %v2916_v41  ;;  %v2759_v19 = vsel %vm918_vm3, %v2756_v12, %v2758_v32  ;;  %v2839_v33 = vsel %vm1088_vm4, %v2836_v24, %v2838_v17 }
 0x74d   : > { %v2966_v60 = vsel %vm1593_vm6, %v2942_v44, 0.0  ;;  %v2864_v62 = vadd.f32 %v2837_v10, %v2784_v29  ;;  %v2785_v58 = vadd.f32 %v2759_v19, %v5254_v42  ;;  %v2919_v18 = vsel %vm1531_vm5, %v2916_v41, %v2918_v50  ;;  %v3020_v19 = vld [vmem:[%s5501_s12 + $0x28] sm:$0xff] }
 0x74e   : > { %2967 = vadd.xlane.f32.xlu0 %v2966_v60  ;;  %v2943_v46 = vadd.f32 %v2915_v21, %v2863_v63  ;;  %v2841_v34 = vsel %vm1088_vm4, %v2838_v17, %v2840_v16  ;;  %v2921_v22 = vsel %vm1531_vm5, %v2918_v50, %v2920_v59  ;;  %v2787_v26 = vadd.f32 %v2763_v8, %v2707_v49  ;;  %v3019_v60 = vld [vmem:[%s5501_s12 + $0x20] sm:$0xff] }
 0x74f   : > { %v2944_v43 = vadd.f32 %v2917_v2, %v2864_v62  ;;  %v2865_v57 = vadd.f32 %v2839_v33, %v2785_v58  ;;  %v2866_v0 = vadd.f32 %v2841_v34, %v2786_v23  ;;  %v2843_v12 = vsel %vm1088_vm4, %v2840_v16, %v2842_v25  ;;  %v3018_v33 = vld [vmem:[%s5501_s12 + $0x18] sm:$0xff]  ;;  %v3023_v58 = vld [vmem:[%s5501_s12 + $0x40] sm:$0xff] }
 0x750   : > { %v2969_v48 = vsel %vm1593_vm6, %v2943_v46, 0.0  ;;  %v2867_v52 = vadd.f32 %v2843_v12, %v2787_v26  ;;  %v2923_v42 = vsel %vm1531_vm5, %v2920_v59, %v2922_v61  ;;  %v4169_v49 = vmov 0   ;;  %v3385_v61 = vld [vmem:[#allocation2] ss:$0 sm:$0xff]  ;;  %v3016_v26 = vld [vmem:[%s5501_s12 + $0x8] sm:$0xff]  ;;  %v3022_v12 = vld [vmem:[%s5501_s12 + $0x38] sm:$0xff] }
 0x751   : > { %2970 = vadd.xlane.f32.xlu1 %v2969_v48  ;;  %v2972_v39 = vsel %vm1593_vm6, %v2944_v43, 0.0  ;;  %v2945_v51 = vadd.f32 %v2919_v18, %v2865_v57  ;;  %v2946_v45 = vadd.f32 %v2921_v22, %v2866_v0  ;;  %4152 = vset.pattern.permute.xlu0 %v4169_v49  ;;  %v3017_v18 = vld [vmem:[%s5501_s12 + $0x10] sm:$0xff]  ;;  %v3015_v22 = vld [vmem:[%s5501_s12] sm:$0xff] }
 0x752   : > { %2973 = vadd.xlane.f32.xlu0 %v2972_v39  ;;  %v2947_v56 = vadd.f32 %v2923_v42, %v2867_v52  ;;  %4153 = vset.pattern.permute.xlu1 %v4169_v49  ;;  %v3021_v0 = vld [vmem:[%s5501_s12 + $0x30] sm:$0xff]  ;;  %v3026_v52 = vld [vmem:[%s5501_s12 + $0x58] sm:$0xff] }
 0x753   : > { %v2975_v15 = vsel %vm1593_vm6, %v2945_v51, 0.0  ;;  %v2978_v25 = vsel %vm1593_vm6, %v2946_v45, 0.0  ;;  %v3024_v51 = vld [vmem:[%s5501_s12 + $0x48] sm:$0xff]  ;;  %v3025_v45 = vld [vmem:[%s5501_s12 + $0x50] sm:$0xff] }
 0x754   : > { %v2981_v14 = vsel %vm1593_vm6, %v2947_v56, 0.0 }
 0x755   : > { %2976 = vadd.xlane.f32.xlu1 %v2975_v15 }
 0x756   : > { %2979 = vadd.xlane.f32.xlu0 %v2978_v25 }
 0x759   : > { %2982 = vadd.xlane.f32.xlu1 %v2981_v14 }
 0x7c7   : > { %v2953_v37 = vpop.xlane.xlu0 %2952 }
 0x7c8   : > { %v2992_v47 = vadd.f32 %v3385_v61, %v2953_v37 }
 0x7ca   : > { %v3004_v6 = vmax.f32 %v2992_v47, 0.0  ;;  %v2950_v28 = vpop.xlane.xlu1 %2949  ;;  %v3027_v47 = vld [vmem:[%s5501_s12 + $0x60] sm:$0xff] }
 0x7cb   : > { %v2991_v36 = vadd.f32 %v3385_v61, %v2950_v28 }
 0x7cc   : > { %3058 = vperm.xlu1 %4153, %v3004_v6   ;;  %v3028_v6 = vld [vmem:[%s5501_s12 + $0x68] sm:$0xff] }
 0x7cd   : > { %v3003_v20 = vmax.f32 %v2991_v36, 0.0  ;;  %v2956_v35 = vpop.xlane.xlu0 %2955 }
 0x7ce   : > { %v2993_v40 = vadd.f32 %v3385_v61, %v2956_v35  ;;  %v2959_v17 = vpop.xlane.xlu1 %2958 }
 0x7cf   : > { %3053 = vperm.xlu0 %4152, %v3003_v20   ;;  %v2994_v32 = vadd.f32 %v3385_v61, %v2959_v17 }
 0x7d0   : > { %v3005_v50 = vmax.f32 %v2993_v40, 0.0 }
 0x7d1   : > { %v3006_v1 = vmax.f32 %v2994_v32, 0.0 }
 0x7d2   : > { %3063 = vperm.xlu1 %4153, %v3005_v50   ;;  %v3032_v50 = vld [vmem:[%s5501_s12 + $0x88] sm:$0xff] }
 0x7d4   : > { %v2962_v55 = vpop.xlane.xlu0 %2961 }
 0x7d5   : > { %v2995_v7 = vadd.f32 %v3385_v61, %v2962_v55 }
 0x7d6   : > { %3068 = vperm.xlu1 %4153, %v3006_v1   ;;  %v2965_v24 = vpop.xlane.xlu1 %2964 }
 0x7d7   : > { %v3007_v3 = vmax.f32 %v2995_v7, 0.0  ;;  %v2996_v53 = vadd.f32 %v3385_v61, %v2965_v24  ;;  %v3030_v7 = vld [vmem:[%s5501_s12 + $0x78] sm:$0xff]  ;;  %v3031_v24 = vld [vmem:[%s5501_s12 + $0x80] sm:$0xff] }
 0x7d9   : > { %v3008_v4 = vmax.f32 %v2996_v53, 0.0 }
 0x7da   : > { %3073 = vperm.xlu1 %4153, %v3007_v3  }
 0x7db   : > { %v2968_v41 = vpop.xlane.xlu0 %2967 }
 0x7dc   : > { %v2997_v30 = vadd.f32 %v3385_v61, %v2968_v41 }
 0x7de   : > { %3078 = vperm.xlu1 %4153, %v3008_v4   ;;  %v2971_v13 = vpop.xlane.xlu1 %2970  ;;  %v3009_v23 = vmax.f32 %v2997_v30, 0.0  ;;  %v3035_v30 = vld [vmem:[%s5501_s12 + $0xa0] sm:$0xff] }
 0x7df   : > { %v2998_v54 = vadd.f32 %v3385_v61, %v2971_v13  ;;  %v2974_v8 = vpop.xlane.xlu0 %2973 }
 0x7e0   : > { %v2999_v5 = vadd.f32 %v3385_v61, %v2974_v8  ;;  %v3033_v8 = vld [vmem:[%s5501_s12 + $0x90] sm:$0xff] }
 0x7e1   : > { %v3010_v9 = vmax.f32 %v2998_v54, 0.0 }
 0x7e2   : > { %3083 = vperm.xlu1 %4153, %v3009_v23   ;;  %v2977_v31 = vpop.xlane.xlu1 %2976  ;;  %v3011_v44 = vmax.f32 %v2999_v5, 0.0 }
 0x7e3   : > { %v3000_v16 = vadd.f32 %v3385_v61, %v2977_v31  ;;  %v2980_v11 = vpop.xlane.xlu0 %2979 }
 0x7e4   : > { %v3001_v59 = vadd.f32 %v3385_v61, %v2980_v11 }
 0x7e5   : > { %v3012_v27 = vmax.f32 %v3000_v16, 0.0 }
 0x7e6   : > { %3088 = vperm.xlu1 %4153, %v3010_v9   ;;  %v2983_v21 = vpop.xlane.xlu1 %2982  ;;  %v3013_v10 = vmax.f32 %v3001_v59, 0.0 }
 0x7e7   : > { %v3002_v38 = vadd.f32 %v3385_v61, %v2983_v21  ;;  %3098 = vperm.xlu0 %4152, %v3012_v27   ;;  %v3029_v61 = vld [vmem:[%s5501_s12 + $0x70] sm:$0xff]  ;;  %v3034_v27 = vld [vmem:[%s5501_s12 + $0x98] sm:$0xff] }
 0x7e9   : > { %v3014_v29 = vmax.f32 %v3002_v38, 0.0 }
 0x7ea   : > { %3093 = vperm.xlu1 %4153, %v3011_v44  }
 0x7eb   : > { %3108 = vperm.xlu0 %4152, %v3014_v29  }
 0x7ee   : > { %3103 = vperm.xlu1 %4153, %v3013_v10  }
 0x84b   : > { %v3059_v63 = vpop.permute.xlu1 %3058 }
 0x84c   : > { %v3116_v34 = vmul.f32 %v3059_v63, %v3020_v19  ;;  %v3114_v43 = vmul.f32 %v3059_v63, %v3018_v33  ;;  %v3115_v57 = vmul.f32 %v3059_v63, %v3019_v60  ;;  %v3036_v63 = vld [vmem:[%s5501_s12 + $0xa8] sm:$0xff]  ;;  %v3038_v19 = vld [vmem:[%s5501_s12 + $0xb8] sm:$0xff] }
 0x84e   : > { %v3054_v46 = vpop.permute.xlu0 %3053  ;;  %v3183_v15 = vsel %vm3181_vm12, %v3116_v34, 0.0 }
 0x84f   : > { %v3113_v39 = vmul.f32 %v3054_v46, %v3017_v18  ;;  %v3111_v49 = vmul.f32 %v3054_v46, %v3015_v22  ;;  %v3112_v56 = vmul.f32 %v3054_v46, %v3016_v26 }
 0x851   : > { %v3064_v2 = vpop.permute.xlu1 %3063  ;;  %v3147_v28 = vadd.f32 %v3114_v43, %v3111_v49  ;;  %v3164_v36 = vadd.f32 %v3115_v57, %v3112_v56  ;;  %v3182_v17 = vsel %vm3181_vm12, %v3113_v39, 0.0  ;;  %v3044_v57 = vld [vmem:[%s5501_s12 + $0xe8] sm:$0xff]  ;;  %v3041_v39 = vld [vmem:[%s5501_s12 + $0xd0] sm:$0xff]  ;;  %v3042_v49 = vld [vmem:[%s5501_s12 + $0xd8] sm:$0xff] }
 0x852   : > { %v3119_v48 = vmul.f32 %v3064_v2, %v3023_v58  ;;  %v3117_v25 = vmul.f32 %v3064_v2, %v3021_v0  ;;  %v3118_v14 = vmul.f32 %v3064_v2, %v3022_v12  ;;  %v3184_v55 = vadd.f32 %v3183_v15, %v3182_v17  ;;  %v3037_v2 = vld [vmem:[%s5501_s12 + $0xb0] sm:$0xff] }
 0x854   : > { %v3185_v20 = vsel %vm3181_vm12, %v3119_v48, 0.0  ;;  %v3148_v41 = vadd.f32 %v3147_v28, %v3117_v25  ;;  %v3165_v4 = vadd.f32 %v3164_v36, %v3118_v14  ;;  %v3043_v14 = vld [vmem:[%s5501_s12 + $0xe0] sm:$0xff] }
 0x855   : > { %v3069_v62 = vpop.permute.xlu1 %3068  ;;  %v3186_v23 = vadd.f32 %v3185_v20, %v3184_v55  ;;  %v3047_v55 = vld [vmem:[%s5501_s12 + $0x100] sm:$0xff] }
 0x856   : > { %v3122_v37 = vmul.f32 %v3069_v62, %v3026_v52  ;;  %v3120_v35 = vmul.f32 %v3069_v62, %v3024_v51  ;;  %v3121_v40 = vmul.f32 %v3069_v62, %v3025_v45  ;;  %v3039_v52 = vld [vmem:[%s5501_s12 + $0xc0] sm:$0xff] }
 0x858   : > { %v3187_v13 = vsel %vm3181_vm12, %v3122_v37, 0.0  ;;  %v3149_v9 = vadd.f32 %v3148_v41, %v3120_v35  ;;  %v3166_v5 = vadd.f32 %v3165_v4, %v3121_v40  ;;  %v3045_v35 = vld [vmem:[%s5501_s12 + $0xf0] sm:$0xff]  ;;  %v3046_v40 = vld [vmem:[%s5501_s12 + $0xf8] sm:$0xff]  ;;  %v3048_v4 = vld [vmem:[%s5501_s12 + $0x108] sm:$0xff] }
 0x859   : > { %v3074_v42 = vpop.permute.xlu1 %3073  ;;  %v3188_v29 = vadd.f32 %v3187_v13, %v3186_v23 }
 0x85a   : > { %v3125_v1 = vmul.f32 %v3074_v42, %v3029_v61  ;;  %v3123_v3 = vmul.f32 %v3074_v42, %v3027_v47  ;;  %v3124_v53 = vmul.f32 %v3074_v42, %v3028_v6  ;;  %v3040_v42 = vld [vmem:[%s5501_s12 + $0xc8] sm:$0xff] }
 0x85c   : > { %v3189_v21 = vsel %vm3181_vm12, %v3125_v1, 0.0  ;;  %v3150_v44 = vadd.f32 %v3149_v9, %v3123_v3  ;;  %v3167_v59 = vadd.f32 %v3166_v5, %v3124_v53 }
 0x85d   : > { %v3079_v32 = vpop.permute.xlu1 %3078  ;;  %v3190_v18 = vadd.f32 %v3189_v21, %v3188_v29 }
 0x85e   : > { %v3128_v54 = vmul.f32 %v3079_v32, %v3032_v50  ;;  %v3126_v31 = vmul.f32 %v3079_v32, %v3030_v7  ;;  %v3127_v16 = vmul.f32 %v3079_v32, %v3031_v24  ;;  %v3050_v7 = vld [vmem:[%s5501_s12 + $0x118] sm:$0xff] }
 0x860   : > { %v3191_v33 = vsel %vm3181_vm12, %v3128_v54, 0.0  ;;  %v3151_v62 = vadd.f32 %v3150_v44, %v3126_v31  ;;  %v3168_v58 = vadd.f32 %v3167_v59, %v3127_v16 }
 0x861   : > { %v3084_v11 = vpop.permute.xlu1 %3083  ;;  %v3192_v12 = vadd.f32 %v3191_v33, %v3190_v18  ;;  %v3218_v33 = vlaneseq }
 0x862   : > { %v3131_v38 = vmul.f32 %v3084_v11, %v3035_v30  ;;  %v3129_v10 = vmul.f32 %v3084_v11, %v3033_v8  ;;  %v3130_v60 = vmul.f32 %v3084_v11, %v3034_v27  ;;  %v3049_v30 = vld [vmem:[%s5501_s12 + $0x110] sm:$0xff] }
 0x863   : > { %vm3240_vm13 = vcmp.lt.s32.totalorder %v3218_v33, 289 }
 0x864   : > { %v3193_v34 = vsel %vm3181_vm12, %v3131_v38, 0.0  ;;  %v3152_v48 = vadd.f32 %v3151_v62, %v3129_v10  ;;  %v3169_v51 = vadd.f32 %v3168_v58, %v3130_v60  ;;  %v4170_v60 = vmov 1966171168  }
 0x865   : > { %v3089_v46 = vpop.permute.xlu1 %3088  ;;  %v3194_v56 = vadd.f32 %v3193_v34, %v3192_v12  ;;  %v3216_v62 = vunpack.c.l.s4 %v4170_v60 }
 0x866   : > { %v3132_v22 = vmul.f32 %v3089_v46, %v3036_v63  ;;  %v3133_v26 = vmul.f32 %v3089_v46, %v3037_v2  ;;  %v3134_v43 = vmul.f32 %v3089_v46, %v3038_v19  ;;  %v3099_v0 = vpop.permute.xlu0 %3098 }
 0x867   : > { %v3140_v61 = vmul.f32 %v3099_v0, %v3044_v57  ;;  %v3138_v20 = vmul.f32 %v3099_v0, %v3042_v49  ;;  %v3139_v1 = vmul.f32 %v3099_v0, %v3043_v14  ;;  %v3217_v57 = vunpack.c.0.s8 %v3216_v62 }
 0x868   : > { %v3195_v45 = vsel %vm3181_vm12, %v3134_v43, 0.0  ;;  %v3153_v15 = vadd.f32 %v3152_v48, %v3132_v22  ;;  %v3170_v37 = vadd.f32 %v3169_v51, %v3133_v26  ;;  %v3219_v43 = vshrl.u32 %v3218_v33, 7 }
 0x869   : > { %v3094_v25 = vpop.permute.xlu1 %3093  ;;  %v3196_v36 = vadd.f32 %v3195_v45, %v3194_v56  ;;  %v3199_v53 = vsel %vm3181_vm12, %v3140_v61, 0.0 }
 0x86a   : > { %v3135_v47 = vmul.f32 %v3094_v25, %v3039_v52  ;;  %v3136_v6 = vmul.f32 %v3094_v25, %v3040_v42  ;;  %v3137_v28 = vmul.f32 %v3094_v25, %v3041_v39  ;;  %v3109_v24 = vpop.permute.xlu0 %3108  ;;  %v3220_v51 = vsub.s32 %v3217_v57, %v3219_v43 }
 0x86b   : > { %v3146_v9 = vmul.f32 %v3109_v24, %v3050_v7  ;;  %v3144_v11 = vmul.f32 %v3109_v24, %v3048_v4  ;;  %v3145_v21 = vmul.f32 %v3109_v24, %v3049_v30 }
 0x86c   : > { %v3154_v17 = vadd.f32 %v3153_v15, %v3135_v47  ;;  %v3171_v50 = vadd.f32 %v3170_v37, %v3136_v6  ;;  %v3197_v32 = vsel %vm3181_vm12, %v3137_v28, 0.0 }
 0x86d   : > { %v3198_v3 = vadd.f32 %v3197_v32, %v3196_v36  ;;  %v3104_v41 = vpop.permute.xlu1 %3103  ;;  %v3203_v10 = vsel %vm3181_vm12, %v3146_v9, 0.0 }
 0x86e   : > { %v3155_v13 = vadd.f32 %v3154_v17, %v3138_v20  ;;  %v3172_v23 = vadd.f32 %v3171_v50, %v3139_v1  ;;  %v3141_v54 = vmul.f32 %v3104_v41, %v3045_v35  ;;  %v3142_v8 = vmul.f32 %v3104_v41, %v3046_v40 }
 0x86f   : > { %v3200_v31 = vadd.f32 %v3199_v53, %v3198_v3  ;;  %v3143_v16 = vmul.f32 %v3104_v41, %v3047_v55 }
 0x870   : > { %v3156_v5 = vadd.f32 %v3155_v13, %v3141_v54  ;;  %v3173_v27 = vadd.f32 %v3172_v23, %v3142_v8 }
 0x871   : > { %v3201_v38 = vsel %vm3181_vm12, %v3143_v16, 0.0 }
 0x872   : > { %v3202_v44 = vadd.f32 %v3201_v38, %v3200_v31  ;;  %v3157_v59 = vadd.f32 %v3156_v5, %v3144_v11  ;;  %v3174_v29 = vadd.f32 %v3173_v27, %v3145_v21 }
 0x874   : > { %v3158_v63 = vrot.slane %v3157_v59, 4  ;;  %v3175_v2 = vrot.slane %v3174_v29, 4  ;;  %v3204_v19 = vadd.f32 %v3203_v10, %v3202_v44 }
 0x876   : > { %v3159_v58 = vadd.f32 %v3158_v63, %v3157_v59  ;;  %v3176_v18 = vadd.f32 %v3175_v2, %v3174_v29  ;;  %v3205_v46 = vrot.slane %v3204_v19, 4 }
 0x878   : > { %v3160_v34 = vrot.slane %v3159_v58, 2  ;;  %v3177_v22 = vrot.slane %v3176_v18, 2  ;;  %v3206_v26 = vadd.f32 %v3205_v46, %v3204_v19 }
 0x87a   : > { %v3161_v0 = vadd.f32 %v3160_v34, %v3159_v58  ;;  %v3178_v12 = vadd.f32 %v3177_v22, %v3176_v18  ;;  %v3207_v48 = vrot.slane %v3206_v26, 2 }
 0x87c   : > { %v3162_v52 = vrot.slane %v3161_v0, 1  ;;  %v3179_v42 = vrot.slane %v3178_v12, 1  ;;  %v3208_v39 = vadd.f32 %v3207_v48, %v3206_v26 }
 0x87e   : > { %v3163_v45 = vadd.f32 %v3162_v52, %v3161_v0  ;;  %v3180_v49 = vadd.f32 %v3179_v42, %v3178_v12  ;;  %v3209_v56 = vrot.slane %v3208_v39, 1 }
 0x880   : > { %v3210_v15 = vadd.f32 %v3209_v56, %v3208_v39  ;;  %v3214_v25 = vcombine.low %v3163_v45, %v3180_v49 }
 0x882   : > { %v3221_v14 = vrot.slane %v3214_v25, %v3220_v51  ;;  %v3228_v61 = vrot.slane %v3210_v15, %v3220_v51 }
 0x884   : > { %v3229_v37 = vcombine.low %v3221_v14, %v3228_v61 }
 0x886   : > { %v3236_v47 = vrot.slane %v3229_v37, %v3220_v51 }
 0x888   : > { %3242 = vst.msk [vmem:[%s440_s8] sm:$0x7] %vm3240_vm13, %v3236_v47 }
 0x889 PF: > { %s25_s27 = sadd.s32 1, %s4160_s27  }
 0x88a   : > { %p22_p4 = scmp.ge.s32.totalorder %s25_s27, 4  }
 0x88c   :  { %24 = sbr.rel (!%p22_p4) target bundleno = 3 (0x3), region = 102 }

</bundles_post_ra>
